<compile_context>
chip_gen: v7x
topology: tpu7x:2x2x1
jax: 0.10.0
libtpu: 0.0.40
codegen_flags: <defaults>
</compile_context>

<pallas_src>
import math
from functools import partial

import jax
import jax.numpy as jnp
from jax import lax
from jax.experimental import pallas as pl
from jax.experimental.pallas import tpu as pltpu

LANE = 128  # classifier logits padded to a lane-dense 128-wide slab


# ----------------------------- in-kernel helpers -----------------------------

def _layernorm(x, g, b, eps=1e-12):
    mu = jnp.mean(x, axis=-1, keepdims=True)
    var = jnp.mean((x - mu) ** 2, axis=-1, keepdims=True)
    return (x - mu) * lax.rsqrt(var + eps) * g + b


def _gelu(x):
    # TODO(synk): HF BERT default activation is exact erf-GELU; tanh approximation
    # is used here for safe Mosaic lowering (small numeric difference).
    return 0.5 * x * (1.0 + jnp.tanh(0.7978845608028654 * (x + 0.044715 * x * x * x)))


# ------------------------------- fused BERT kernel ----------------------------

def _bert_forward_kernel(num_heads, num_layers, B, N,
                         emb_ref, mask_ref,                 # (B*N, H) f32, (B, N) f32
                         emb_ln_g, emb_ln_b,                # (1, H) f32
                         w_qkv, b_qkv,                      # (L, H, 3H) bf16, (L, 1, 3H) f32
                         w_ao, b_ao,                        # (L, H, H) bf16, (L, 1, H) f32
                         ln1_g, ln1_b,                      # (L, 1, H) f32
                         w_i, b_i,                          # (L, H, I) bf16, (L, 1, I) f32
                         w_o2, b_o2,                        # (L, I, H) bf16, (L, 1, H) f32
                         ln2_g, ln2_b,                      # (L, 1, H) f32
                         cls_w, cls_b,                      # (H, 128) bf16, (1, 128) f32
                         out_ref):                          # (B*N, 128) f32
    BN, H = emb_ref.shape
    hd = H // num_heads
    scale = 1.0 / math.sqrt(hd)

    # embeddings -> LayerNorm (activations stay resident in VMEM / vregs)
    x = _layernorm(emb_ref[...], emb_ln_g[...], emb_ln_b[...])           # (BN, H) f32

    # HF-style additive attention bias built in-kernel from the (B, N) mask
    bias = ((1.0 - mask_ref[...]) * -1e9)[:, None, :]                    # (B, 1, N)

    for l in range(num_layers):        # static unroll over layers (L is tiny)
        xb = x.astype(jnp.bfloat16)
        # fused Q/K/V projection over the whole (B*N) row slab
        qkv = (jnp.dot(xb, w_qkv[l], preferred_element_type=jnp.float32)
               + b_qkv[l])                                               # (BN, 3H) f32
        wo_l = w_ao[l]                                                   # (H, H) bf16

        attn = jnp.zeros((BN, H), jnp.float32)
        for h in range(num_heads):
            qh = qkv[:, h * hd:(h + 1) * hd].reshape(B, N, hd).astype(jnp.bfloat16)
            kh = qkv[:, H + h * hd:H + (h + 1) * hd].reshape(B, N, hd).astype(jnp.bfloat16)
            vh = qkv[:, 2 * H + h * hd:2 * H + (h + 1) * hd].reshape(B, N, hd).astype(jnp.bfloat16)

            s = (jnp.einsum('bqd,bkd->bqk', qh, kh,
                            preferred_element_type=jnp.float32) * scale + bias)
            s = s - jnp.max(s, axis=-1, keepdims=True)
            p = jnp.exp(s)
            p = p * pl.reciprocal(jnp.sum(p, axis=-1, keepdims=True), approx=True)

            ctx = jnp.einsum('bqk,bkd->bqd', p.astype(jnp.bfloat16), vh,
                             preferred_element_type=jnp.float32)          # (B, N, hd)
            # fold head output directly into the output projection (no lane concat)
            attn = attn + jnp.dot(ctx.reshape(BN, hd).astype(jnp.bfloat16),
                                  wo_l[h * hd:(h + 1) * hd, :],
                                  preferred_element_type=jnp.float32)

        attn = attn + b_ao[l]
        h1 = _layernorm(x + attn, ln1_g[l], ln1_b[l])
        mid = _gelu(jnp.dot(h1.astype(jnp.bfloat16), w_i[l],
                            preferred_element_type=jnp.float32) + b_i[l])
        ffn = (jnp.dot(mid.astype(jnp.bfloat16), w_o2[l],
                       preferred_element_type=jnp.float32) + b_o2[l])
        x = _layernorm(h1 + ffn, ln2_g[l], ln2_b[l])

    # lane-dense (padded to 128) classifier output
    out_ref[...] = (jnp.dot(x.astype(jnp.bfloat16), cls_w[...],
                            preferred_element_type=jnp.float32)
                    + cls_b[...]).astype(out_ref.dtype)


def bert_token_classifier_forward(input_ids, attention_mask, prep, num_heads, num_labels):
    """Full BERT token-classifier forward: 1 Pallas call, everything VMEM-resident."""
    B, N = input_ids.shape
    H = prep["word_emb"].shape[1]
    num_layers = prep["w_qkv"].shape[0]
    lpad = prep["cls_w"].shape[1]

    # embedding gather is glue (data-dependent gather stays in XLA)
    emb = (jnp.take(prep["word_emb"], input_ids, axis=0)
           + prep["pos_emb"][:N][None, :, :]
           + prep["type_emb"][0][None, None, :]).reshape(B * N, H)
    maskf = attention_mask.astype(jnp.float32)

    ins = [emb, maskf,
           prep["emb_ln_g"], prep["emb_ln_b"],
           prep["w_qkv"], prep["b_qkv"], prep["w_ao"], prep["b_ao"],
           prep["ln1_g"], prep["ln1_b"],
           prep["w_i"], prep["b_i"], prep["w_o2"], prep["b_o2"],
           prep["ln2_g"], prep["ln2_b"],
           prep["cls_w"], prep["cls_b"]]

    logits_pad = pl.pallas_call(
        partial(_bert_forward_kernel, num_heads, num_layers, B, N),
        out_shape=jax.ShapeDtypeStruct((B * N, lpad), jnp.float32),
        in_specs=[pl.BlockSpec(memory_space=pltpu.MemorySpace.VMEM)] * len(ins),
        out_specs=pl.BlockSpec(memory_space=pltpu.MemorySpace.VMEM),
    )(*ins)
    # TODO(synk): at real B*N / hidden sizes, tile rows with a 'parallel' grid axis
    # (v7x dual TensorCore) and re-derive VMEM sizing (64 MiB on v7x).
    return logits_pad[:, :num_labels].reshape(B, N, num_labels)


# ------------------------- CRF Viterbi decode (glue) --------------------------
# TODO(synk): sequential Viterbi backtracking over tiny (L x L) tables is kept in
# lax.scan rather than a Pallas kernel; torch pad_sequence(PAD_TOKEN_ID) is replaced
# by full-length tags (padded positions are overwritten to 0 downstream anyway).

def viterbi_decode(emissions, mask, start_trans, end_trans, trans):
    B, N, L = emissions.shape
    maskb = mask.astype(bool)
    score0 = start_trans[None, :] + emissions[:, 0]

    def fwd(score, xs):
        emit_t, mask_t = xs
        cand = score[:, :, None] + trans[None, :, :] + emit_t[:, None, :]   # (B, L, L)
        next_score = jnp.max(cand, axis=1)
        best_prev = jnp.argmax(cand, axis=1)
        new_score = jnp.where(mask_t[:, None], next_score, score)
        bp = jnp.where(mask_t[:, None], best_prev,
                       jnp.broadcast_to(jnp.arange(L, dtype=best_prev.dtype), (B, L)))
        return new_score, bp

    final_score, bps = lax.scan(
        fwd, score0,
        (jnp.transpose(emissions[:, 1:], (1, 0, 2)), jnp.transpose(maskb[:, 1:], (1, 0))))
    final_score = final_score + end_trans[None, :]
    last_tag = jnp.argmax(final_score, axis=-1)

    def bwd(tag, bp_t):
        new_tag = bp_t[jnp.arange(B), tag]
        return new_tag, new_tag

    _, tags_prefix = lax.scan(bwd, last_tag, bps, reverse=True)
    tags = jnp.concatenate([jnp.transpose(tags_prefix, (1, 0)), last_tag[:, None]], axis=1)
    return tags.astype(jnp.int32)


# ----------------------------- loss (glue) ------------------------------------

def token_ce_loss(logits, labels):
    valid = labels != -100
    safe = jnp.where(valid, labels, 0)
    logp = jax.nn.log_softmax(logits, axis=-1)
    nll = -jnp.take_along_axis(logp, safe[..., None], axis=-1)[..., 0]
    return jnp.sum(nll * valid) / jnp.maximum(jnp.sum(valid), 1)


# ----------------------------- stacked forward --------------------------------

def stacked_bert_with_crf_forward(input_ids, attention_mask, labels,
                                  base_prep, crf_params, tagger_prep,
                                  *, num_heads, num_labels):
    # base BertWithCRF (crf=True, frozen): logits -> CRF Viterbi decode -> predictions
    base_logits = bert_token_classifier_forward(input_ids, attention_mask,
                                                base_prep, num_heads, num_labels)
    preds = viterbi_decode(base_logits, attention_mask,
                           crf_params["start"], crf_params["end"], crf_params["trans"])
    # predictions + 1, padding positions -> tag_pad_token (0)
    bert_preds = jnp.where(attention_mask.astype(bool), preds + 1, 0).astype(jnp.int32)
    # tagger BERT on tag ids (vocab = num_labels + 1)
    tagger_logits = bert_token_classifier_forward(bert_preds, attention_mask,
                                                  tagger_prep, num_heads, num_labels)
    loss = token_ce_loss(tagger_logits, labels) if labels is not None else None
    return loss, tagger_logits


# ------------------------------ parameter init --------------------------------

def _norm(key, shape, scale=0.02):
    return scale * jax.random.normal(key, shape, dtype=jnp.float32)


def init_bert_params(key, vocab, max_pos, H, I, n_layers, num_labels):
    keys = iter(jax.random.split(key, 16 + 16 * n_layers))
    params = dict(
        word_emb=_norm(next(keys), (vocab, H)),
        pos_emb=_norm(next(keys), (max_pos, H)),
        type_emb=_norm(next(keys), (2, H)),
        emb_ln_g=jnp.ones((H,), jnp.float32),
        emb_ln_b=jnp.zeros((H,), jnp.float32),
        cls_w=_norm(next(keys), (H, num_labels)),
        cls_b=jnp.zeros((num_labels,), jnp.float32),
        layers=[],
    )
    for _ in range(n_layers):
        params["layers"].append(dict(
            wq=_norm(next(keys), (H, H)), bq=jnp.zeros((H,), jnp.float32),
            wk=_norm(next(keys), (H, H)), bk=jnp.zeros((H,), jnp.float32),
            wv=_norm(next(keys), (H, H)), bv=jnp.zeros((H,), jnp.float32),
            wo=_norm(next(keys), (H, H)), bo=jnp.zeros((H,), jnp.float32),
            ln1_g=jnp.ones((H,), jnp.float32), ln1_b=jnp.zeros((H,), jnp.float32),
            wi=_norm(next(keys), (H, I)), bi=jnp.zeros((I,), jnp.float32),
            wo2=_norm(next(keys), (I, H)), bo2=jnp.zeros((H,), jnp.float32),
            ln2_g=jnp.ones((H,), jnp.float32), ln2_b=jnp.zeros((H,), jnp.float32),
        ))
    return params


def prepare_bert_params(params):
    """Stack per-layer weights on a leading layer axis, fuse QKV, cast weights to
    bf16 (f32 biases / LayerNorm), and pad the classifier to a 128-lane slab."""
    H = params["word_emb"].shape[1]
    layers = params["layers"]

    def stack(key):
        return jnp.stack([lp[key] for lp in layers])

    w_qkv = jnp.stack([jnp.concatenate([lp["wq"], lp["wk"], lp["wv"]], axis=1)
                       for lp in layers]).astype(jnp.bfloat16)            # (L, H, 3H)
    b_qkv = jnp.stack([jnp.concatenate([lp["bq"], lp["bk"], lp["bv"]])
                       for lp in layers])[:, None, :]                     # (L, 1, 3H)

    num_labels = params["cls_w"].shape[1]
    cls_w = jnp.zeros((H, LANE), jnp.float32).at[:, :num_labels].set(
        params["cls_w"]).astype(jnp.bfloat16)
    cls_b = jnp.zeros((1, LANE), jnp.float32).at[0, :num_labels].set(params["cls_b"])

    return dict(
        word_emb=params["word_emb"], pos_emb=params["pos_emb"], type_emb=params["type_emb"],
        emb_ln_g=params["emb_ln_g"].reshape(1, H), emb_ln_b=params["emb_ln_b"].reshape(1, H),
        w_qkv=w_qkv, b_qkv=b_qkv,
        w_ao=stack("wo").astype(jnp.bfloat16), b_ao=stack("bo")[:, None, :],
        ln1_g=stack("ln1_g")[:, None, :], ln1_b=stack("ln1_b")[:, None, :],
        w_i=stack("wi").astype(jnp.bfloat16), b_i=stack("bi")[:, None, :],
        w_o2=stack("wo2").astype(jnp.bfloat16), b_o2=stack("bo2")[:, None, :],
        ln2_g=stack("ln2_g")[:, None, :], ln2_b=stack("ln2_b")[:, None, :],
        cls_w=cls_w, cls_b=cls_b,
    )


# ----------------------------------- main --------------------------------------

if __name__ == "__main__":
    B, N = 2, 8
    H, I, N_LAYERS, N_HEADS = 128, 256, 2, 2        # debug config in the module
    VOCAB, MAX_POS = 30, 64
    NUM_LABELS = 5                                   # e.g. {O, B-PER, I-PER, B-LOC, I-LOC}

    root = jax.random.PRNGKey(0)
    k_base, k_tag, k_crf, k_ids, k_lbl = jax.random.split(root, 5)

    base_prep = prepare_bert_params(
        init_bert_params(k_base, VOCAB, MAX_POS, H, I, N_LAYERS, NUM_LABELS))
    tagger_prep = prepare_bert_params(
        init_bert_params(k_tag, NUM_LABELS + 1, MAX_POS, H, I, N_LAYERS, NUM_LABELS))
    kc = jax.random.split(k_crf, 3)
    crf_params = dict(  # torchcrf init: uniform(-0.1, 0.1)
        start=jax.random.uniform(kc[0], (NUM_LABELS,), minval=-0.1, maxval=0.1),
        end=jax.random.uniform(kc[1], (NUM_LABELS,), minval=-0.1, maxval=0.1),
        trans=jax.random.uniform(kc[2], (NUM_LABELS, NUM_LABELS), minval=-0.1, maxval=0.1),
    )

    input_ids = jax.random.randint(k_ids, (B, N), 0, VOCAB, dtype=jnp.int32)
    attention_mask = jnp.array([[1] * N, [1] * (N - 2) + [0, 0]], dtype=jnp.int32)
    labels = jax.random.randint(k_lbl, (B, N), 0, NUM_LABELS, dtype=jnp.int32)
    labels = jnp.where(attention_mask.astype(bool), labels, -100)

    fwd = jax.jit(partial(stacked_bert_with_crf_forward,
                          num_heads=N_HEADS, num_labels=NUM_LABELS))
    loss, logits = fwd(input_ids, attention_mask, labels,
                       base_prep, crf_params, tagger_prep)

    jax.block_until_ready((loss, logits))
    assert logits.shape == (B, N, NUM_LABELS)
    assert bool(jnp.isfinite(loss))
    print("KERNEL_OK")
</pallas_src>

<mosaic_0001>
module attributes {stable_mosaic.version = 11 : i64} {
  func.func @_bert_forward_kernel(%arg0: memref<16x128xf32, #tpu.memory_space<vmem>>, %arg1: memref<2x8xf32, #tpu.memory_space<vmem>>, %arg2: memref<1x128xf32, #tpu.memory_space<vmem>>, %arg3: memref<1x128xf32, #tpu.memory_space<vmem>>, %arg4: memref<2x128x384xbf16, #tpu.memory_space<vmem>>, %arg5: memref<2x1x384xf32, #tpu.memory_space<vmem>>, %arg6: memref<2x128x128xbf16, #tpu.memory_space<vmem>>, %arg7: memref<2x1x128xf32, #tpu.memory_space<vmem>>, %arg8: memref<2x1x128xf32, #tpu.memory_space<vmem>>, %arg9: memref<2x1x128xf32, #tpu.memory_space<vmem>>, %arg10: memref<2x128x256xbf16, #tpu.memory_space<vmem>>, %arg11: memref<2x1x256xf32, #tpu.memory_space<vmem>>, %arg12: memref<2x256x128xbf16, #tpu.memory_space<vmem>>, %arg13: memref<2x1x128xf32, #tpu.memory_space<vmem>>, %arg14: memref<2x1x128xf32, #tpu.memory_space<vmem>>, %arg15: memref<2x1x128xf32, #tpu.memory_space<vmem>>, %arg16: memref<128x128xbf16, #tpu.memory_space<vmem>>, %arg17: memref<1x128xf32, #tpu.memory_space<vmem>>, %arg18: memref<16x128xf32, #tpu.memory_space<vmem>>) attributes {dimension_semantics = [], scalar_prefetch = 0 : i64, scratch_operands = 0 : i64, tpu.core_type = #tpu.core_type<tc>} {
    %c0 = arith.constant 0 : index
    %c0_0 = arith.constant 0 : index
    %0 = vector.load %arg0[%c0, %c0_0] : memref<16x128xf32, #tpu.memory_space<vmem>>, vector<16x128xf32>
    %c0_1 = arith.constant 0 : index
    %c0_2 = arith.constant 0 : index
    %1 = vector.load %arg2[%c0_1, %c0_2] : memref<1x128xf32, #tpu.memory_space<vmem>>, vector<1x128xf32>
    %c0_3 = arith.constant 0 : index
    %c0_4 = arith.constant 0 : index
    %2 = vector.load %arg3[%c0_3, %c0_4] : memref<1x128xf32, #tpu.memory_space<vmem>>, vector<1x128xf32>
    %cst = arith.constant dense<0.000000e+00> : vector<16xf32>
    %3 = vector.multi_reduction <add>, %0, %cst [1] : vector<16x128xf32> to vector<16xf32>
    %4 = vector.shape_cast %3 : vector<16xf32> to vector<16x1xf32>
    %cst_5 = arith.constant 1.280000e+02 : f32
    %5 = vector.broadcast %cst_5 : f32 to vector<16x1xf32>
    %6 = arith.divf %4, %5 : vector<16x1xf32>
    %7 = vector.broadcast %6 : vector<16x1xf32> to vector<16x128xf32>
    %8 = arith.subf %0, %7 : vector<16x128xf32>
    %9 = arith.mulf %8, %8 : vector<16x128xf32>
    %cst_6 = arith.constant dense<0.000000e+00> : vector<16xf32>
    %10 = vector.multi_reduction <add>, %9, %cst_6 [1] : vector<16x128xf32> to vector<16xf32>
    %11 = vector.shape_cast %10 : vector<16xf32> to vector<16x1xf32>
    %cst_7 = arith.constant 1.280000e+02 : f32
    %12 = vector.broadcast %cst_7 : f32 to vector<16x1xf32>
    %13 = arith.divf %11, %12 : vector<16x1xf32>
    %14 = vector.broadcast %6 : vector<16x1xf32> to vector<16x128xf32>
    %15 = arith.subf %0, %14 : vector<16x128xf32>
    %cst_8 = arith.constant 9.99999996E-13 : f32
    %16 = vector.broadcast %cst_8 : f32 to vector<16x1xf32>
    %17 = arith.addf %13, %16 : vector<16x1xf32>
    %18 = math.rsqrt %17 : vector<16x1xf32>
    %19 = vector.broadcast %18 : vector<16x1xf32> to vector<16x128xf32>
    %20 = arith.mulf %15, %19 : vector<16x128xf32>
    %21 = vector.broadcast %1 : vector<1x128xf32> to vector<16x128xf32>
    %22 = arith.mulf %20, %21 : vector<16x128xf32>
    %23 = vector.broadcast %2 : vector<1x128xf32> to vector<16x128xf32>
    %24 = arith.addf %22, %23 : vector<16x128xf32>
    %c0_9 = arith.constant 0 : index
    %c0_10 = arith.constant 0 : index
    %25 = vector.load %arg1[%c0_9, %c0_10] : memref<2x8xf32, #tpu.memory_space<vmem>>, vector<2x8xf32>
    %cst_11 = arith.constant 1.000000e+00 : f32
    %26 = vector.broadcast %cst_11 : f32 to vector<2x8xf32>
    %27 = arith.subf %26, %25 : vector<2x8xf32>
    %cst_12 = arith.constant -1.000000e+09 : f32
    %28 = vector.broadcast %cst_12 : f32 to vector<2x8xf32>
    %29 = arith.mulf %27, %28 : vector<2x8xf32>
    %30 = vector.shape_cast %29 : vector<2x8xf32> to vector<2x1x8xf32>
    %31 = arith.truncf %24 : vector<16x128xf32> to vector<16x128xbf16>
    %c0_13 = arith.constant 0 : index
    %c0_14 = arith.constant 0 : index
    %c0_15 = arith.constant 0 : index
    %32 = vector.load %arg4[%c0_13, %c0_14, %c0_15] : memref<2x128x384xbf16, #tpu.memory_space<vmem>>, vector<1x128x384xbf16>
    %33 = vector.shape_cast %32 : vector<1x128x384xbf16> to vector<128x384xbf16>
    %cst_16 = arith.constant dense<0.000000e+00> : vector<16x384xf32>
    %34 = tpu.matmul %31, %33, %cst_16 {dimension_numbers = #tpu.dot_dimension_numbers<[1], [0], [0], [1], [0, 0, 1, 1], [], []>} : vector<16x128xbf16>, vector<128x384xbf16>, vector<16x384xf32> -> vector<16x384xf32>
    %c0_17 = arith.constant 0 : index
    %c0_18 = arith.constant 0 : index
    %c0_19 = arith.constant 0 : index
    %35 = vector.load %arg5[%c0_17, %c0_18, %c0_19] : memref<2x1x384xf32, #tpu.memory_space<vmem>>, vector<1x1x384xf32>
    %36 = vector.shape_cast %35 : vector<1x1x384xf32> to vector<1x384xf32>
    %37 = vector.broadcast %36 : vector<1x384xf32> to vector<16x384xf32>
    %38 = arith.addf %34, %37 : vector<16x384xf32>
    %c0_20 = arith.constant 0 : index
    %c0_21 = arith.constant 0 : index
    %c0_22 = arith.constant 0 : index
    %39 = vector.load %arg6[%c0_20, %c0_21, %c0_22] : memref<2x128x128xbf16, #tpu.memory_space<vmem>>, vector<1x128x128xbf16>
    %40 = vector.shape_cast %39 : vector<1x128x128xbf16> to vector<128x128xbf16>
    %cst_23 = arith.constant 0.000000e+00 : f32
    %41 = vector.broadcast %cst_23 : f32 to vector<16x128xf32>
    %42 = vector.extract_strided_slice %38 {offsets = [0, 0], sizes = [16, 64], strides = [1, 1]} : vector<16x384xf32> to vector<16x64xf32>
    %43 = vector.shape_cast %42 : vector<16x64xf32> to vector<2x8x64xf32>
    %44 = arith.truncf %43 : vector<2x8x64xf32> to vector<2x8x64xbf16>
    %45 = vector.extract_strided_slice %38 {offsets = [0, 128], sizes = [16, 64], strides = [1, 1]} : vector<16x384xf32> to vector<16x64xf32>
    %46 = vector.shape_cast %45 : vector<16x64xf32> to vector<2x8x64xf32>
    %47 = arith.truncf %46 : vector<2x8x64xf32> to vector<2x8x64xbf16>
    %48 = vector.extract_strided_slice %38 {offsets = [0, 256], sizes = [16, 64], strides = [1, 1]} : vector<16x384xf32> to vector<16x64xf32>
    %49 = vector.shape_cast %48 : vector<16x64xf32> to vector<2x8x64xf32>
    %50 = arith.truncf %49 : vector<2x8x64xf32> to vector<2x8x64xbf16>
    "tpu.trace_start"() <{level = 10 : i32, message = "bqd,bkd->bqk"}> : () -> ()
    %cst_24 = arith.constant dense<0.000000e+00> : vector<2x8x8xf32>
    %51 = tpu.matmul %44, %47, %cst_24 {dimension_numbers = #tpu.dot_dimension_numbers<[2], [2], [1], [1], [0, 0, 0, 1, 1, 1], [0], [0]>} : vector<2x8x64xbf16>, vector<2x8x64xbf16>, vector<2x8x8xf32> -> vector<2x8x8xf32>
    "tpu.trace_stop"() : () -> ()
    %cst_25 = arith.constant 1.250000e-01 : f32
    %52 = vector.broadcast %cst_25 : f32 to vector<2x8x8xf32>
    %53 = arith.mulf %51, %52 : vector<2x8x8xf32>
    %54 = vector.broadcast %30 : vector<2x1x8xf32> to vector<2x8x8xf32>
    %55 = arith.addf %53, %54 : vector<2x8x8xf32>
    %cst_26 = arith.constant dense<0xFF800000> : vector<2x8xf32>
    %56 = vector.multi_reduction <maximumf>, %55, %cst_26 [2] : vector<2x8x8xf32> to vector<2x8xf32>
    %57 = vector.shape_cast %56 : vector<2x8xf32> to vector<2x8x1xf32>
    %58 = vector.broadcast %57 : vector<2x8x1xf32> to vector<2x8x8xf32>
    %59 = arith.subf %55, %58 : vector<2x8x8xf32>
    %60 = math.exp %59 : vector<2x8x8xf32>
    %cst_27 = arith.constant dense<0.000000e+00> : vector<2x8xf32>
    %61 = vector.multi_reduction <add>, %60, %cst_27 [2] : vector<2x8x8xf32> to vector<2x8xf32>
    %62 = vector.shape_cast %61 : vector<2x8xf32> to vector<2x8x1xf32>
    %63 = tpu.reciprocal %62 {approx = true} : vector<2x8x1xf32> -> vector<2x8x1xf32>
    %64 = vector.broadcast %63 : vector<2x8x1xf32> to vector<2x8x8xf32>
    %65 = arith.mulf %60, %64 : vector<2x8x8xf32>
    %66 = arith.truncf %65 : vector<2x8x8xf32> to vector<2x8x8xbf16>
    "tpu.trace_start"() <{level = 10 : i32, message = "bqk,bkd->bqd"}> : () -> ()
    %cst_28 = arith.constant dense<0.000000e+00> : vector<2x8x64xf32>
    %67 = tpu.matmul %66, %50, %cst_28 {dimension_numbers = #tpu.dot_dimension_numbers<[2], [1], [1], [2], [0, 0, 0, 1, 1, 2], [0], [0]>} : vector<2x8x8xbf16>, vector<2x8x64xbf16>, vector<2x8x64xf32> -> vector<2x8x64xf32>
    "tpu.trace_stop"() : () -> ()
    %68 = vector.shape_cast %67 : vector<2x8x64xf32> to vector<16x64xf32>
    %69 = arith.truncf %68 : vector<16x64xf32> to vector<16x64xbf16>
    %70 = vector.extract_strided_slice %40 {offsets = [0, 0], sizes = [64, 128], strides = [1, 1]} : vector<128x128xbf16> to vector<64x128xbf16>
    %cst_29 = arith.constant dense<0.000000e+00> : vector<16x128xf32>
    %71 = tpu.matmul %69, %70, %cst_29 {dimension_numbers = #tpu.dot_dimension_numbers<[1], [0], [0], [1], [0, 0, 1, 1], [], []>} : vector<16x64xbf16>, vector<64x128xbf16>, vector<16x128xf32> -> vector<16x128xf32>
    %72 = arith.addf %41, %71 : vector<16x128xf32>
    %73 = vector.extract_strided_slice %38 {offsets = [0, 64], sizes = [16, 64], strides = [1, 1]} : vector<16x384xf32> to vector<16x64xf32>
    %74 = vector.shape_cast %73 : vector<16x64xf32> to vector<2x8x64xf32>
    %75 = arith.truncf %74 : vector<2x8x64xf32> to vector<2x8x64xbf16>
    %76 = vector.extract_strided_slice %38 {offsets = [0, 192], sizes = [16, 64], strides = [1, 1]} : vector<16x384xf32> to vector<16x64xf32>
    %77 = vector.shape_cast %76 : vector<16x64xf32> to vector<2x8x64xf32>
    %78 = arith.truncf %77 : vector<2x8x64xf32> to vector<2x8x64xbf16>
    %79 = vector.extract_strided_slice %38 {offsets = [0, 320], sizes = [16, 64], strides = [1, 1]} : vector<16x384xf32> to vector<16x64xf32>
    %80 = vector.shape_cast %79 : vector<16x64xf32> to vector<2x8x64xf32>
    %81 = arith.truncf %80 : vector<2x8x64xf32> to vector<2x8x64xbf16>
    "tpu.trace_start"() <{level = 10 : i32, message = "bqd,bkd->bqk"}> : () -> ()
    %cst_30 = arith.constant dense<0.000000e+00> : vector<2x8x8xf32>
    %82 = tpu.matmul %75, %78, %cst_30 {dimension_numbers = #tpu.dot_dimension_numbers<[2], [2], [1], [1], [0, 0, 0, 1, 1, 1], [0], [0]>} : vector<2x8x64xbf16>, vector<2x8x64xbf16>, vector<2x8x8xf32> -> vector<2x8x8xf32>
    "tpu.trace_stop"() : () -> ()
    %cst_31 = arith.constant 1.250000e-01 : f32
    %83 = vector.broadcast %cst_31 : f32 to vector<2x8x8xf32>
    %84 = arith.mulf %82, %83 : vector<2x8x8xf32>
    %85 = vector.broadcast %30 : vector<2x1x8xf32> to vector<2x8x8xf32>
    %86 = arith.addf %84, %85 : vector<2x8x8xf32>
    %cst_32 = arith.constant dense<0xFF800000> : vector<2x8xf32>
    %87 = vector.multi_reduction <maximumf>, %86, %cst_32 [2] : vector<2x8x8xf32> to vector<2x8xf32>
    %88 = vector.shape_cast %87 : vector<2x8xf32> to vector<2x8x1xf32>
    %89 = vector.broadcast %88 : vector<2x8x1xf32> to vector<2x8x8xf32>
    %90 = arith.subf %86, %89 : vector<2x8x8xf32>
    %91 = math.exp %90 : vector<2x8x8xf32>
    %cst_33 = arith.constant dense<0.000000e+00> : vector<2x8xf32>
    %92 = vector.multi_reduction <add>, %91, %cst_33 [2] : vector<2x8x8xf32> to vector<2x8xf32>
    %93 = vector.shape_cast %92 : vector<2x8xf32> to vector<2x8x1xf32>
    %94 = tpu.reciprocal %93 {approx = true} : vector<2x8x1xf32> -> vector<2x8x1xf32>
    %95 = vector.broadcast %94 : vector<2x8x1xf32> to vector<2x8x8xf32>
    %96 = arith.mulf %91, %95 : vector<2x8x8xf32>
    %97 = arith.truncf %96 : vector<2x8x8xf32> to vector<2x8x8xbf16>
    "tpu.trace_start"() <{level = 10 : i32, message = "bqk,bkd->bqd"}> : () -> ()
    %cst_34 = arith.constant dense<0.000000e+00> : vector<2x8x64xf32>
    %98 = tpu.matmul %97, %81, %cst_34 {dimension_numbers = #tpu.dot_dimension_numbers<[2], [1], [1], [2], [0, 0, 0, 1, 1, 2], [0], [0]>} : vector<2x8x8xbf16>, vector<2x8x64xbf16>, vector<2x8x64xf32> -> vector<2x8x64xf32>
    "tpu.trace_stop"() : () -> ()
    %99 = vector.shape_cast %98 : vector<2x8x64xf32> to vector<16x64xf32>
    %100 = arith.truncf %99 : vector<16x64xf32> to vector<16x64xbf16>
    %101 = vector.extract_strided_slice %40 {offsets = [64, 0], sizes = [64, 128], strides = [1, 1]} : vector<128x128xbf16> to vector<64x128xbf16>
    %cst_35 = arith.constant dense<0.000000e+00> : vector<16x128xf32>
    %102 = tpu.matmul %100, %101, %cst_35 {dimension_numbers = #tpu.dot_dimension_numbers<[1], [0], [0], [1], [0, 0, 1, 1], [], []>} : vector<16x64xbf16>, vector<64x128xbf16>, vector<16x128xf32> -> vector<16x128xf32>
    %103 = arith.addf %72, %102 : vector<16x128xf32>
    %c0_36 = arith.constant 0 : index
    %c0_37 = arith.constant 0 : index
    %c0_38 = arith.constant 0 : index
    %104 = vector.load %arg7[%c0_36, %c0_37, %c0_38] : memref<2x1x128xf32, #tpu.memory_space<vmem>>, vector<1x1x128xf32>
    %105 = vector.shape_cast %104 : vector<1x1x128xf32> to vector<1x128xf32>
    %106 = vector.broadcast %105 : vector<1x128xf32> to vector<16x128xf32>
    %107 = arith.addf %103, %106 : vector<16x128xf32>
    %108 = arith.addf %24, %107 : vector<16x128xf32>
    %c0_39 = arith.constant 0 : index
    %c0_40 = arith.constant 0 : index
    %c0_41 = arith.constant 0 : index
    %109 = vector.load %arg8[%c0_39, %c0_40, %c0_41] : memref<2x1x128xf32, #tpu.memory_space<vmem>>, vector<1x1x128xf32>
    %110 = vector.shape_cast %109 : vector<1x1x128xf32> to vector<1x128xf32>
    %c0_42 = arith.constant 0 : index
    %c0_43 = arith.constant 0 : index
    %c0_44 = arith.constant 0 : index
    %111 = vector.load %arg9[%c0_42, %c0_43, %c0_44] : memref<2x1x128xf32, #tpu.memory_space<vmem>>, vector<1x1x128xf32>
    %112 = vector.shape_cast %111 : vector<1x1x128xf32> to vector<1x128xf32>
    %cst_45 = arith.constant dense<0.000000e+00> : vector<16xf32>
    %113 = vector.multi_reduction <add>, %108, %cst_45 [1] : vector<16x128xf32> to vector<16xf32>
    %114 = vector.shape_cast %113 : vector<16xf32> to vector<16x1xf32>
    %cst_46 = arith.constant 1.280000e+02 : f32
    %115 = vector.broadcast %cst_46 : f32 to vector<16x1xf32>
    %116 = arith.divf %114, %115 : vector<16x1xf32>
    %117 = vector.broadcast %116 : vector<16x1xf32> to vector<16x128xf32>
    %118 = arith.subf %108, %117 : vector<16x128xf32>
    %119 = arith.mulf %118, %118 : vector<16x128xf32>
    %cst_47 = arith.constant dense<0.000000e+00> : vector<16xf32>
    %120 = vector.multi_reduction <add>, %119, %cst_47 [1] : vector<16x128xf32> to vector<16xf32>
    %121 = vector.shape_cast %120 : vector<16xf32> to vector<16x1xf32>
    %cst_48 = arith.constant 1.280000e+02 : f32
    %122 = vector.broadcast %cst_48 : f32 to vector<16x1xf32>
    %123 = arith.divf %121, %122 : vector<16x1xf32>
    %124 = vector.broadcast %116 : vector<16x1xf32> to vector<16x128xf32>
    %125 = arith.subf %108, %124 : vector<16x128xf32>
    %cst_49 = arith.constant 9.99999996E-13 : f32
    %126 = vector.broadcast %cst_49 : f32 to vector<16x1xf32>
    %127 = arith.addf %123, %126 : vector<16x1xf32>
    %128 = math.rsqrt %127 : vector<16x1xf32>
    %129 = vector.broadcast %128 : vector<16x1xf32> to vector<16x128xf32>
    %130 = arith.mulf %125, %129 : vector<16x128xf32>
    %131 = vector.broadcast %110 : vector<1x128xf32> to vector<16x128xf32>
    %132 = arith.mulf %130, %131 : vector<16x128xf32>
    %133 = vector.broadcast %112 : vector<1x128xf32> to vector<16x128xf32>
    %134 = arith.addf %132, %133 : vector<16x128xf32>
    %135 = arith.truncf %134 : vector<16x128xf32> to vector<16x128xbf16>
    %c0_50 = arith.constant 0 : index
    %c0_51 = arith.constant 0 : index
    %c0_52 = arith.constant 0 : index
    %136 = vector.load %arg10[%c0_50, %c0_51, %c0_52] : memref<2x128x256xbf16, #tpu.memory_space<vmem>>, vector<1x128x256xbf16>
    %137 = vector.shape_cast %136 : vector<1x128x256xbf16> to vector<128x256xbf16>
    %cst_53 = arith.constant dense<0.000000e+00> : vector<16x256xf32>
    %138 = tpu.matmul %135, %137, %cst_53 {dimension_numbers = #tpu.dot_dimension_numbers<[1], [0], [0], [1], [0, 0, 1, 1], [], []>} : vector<16x128xbf16>, vector<128x256xbf16>, vector<16x256xf32> -> vector<16x256xf32>
    %c0_54 = arith.constant 0 : index
    %c0_55 = arith.constant 0 : index
    %c0_56 = arith.constant 0 : index
    %139 = vector.load %arg11[%c0_54, %c0_55, %c0_56] : memref<2x1x256xf32, #tpu.memory_space<vmem>>, vector<1x1x256xf32>
    %140 = vector.shape_cast %139 : vector<1x1x256xf32> to vector<1x256xf32>
    %141 = vector.broadcast %140 : vector<1x256xf32> to vector<16x256xf32>
    %142 = arith.addf %138, %141 : vector<16x256xf32>
    %cst_57 = arith.constant 5.000000e-01 : f32
    %143 = vector.broadcast %cst_57 : f32 to vector<16x256xf32>
    %144 = arith.mulf %143, %142 : vector<16x256xf32>
    %cst_58 = arith.constant 4.471500e-02 : f32
    %145 = vector.broadcast %cst_58 : f32 to vector<16x256xf32>
    %146 = arith.mulf %145, %142 : vector<16x256xf32>
    %147 = arith.mulf %146, %142 : vector<16x256xf32>
    %148 = arith.mulf %147, %142 : vector<16x256xf32>
    %149 = arith.addf %142, %148 : vector<16x256xf32>
    %cst_59 = arith.constant 0.797884583 : f32
    %150 = vector.broadcast %cst_59 : f32 to vector<16x256xf32>
    %151 = arith.mulf %150, %149 : vector<16x256xf32>
    %152 = math.tanh %151 : vector<16x256xf32>
    %cst_60 = arith.constant 1.000000e+00 : f32
    %153 = vector.broadcast %cst_60 : f32 to vector<16x256xf32>
    %154 = arith.addf %153, %152 : vector<16x256xf32>
    %155 = arith.mulf %144, %154 : vector<16x256xf32>
    %156 = arith.truncf %155 : vector<16x256xf32> to vector<16x256xbf16>
    %c0_61 = arith.constant 0 : index
    %c0_62 = arith.constant 0 : index
    %c0_63 = arith.constant 0 : index
    %157 = vector.load %arg12[%c0_61, %c0_62, %c0_63] : memref<2x256x128xbf16, #tpu.memory_space<vmem>>, vector<1x256x128xbf16>
    %158 = vector.shape_cast %157 : vector<1x256x128xbf16> to vector<256x128xbf16>
    %cst_64 = arith.constant dense<0.000000e+00> : vector<16x128xf32>
    %159 = tpu.matmul %156, %158, %cst_64 {dimension_numbers = #tpu.dot_dimension_numbers<[1], [0], [0], [1], [0, 0, 1, 1], [], []>} : vector<16x256xbf16>, vector<256x128xbf16>, vector<16x128xf32> -> vector<16x128xf32>
    %c0_65 = arith.constant 0 : index
    %c0_66 = arith.constant 0 : index
    %c0_67 = arith.constant 0 : index
    %160 = vector.load %arg13[%c0_65, %c0_66, %c0_67] : memref<2x1x128xf32, #tpu.memory_space<vmem>>, vector<1x1x128xf32>
    %161 = vector.shape_cast %160 : vector<1x1x128xf32> to vector<1x128xf32>
    %162 = vector.broadcast %161 : vector<1x128xf32> to vector<16x128xf32>
    %163 = arith.addf %159, %162 : vector<16x128xf32>
    %164 = arith.addf %134, %163 : vector<16x128xf32>
    %c0_68 = arith.constant 0 : index
    %c0_69 = arith.constant 0 : index
    %c0_70 = arith.constant 0 : index
    %165 = vector.load %arg14[%c0_68, %c0_69, %c0_70] : memref<2x1x128xf32, #tpu.memory_space<vmem>>, vector<1x1x128xf32>
    %166 = vector.shape_cast %165 : vector<1x1x128xf32> to vector<1x128xf32>
    %c0_71 = arith.constant 0 : index
    %c0_72 = arith.constant 0 : index
    %c0_73 = arith.constant 0 : index
    %167 = vector.load %arg15[%c0_71, %c0_72, %c0_73] : memref<2x1x128xf32, #tpu.memory_space<vmem>>, vector<1x1x128xf32>
    %168 = vector.shape_cast %167 : vector<1x1x128xf32> to vector<1x128xf32>
    %cst_74 = arith.constant dense<0.000000e+00> : vector<16xf32>
    %169 = vector.multi_reduction <add>, %164, %cst_74 [1] : vector<16x128xf32> to vector<16xf32>
    %170 = vector.shape_cast %169 : vector<16xf32> to vector<16x1xf32>
    %cst_75 = arith.constant 1.280000e+02 : f32
    %171 = vector.broadcast %cst_75 : f32 to vector<16x1xf32>
    %172 = arith.divf %170, %171 : vector<16x1xf32>
    %173 = vector.broadcast %172 : vector<16x1xf32> to vector<16x128xf32>
    %174 = arith.subf %164, %173 : vector<16x128xf32>
    %175 = arith.mulf %174, %174 : vector<16x128xf32>
    %cst_76 = arith.constant dense<0.000000e+00> : vector<16xf32>
    %176 = vector.multi_reduction <add>, %175, %cst_76 [1] : vector<16x128xf32> to vector<16xf32>
    %177 = vector.shape_cast %176 : vector<16xf32> to vector<16x1xf32>
    %cst_77 = arith.constant 1.280000e+02 : f32
    %178 = vector.broadcast %cst_77 : f32 to vector<16x1xf32>
    %179 = arith.divf %177, %178 : vector<16x1xf32>
    %180 = vector.broadcast %172 : vector<16x1xf32> to vector<16x128xf32>
    %181 = arith.subf %164, %180 : vector<16x128xf32>
    %cst_78 = arith.constant 9.99999996E-13 : f32
    %182 = vector.broadcast %cst_78 : f32 to vector<16x1xf32>
    %183 = arith.addf %179, %182 : vector<16x1xf32>
    %184 = math.rsqrt %183 : vector<16x1xf32>
    %185 = vector.broadcast %184 : vector<16x1xf32> to vector<16x128xf32>
    %186 = arith.mulf %181, %185 : vector<16x128xf32>
    %187 = vector.broadcast %166 : vector<1x128xf32> to vector<16x128xf32>
    %188 = arith.mulf %186, %187 : vector<16x128xf32>
    %189 = vector.broadcast %168 : vector<1x128xf32> to vector<16x128xf32>
    %190 = arith.addf %188, %189 : vector<16x128xf32>
    %191 = arith.truncf %190 : vector<16x128xf32> to vector<16x128xbf16>
    %c1 = arith.constant 1 : index
    %c0_79 = arith.constant 0 : index
    %c0_80 = arith.constant 0 : index
    %192 = vector.load %arg4[%c1, %c0_79, %c0_80] : memref<2x128x384xbf16, #tpu.memory_space<vmem>>, vector<1x128x384xbf16>
    %193 = vector.shape_cast %192 : vector<1x128x384xbf16> to vector<128x384xbf16>
    %cst_81 = arith.constant dense<0.000000e+00> : vector<16x384xf32>
    %194 = tpu.matmul %191, %193, %cst_81 {dimension_numbers = #tpu.dot_dimension_numbers<[1], [0], [0], [1], [0, 0, 1, 1], [], []>} : vector<16x128xbf16>, vector<128x384xbf16>, vector<16x384xf32> -> vector<16x384xf32>
    %c1_82 = arith.constant 1 : index
    %c0_83 = arith.constant 0 : index
    %c0_84 = arith.constant 0 : index
    %195 = vector.load %arg5[%c1_82, %c0_83, %c0_84] : memref<2x1x384xf32, #tpu.memory_space<vmem>>, vector<1x1x384xf32>
    %196 = vector.shape_cast %195 : vector<1x1x384xf32> to vector<1x384xf32>
    %197 = vector.broadcast %196 : vector<1x384xf32> to vector<16x384xf32>
    %198 = arith.addf %194, %197 : vector<16x384xf32>
    %c1_85 = arith.constant 1 : index
    %c0_86 = arith.constant 0 : index
    %c0_87 = arith.constant 0 : index
    %199 = vector.load %arg6[%c1_85, %c0_86, %c0_87] : memref<2x128x128xbf16, #tpu.memory_space<vmem>>, vector<1x128x128xbf16>
    %200 = vector.shape_cast %199 : vector<1x128x128xbf16> to vector<128x128xbf16>
    %cst_88 = arith.constant 0.000000e+00 : f32
    %201 = vector.broadcast %cst_88 : f32 to vector<16x128xf32>
    %202 = vector.extract_strided_slice %198 {offsets = [0, 0], sizes = [16, 64], strides = [1, 1]} : vector<16x384xf32> to vector<16x64xf32>
    %203 = vector.shape_cast %202 : vector<16x64xf32> to vector<2x8x64xf32>
    %204 = arith.truncf %203 : vector<2x8x64xf32> to vector<2x8x64xbf16>
    %205 = vector.extract_strided_slice %198 {offsets = [0, 128], sizes = [16, 64], strides = [1, 1]} : vector<16x384xf32> to vector<16x64xf32>
    %206 = vector.shape_cast %205 : vector<16x64xf32> to vector<2x8x64xf32>
    %207 = arith.truncf %206 : vector<2x8x64xf32> to vector<2x8x64xbf16>
    %208 = vector.extract_strided_slice %198 {offsets = [0, 256], sizes = [16, 64], strides = [1, 1]} : vector<16x384xf32> to vector<16x64xf32>
    %209 = vector.shape_cast %208 : vector<16x64xf32> to vector<2x8x64xf32>
    %210 = arith.truncf %209 : vector<2x8x64xf32> to vector<2x8x64xbf16>
    "tpu.trace_start"() <{level = 10 : i32, message = "bqd,bkd->bqk"}> : () -> ()
    %cst_89 = arith.constant dense<0.000000e+00> : vector<2x8x8xf32>
    %211 = tpu.matmul %204, %207, %cst_89 {dimension_numbers = #tpu.dot_dimension_numbers<[2], [2], [1], [1], [0, 0, 0, 1, 1, 1], [0], [0]>} : vector<2x8x64xbf16>, vector<2x8x64xbf16>, vector<2x8x8xf32> -> vector<2x8x8xf32>
    "tpu.trace_stop"() : () -> ()
    %cst_90 = arith.constant 1.250000e-01 : f32
    %212 = vector.broadcast %cst_90 : f32 to vector<2x8x8xf32>
    %213 = arith.mulf %211, %212 : vector<2x8x8xf32>
    %214 = vector.broadcast %30 : vector<2x1x8xf32> to vector<2x8x8xf32>
    %215 = arith.addf %213, %214 : vector<2x8x8xf32>
    %cst_91 = arith.constant dense<0xFF800000> : vector<2x8xf32>
    %216 = vector.multi_reduction <maximumf>, %215, %cst_91 [2] : vector<2x8x8xf32> to vector<2x8xf32>
    %217 = vector.shape_cast %216 : vector<2x8xf32> to vector<2x8x1xf32>
    %218 = vector.broadcast %217 : vector<2x8x1xf32> to vector<2x8x8xf32>
    %219 = arith.subf %215, %218 : vector<2x8x8xf32>
    %220 = math.exp %219 : vector<2x8x8xf32>
    %cst_92 = arith.constant dense<0.000000e+00> : vector<2x8xf32>
    %221 = vector.multi_reduction <add>, %220, %cst_92 [2] : vector<2x8x8xf32> to vector<2x8xf32>
    %222 = vector.shape_cast %221 : vector<2x8xf32> to vector<2x8x1xf32>
    %223 = tpu.reciprocal %222 {approx = true} : vector<2x8x1xf32> -> vector<2x8x1xf32>
    %224 = vector.broadcast %223 : vector<2x8x1xf32> to vector<2x8x8xf32>
    %225 = arith.mulf %220, %224 : vector<2x8x8xf32>
    %226 = arith.truncf %225 : vector<2x8x8xf32> to vector<2x8x8xbf16>
    "tpu.trace_start"() <{level = 10 : i32, message = "bqk,bkd->bqd"}> : () -> ()
    %cst_93 = arith.constant dense<0.000000e+00> : vector<2x8x64xf32>
    %227 = tpu.matmul %226, %210, %cst_93 {dimension_numbers = #tpu.dot_dimension_numbers<[2], [1], [1], [2], [0, 0, 0, 1, 1, 2], [0], [0]>} : vector<2x8x8xbf16>, vector<2x8x64xbf16>, vector<2x8x64xf32> -> vector<2x8x64xf32>
    "tpu.trace_stop"() : () -> ()
    %228 = vector.shape_cast %227 : vector<2x8x64xf32> to vector<16x64xf32>
    %229 = arith.truncf %228 : vector<16x64xf32> to vector<16x64xbf16>
    %230 = vector.extract_strided_slice %200 {offsets = [0, 0], sizes = [64, 128], strides = [1, 1]} : vector<128x128xbf16> to vector<64x128xbf16>
    %cst_94 = arith.constant dense<0.000000e+00> : vector<16x128xf32>
    %231 = tpu.matmul %229, %230, %cst_94 {dimension_numbers = #tpu.dot_dimension_numbers<[1], [0], [0], [1], [0, 0, 1, 1], [], []>} : vector<16x64xbf16>, vector<64x128xbf16>, vector<16x128xf32> -> vector<16x128xf32>
    %232 = arith.addf %201, %231 : vector<16x128xf32>
    %233 = vector.extract_strided_slice %198 {offsets = [0, 64], sizes = [16, 64], strides = [1, 1]} : vector<16x384xf32> to vector<16x64xf32>
    %234 = vector.shape_cast %233 : vector<16x64xf32> to vector<2x8x64xf32>
    %235 = arith.truncf %234 : vector<2x8x64xf32> to vector<2x8x64xbf16>
    %236 = vector.extract_strided_slice %198 {offsets = [0, 192], sizes = [16, 64], strides = [1, 1]} : vector<16x384xf32> to vector<16x64xf32>
    %237 = vector.shape_cast %236 : vector<16x64xf32> to vector<2x8x64xf32>
    %238 = arith.truncf %237 : vector<2x8x64xf32> to vector<2x8x64xbf16>
    %239 = vector.extract_strided_slice %198 {offsets = [0, 320], sizes = [16, 64], strides = [1, 1]} : vector<16x384xf32> to vector<16x64xf32>
    %240 = vector.shape_cast %239 : vector<16x64xf32> to vector<2x8x64xf32>
    %241 = arith.truncf %240 : vector<2x8x64xf32> to vector<2x8x64xbf16>
    "tpu.trace_start"() <{level = 10 : i32, message = "bqd,bkd->bqk"}> : () -> ()
    %cst_95 = arith.constant dense<0.000000e+00> : vector<2x8x8xf32>
    %242 = tpu.matmul %235, %238, %cst_95 {dimension_numbers = #tpu.dot_dimension_numbers<[2], [2], [1], [1], [0, 0, 0, 1, 1, 1], [0], [0]>} : vector<2x8x64xbf16>, vector<2x8x64xbf16>, vector<2x8x8xf32> -> vector<2x8x8xf32>
    "tpu.trace_stop"() : () -> ()
    %cst_96 = arith.constant 1.250000e-01 : f32
    %243 = vector.broadcast %cst_96 : f32 to vector<2x8x8xf32>
    %244 = arith.mulf %242, %243 : vector<2x8x8xf32>
    %245 = vector.broadcast %30 : vector<2x1x8xf32> to vector<2x8x8xf32>
    %246 = arith.addf %244, %245 : vector<2x8x8xf32>
    %cst_97 = arith.constant dense<0xFF800000> : vector<2x8xf32>
    %247 = vector.multi_reduction <maximumf>, %246, %cst_97 [2] : vector<2x8x8xf32> to vector<2x8xf32>
    %248 = vector.shape_cast %247 : vector<2x8xf32> to vector<2x8x1xf32>
    %249 = vector.broadcast %248 : vector<2x8x1xf32> to vector<2x8x8xf32>
    %250 = arith.subf %246, %249 : vector<2x8x8xf32>
    %251 = math.exp %250 : vector<2x8x8xf32>
    %cst_98 = arith.constant dense<0.000000e+00> : vector<2x8xf32>
    %252 = vector.multi_reduction <add>, %251, %cst_98 [2] : vector<2x8x8xf32> to vector<2x8xf32>
    %253 = vector.shape_cast %252 : vector<2x8xf32> to vector<2x8x1xf32>
    %254 = tpu.reciprocal %253 {approx = true} : vector<2x8x1xf32> -> vector<2x8x1xf32>
    %255 = vector.broadcast %254 : vector<2x8x1xf32> to vector<2x8x8xf32>
    %256 = arith.mulf %251, %255 : vector<2x8x8xf32>
    %257 = arith.truncf %256 : vector<2x8x8xf32> to vector<2x8x8xbf16>
    "tpu.trace_start"() <{level = 10 : i32, message = "bqk,bkd->bqd"}> : () -> ()
    %cst_99 = arith.constant dense<0.000000e+00> : vector<2x8x64xf32>
    %258 = tpu.matmul %257, %241, %cst_99 {dimension_numbers = #tpu.dot_dimension_numbers<[2], [1], [1], [2], [0, 0, 0, 1, 1, 2], [0], [0]>} : vector<2x8x8xbf16>, vector<2x8x64xbf16>, vector<2x8x64xf32> -> vector<2x8x64xf32>
    "tpu.trace_stop"() : () -> ()
    %259 = vector.shape_cast %258 : vector<2x8x64xf32> to vector<16x64xf32>
    %260 = arith.truncf %259 : vector<16x64xf32> to vector<16x64xbf16>
    %261 = vector.extract_strided_slice %200 {offsets = [64, 0], sizes = [64, 128], strides = [1, 1]} : vector<128x128xbf16> to vector<64x128xbf16>
    %cst_100 = arith.constant dense<0.000000e+00> : vector<16x128xf32>
    %262 = tpu.matmul %260, %261, %cst_100 {dimension_numbers = #tpu.dot_dimension_numbers<[1], [0], [0], [1], [0, 0, 1, 1], [], []>} : vector<16x64xbf16>, vector<64x128xbf16>, vector<16x128xf32> -> vector<16x128xf32>
    %263 = arith.addf %232, %262 : vector<16x128xf32>
    %c1_101 = arith.constant 1 : index
    %c0_102 = arith.constant 0 : index
    %c0_103 = arith.constant 0 : index
    %264 = vector.load %arg7[%c1_101, %c0_102, %c0_103] : memref<2x1x128xf32, #tpu.memory_space<vmem>>, vector<1x1x128xf32>
    %265 = vector.shape_cast %264 : vector<1x1x128xf32> to vector<1x128xf32>
    %266 = vector.broadcast %265 : vector<1x128xf32> to vector<16x128xf32>
    %267 = arith.addf %263, %266 : vector<16x128xf32>
    %268 = arith.addf %190, %267 : vector<16x128xf32>
    %c1_104 = arith.constant 1 : index
    %c0_105 = arith.constant 0 : index
    %c0_106 = arith.constant 0 : index
    %269 = vector.load %arg8[%c1_104, %c0_105, %c0_106] : memref<2x1x128xf32, #tpu.memory_space<vmem>>, vector<1x1x128xf32>
    %270 = vector.shape_cast %269 : vector<1x1x128xf32> to vector<1x128xf32>
    %c1_107 = arith.constant 1 : index
    %c0_108 = arith.constant 0 : index
    %c0_109 = arith.constant 0 : index
    %271 = vector.load %arg9[%c1_107, %c0_108, %c0_109] : memref<2x1x128xf32, #tpu.memory_space<vmem>>, vector<1x1x128xf32>
    %272 = vector.shape_cast %271 : vector<1x1x128xf32> to vector<1x128xf32>
    %cst_110 = arith.constant dense<0.000000e+00> : vector<16xf32>
    %273 = vector.multi_reduction <add>, %268, %cst_110 [1] : vector<16x128xf32> to vector<16xf32>
    %274 = vector.shape_cast %273 : vector<16xf32> to vector<16x1xf32>
    %cst_111 = arith.constant 1.280000e+02 : f32
    %275 = vector.broadcast %cst_111 : f32 to vector<16x1xf32>
    %276 = arith.divf %274, %275 : vector<16x1xf32>
    %277 = vector.broadcast %276 : vector<16x1xf32> to vector<16x128xf32>
    %278 = arith.subf %268, %277 : vector<16x128xf32>
    %279 = arith.mulf %278, %278 : vector<16x128xf32>
    %cst_112 = arith.constant dense<0.000000e+00> : vector<16xf32>
    %280 = vector.multi_reduction <add>, %279, %cst_112 [1] : vector<16x128xf32> to vector<16xf32>
    %281 = vector.shape_cast %280 : vector<16xf32> to vector<16x1xf32>
    %cst_113 = arith.constant 1.280000e+02 : f32
    %282 = vector.broadcast %cst_113 : f32 to vector<16x1xf32>
    %283 = arith.divf %281, %282 : vector<16x1xf32>
    %284 = vector.broadcast %276 : vector<16x1xf32> to vector<16x128xf32>
    %285 = arith.subf %268, %284 : vector<16x128xf32>
    %cst_114 = arith.constant 9.99999996E-13 : f32
    %286 = vector.broadcast %cst_114 : f32 to vector<16x1xf32>
    %287 = arith.addf %283, %286 : vector<16x1xf32>
    %288 = math.rsqrt %287 : vector<16x1xf32>
    %289 = vector.broadcast %288 : vector<16x1xf32> to vector<16x128xf32>
    %290 = arith.mulf %285, %289 : vector<16x128xf32>
    %291 = vector.broadcast %270 : vector<1x128xf32> to vector<16x128xf32>
    %292 = arith.mulf %290, %291 : vector<16x128xf32>
    %293 = vector.broadcast %272 : vector<1x128xf32> to vector<16x128xf32>
    %294 = arith.addf %292, %293 : vector<16x128xf32>
    %295 = arith.truncf %294 : vector<16x128xf32> to vector<16x128xbf16>
    %c1_115 = arith.constant 1 : index
    %c0_116 = arith.constant 0 : index
    %c0_117 = arith.constant 0 : index
    %296 = vector.load %arg10[%c1_115, %c0_116, %c0_117] : memref<2x128x256xbf16, #tpu.memory_space<vmem>>, vector<1x128x256xbf16>
    %297 = vector.shape_cast %296 : vector<1x128x256xbf16> to vector<128x256xbf16>
    %cst_118 = arith.constant dense<0.000000e+00> : vector<16x256xf32>
    %298 = tpu.matmul %295, %297, %cst_118 {dimension_numbers = #tpu.dot_dimension_numbers<[1], [0], [0], [1], [0, 0, 1, 1], [], []>} : vector<16x128xbf16>, vector<128x256xbf16>, vector<16x256xf32> -> vector<16x256xf32>
    %c1_119 = arith.constant 1 : index
    %c0_120 = arith.constant 0 : index
    %c0_121 = arith.constant 0 : index
    %299 = vector.load %arg11[%c1_119, %c0_120, %c0_121] : memref<2x1x256xf32, #tpu.memory_space<vmem>>, vector<1x1x256xf32>
    %300 = vector.shape_cast %299 : vector<1x1x256xf32> to vector<1x256xf32>
    %301 = vector.broadcast %300 : vector<1x256xf32> to vector<16x256xf32>
    %302 = arith.addf %298, %301 : vector<16x256xf32>
    %cst_122 = arith.constant 5.000000e-01 : f32
    %303 = vector.broadcast %cst_122 : f32 to vector<16x256xf32>
    %304 = arith.mulf %303, %302 : vector<16x256xf32>
    %cst_123 = arith.constant 4.471500e-02 : f32
    %305 = vector.broadcast %cst_123 : f32 to vector<16x256xf32>
    %306 = arith.mulf %305, %302 : vector<16x256xf32>
    %307 = arith.mulf %306, %302 : vector<16x256xf32>
    %308 = arith.mulf %307, %302 : vector<16x256xf32>
    %309 = arith.addf %302, %308 : vector<16x256xf32>
    %cst_124 = arith.constant 0.797884583 : f32
    %310 = vector.broadcast %cst_124 : f32 to vector<16x256xf32>
    %311 = arith.mulf %310, %309 : vector<16x256xf32>
    %312 = math.tanh %311 : vector<16x256xf32>
    %cst_125 = arith.constant 1.000000e+00 : f32
    %313 = vector.broadcast %cst_125 : f32 to vector<16x256xf32>
    %314 = arith.addf %313, %312 : vector<16x256xf32>
    %315 = arith.mulf %304, %314 : vector<16x256xf32>
    %316 = arith.truncf %315 : vector<16x256xf32> to vector<16x256xbf16>
    %c1_126 = arith.constant 1 : index
    %c0_127 = arith.constant 0 : index
    %c0_128 = arith.constant 0 : index
    %317 = vector.load %arg12[%c1_126, %c0_127, %c0_128] : memref<2x256x128xbf16, #tpu.memory_space<vmem>>, vector<1x256x128xbf16>
    %318 = vector.shape_cast %317 : vector<1x256x128xbf16> to vector<256x128xbf16>
    %cst_129 = arith.constant dense<0.000000e+00> : vector<16x128xf32>
    %319 = tpu.matmul %316, %318, %cst_129 {dimension_numbers = #tpu.dot_dimension_numbers<[1], [0], [0], [1], [0, 0, 1, 1], [], []>} : vector<16x256xbf16>, vector<256x128xbf16>, vector<16x128xf32> -> vector<16x128xf32>
    %c1_130 = arith.constant 1 : index
    %c0_131 = arith.constant 0 : index
    %c0_132 = arith.constant 0 : index
    %320 = vector.load %arg13[%c1_130, %c0_131, %c0_132] : memref<2x1x128xf32, #tpu.memory_space<vmem>>, vector<1x1x128xf32>
    %321 = vector.shape_cast %320 : vector<1x1x128xf32> to vector<1x128xf32>
    %322 = vector.broadcast %321 : vector<1x128xf32> to vector<16x128xf32>
    %323 = arith.addf %319, %322 : vector<16x128xf32>
    %324 = arith.addf %294, %323 : vector<16x128xf32>
    %c1_133 = arith.constant 1 : index
    %c0_134 = arith.constant 0 : index
    %c0_135 = arith.constant 0 : index
    %325 = vector.load %arg14[%c1_133, %c0_134, %c0_135] : memref<2x1x128xf32, #tpu.memory_space<vmem>>, vector<1x1x128xf32>
    %326 = vector.shape_cast %325 : vector<1x1x128xf32> to vector<1x128xf32>
    %c1_136 = arith.constant 1 : index
    %c0_137 = arith.constant 0 : index
    %c0_138 = arith.constant 0 : index
    %327 = vector.load %arg15[%c1_136, %c0_137, %c0_138] : memref<2x1x128xf32, #tpu.memory_space<vmem>>, vector<1x1x128xf32>
    %328 = vector.shape_cast %327 : vector<1x1x128xf32> to vector<1x128xf32>
    %cst_139 = arith.constant dense<0.000000e+00> : vector<16xf32>
    %329 = vector.multi_reduction <add>, %324, %cst_139 [1] : vector<16x128xf32> to vector<16xf32>
    %330 = vector.shape_cast %329 : vector<16xf32> to vector<16x1xf32>
    %cst_140 = arith.constant 1.280000e+02 : f32
    %331 = vector.broadcast %cst_140 : f32 to vector<16x1xf32>
    %332 = arith.divf %330, %331 : vector<16x1xf32>
    %333 = vector.broadcast %332 : vector<16x1xf32> to vector<16x128xf32>
    %334 = arith.subf %324, %333 : vector<16x128xf32>
    %335 = arith.mulf %334, %334 : vector<16x128xf32>
    %cst_141 = arith.constant dense<0.000000e+00> : vector<16xf32>
    %336 = vector.multi_reduction <add>, %335, %cst_141 [1] : vector<16x128xf32> to vector<16xf32>
    %337 = vector.shape_cast %336 : vector<16xf32> to vector<16x1xf32>
    %cst_142 = arith.constant 1.280000e+02 : f32
    %338 = vector.broadcast %cst_142 : f32 to vector<16x1xf32>
    %339 = arith.divf %337, %338 : vector<16x1xf32>
    %340 = vector.broadcast %332 : vector<16x1xf32> to vector<16x128xf32>
    %341 = arith.subf %324, %340 : vector<16x128xf32>
    %cst_143 = arith.constant 9.99999996E-13 : f32
    %342 = vector.broadcast %cst_143 : f32 to vector<16x1xf32>
    %343 = arith.addf %339, %342 : vector<16x1xf32>
    %344 = math.rsqrt %343 : vector<16x1xf32>
    %345 = vector.broadcast %344 : vector<16x1xf32> to vector<16x128xf32>
    %346 = arith.mulf %341, %345 : vector<16x128xf32>
    %347 = vector.broadcast %326 : vector<1x128xf32> to vector<16x128xf32>
    %348 = arith.mulf %346, %347 : vector<16x128xf32>
    %349 = vector.broadcast %328 : vector<1x128xf32> to vector<16x128xf32>
    %350 = arith.addf %348, %349 : vector<16x128xf32>
    %351 = arith.truncf %350 : vector<16x128xf32> to vector<16x128xbf16>
    %c0_144 = arith.constant 0 : index
    %c0_145 = arith.constant 0 : index
    %352 = vector.load %arg16[%c0_144, %c0_145] : memref<128x128xbf16, #tpu.memory_space<vmem>>, vector<128x128xbf16>
    %cst_146 = arith.constant dense<0.000000e+00> : vector<16x128xf32>
    %353 = tpu.matmul %351, %352, %cst_146 {dimension_numbers = #tpu.dot_dimension_numbers<[1], [0], [0], [1], [0, 0, 1, 1], [], []>} : vector<16x128xbf16>, vector<128x128xbf16>, vector<16x128xf32> -> vector<16x128xf32>
    %c0_147 = arith.constant 0 : index
    %c0_148 = arith.constant 0 : index
    %354 = vector.load %arg17[%c0_147, %c0_148] : memref<1x128xf32, #tpu.memory_space<vmem>>, vector<1x128xf32>
    %355 = vector.broadcast %354 : vector<1x128xf32> to vector<16x128xf32>
    %356 = arith.addf %353, %355 : vector<16x128xf32>
    %c0_149 = arith.constant 0 : index
    %c0_150 = arith.constant 0 : index
    %357 = vector.load %arg18[%c0_149, %c0_150] : memref<16x128xf32, #tpu.memory_space<vmem>>, vector<16x128xf32>
    tpu.vector_store %arg18[%c0_149, %c0_150], %356 {strides = array<i32>} : memref<16x128xf32, #tpu.memory_space<vmem>>, vector<16x128xf32>,
    return
  }
}

module attributes {stable_mosaic.version = 11 : i64} {
  func.func @_bert_forward_kernel(%arg0: memref<16x128xf32, #tpu.memory_space<vmem>>, %arg1: memref<2x8xf32, #tpu.memory_space<vmem>>, %arg2: memref<1x128xf32, #tpu.memory_space<vmem>>, %arg3: memref<1x128xf32, #tpu.memory_space<vmem>>, %arg4: memref<2x128x384xbf16, #tpu.memory_space<vmem>>, %arg5: memref<2x1x384xf32, #tpu.memory_space<vmem>>, %arg6: memref<2x128x128xbf16, #tpu.memory_space<vmem>>, %arg7: memref<2x1x128xf32, #tpu.memory_space<vmem>>, %arg8: memref<2x1x128xf32, #tpu.memory_space<vmem>>, %arg9: memref<2x1x128xf32, #tpu.memory_space<vmem>>, %arg10: memref<2x128x256xbf16, #tpu.memory_space<vmem>>, %arg11: memref<2x1x256xf32, #tpu.memory_space<vmem>>, %arg12: memref<2x256x128xbf16, #tpu.memory_space<vmem>>, %arg13: memref<2x1x128xf32, #tpu.memory_space<vmem>>, %arg14: memref<2x1x128xf32, #tpu.memory_space<vmem>>, %arg15: memref<2x1x128xf32, #tpu.memory_space<vmem>>, %arg16: memref<128x128xbf16, #tpu.memory_space<vmem>>, %arg17: memref<1x128xf32, #tpu.memory_space<vmem>>, %arg18: memref<16x128xf32, #tpu.memory_space<vmem>>) attributes {dimension_semantics = [], scalar_prefetch = 0 : i64, scratch_operands = 0 : i64, tpu.core_type = #tpu.core_type<tc>} {
    %c0 = arith.constant 0 : index
    %c0_0 = arith.constant 0 : index
    %0 = vector.load %arg0[%c0, %c0_0] : memref<16x128xf32, #tpu.memory_space<vmem>>, vector<16x128xf32>
    %c0_1 = arith.constant 0 : index
    %c0_2 = arith.constant 0 : index
    %1 = vector.load %arg2[%c0_1, %c0_2] : memref<1x128xf32, #tpu.memory_space<vmem>>, vector<1x128xf32>
    %c0_3 = arith.constant 0 : index
    %c0_4 = arith.constant 0 : index
    %2 = vector.load %arg3[%c0_3, %c0_4] : memref<1x128xf32, #tpu.memory_space<vmem>>, vector<1x128xf32>
    %cst = arith.constant dense<0.000000e+00> : vector<16xf32>
    %3 = vector.multi_reduction <add>, %0, %cst [1] : vector<16x128xf32> to vector<16xf32>
    %4 = vector.shape_cast %3 : vector<16xf32> to vector<16x1xf32>
    %cst_5 = arith.constant 1.280000e+02 : f32
    %5 = vector.broadcast %cst_5 : f32 to vector<16x1xf32>
    %6 = arith.divf %4, %5 : vector<16x1xf32>
    %7 = vector.broadcast %6 : vector<16x1xf32> to vector<16x128xf32>
    %8 = arith.subf %0, %7 : vector<16x128xf32>
    %9 = arith.mulf %8, %8 : vector<16x128xf32>
    %cst_6 = arith.constant dense<0.000000e+00> : vector<16xf32>
    %10 = vector.multi_reduction <add>, %9, %cst_6 [1] : vector<16x128xf32> to vector<16xf32>
    %11 = vector.shape_cast %10 : vector<16xf32> to vector<16x1xf32>
    %cst_7 = arith.constant 1.280000e+02 : f32
    %12 = vector.broadcast %cst_7 : f32 to vector<16x1xf32>
    %13 = arith.divf %11, %12 : vector<16x1xf32>
    %14 = vector.broadcast %6 : vector<16x1xf32> to vector<16x128xf32>
    %15 = arith.subf %0, %14 : vector<16x128xf32>
    %cst_8 = arith.constant 9.99999996E-13 : f32
    %16 = vector.broadcast %cst_8 : f32 to vector<16x1xf32>
    %17 = arith.addf %13, %16 : vector<16x1xf32>
    %18 = math.rsqrt %17 : vector<16x1xf32>
    %19 = vector.broadcast %18 : vector<16x1xf32> to vector<16x128xf32>
    %20 = arith.mulf %15, %19 : vector<16x128xf32>
    %21 = vector.broadcast %1 : vector<1x128xf32> to vector<16x128xf32>
    %22 = arith.mulf %20, %21 : vector<16x128xf32>
    %23 = vector.broadcast %2 : vector<1x128xf32> to vector<16x128xf32>
    %24 = arith.addf %22, %23 : vector<16x128xf32>
    %c0_9 = arith.constant 0 : index
    %c0_10 = arith.constant 0 : index
    %25 = vector.load %arg1[%c0_9, %c0_10] : memref<2x8xf32, #tpu.memory_space<vmem>>, vector<2x8xf32>
    %cst_11 = arith.constant 1.000000e+00 : f32
    %26 = vector.broadcast %cst_11 : f32 to vector<2x8xf32>
    %27 = arith.subf %26, %25 : vector<2x8xf32>
    %cst_12 = arith.constant -1.000000e+09 : f32
    %28 = vector.broadcast %cst_12 : f32 to vector<2x8xf32>
    %29 = arith.mulf %27, %28 : vector<2x8xf32>
    %30 = vector.shape_cast %29 : vector<2x8xf32> to vector<2x1x8xf32>
    %31 = arith.truncf %24 : vector<16x128xf32> to vector<16x128xbf16>
    %c0_13 = arith.constant 0 : index
    %c0_14 = arith.constant 0 : index
    %c0_15 = arith.constant 0 : index
    %32 = vector.load %arg4[%c0_13, %c0_14, %c0_15] : memref<2x128x384xbf16, #tpu.memory_space<vmem>>, vector<1x128x384xbf16>
    %33 = vector.shape_cast %32 : vector<1x128x384xbf16> to vector<128x384xbf16>
    %cst_16 = arith.constant dense<0.000000e+00> : vector<16x384xf32>
    %34 = tpu.matmul %31, %33, %cst_16 {dimension_numbers = #tpu.dot_dimension_numbers<[1], [0], [0], [1], [0, 0, 1, 1], [], []>} : vector<16x128xbf16>, vector<128x384xbf16>, vector<16x384xf32> -> vector<16x384xf32>
    %c0_17 = arith.constant 0 : index
    %c0_18 = arith.constant 0 : index
    %c0_19 = arith.constant 0 : index
    %35 = vector.load %arg5[%c0_17, %c0_18, %c0_19] : memref<2x1x384xf32, #tpu.memory_space<vmem>>, vector<1x1x384xf32>
    %36 = vector.shape_cast %35 : vector<1x1x384xf32> to vector<1x384xf32>
    %37 = vector.broadcast %36 : vector<1x384xf32> to vector<16x384xf32>
    %38 = arith.addf %34, %37 : vector<16x384xf32>
    %c0_20 = arith.constant 0 : index
    %c0_21 = arith.constant 0 : index
    %c0_22 = arith.constant 0 : index
    %39 = vector.load %arg6[%c0_20, %c0_21, %c0_22] : memref<2x128x128xbf16, #tpu.memory_space<vmem>>, vector<1x128x128xbf16>
    %40 = vector.shape_cast %39 : vector<1x128x128xbf16> to vector<128x128xbf16>
    %cst_23 = arith.constant 0.000000e+00 : f32
    %41 = vector.broadcast %cst_23 : f32 to vector<16x128xf32>
    %42 = vector.extract_strided_slice %38 {offsets = [0, 0], sizes = [16, 64], strides = [1, 1]} : vector<16x384xf32> to vector<16x64xf32>
    %43 = vector.shape_cast %42 : vector<16x64xf32> to vector<2x8x64xf32>
    %44 = arith.truncf %43 : vector<2x8x64xf32> to vector<2x8x64xbf16>
    %45 = vector.extract_strided_slice %38 {offsets = [0, 128], sizes = [16, 64], strides = [1, 1]} : vector<16x384xf32> to vector<16x64xf32>
    %46 = vector.shape_cast %45 : vector<16x64xf32> to vector<2x8x64xf32>
    %47 = arith.truncf %46 : vector<2x8x64xf32> to vector<2x8x64xbf16>
    %48 = vector.extract_strided_slice %38 {offsets = [0, 256], sizes = [16, 64], strides = [1, 1]} : vector<16x384xf32> to vector<16x64xf32>
    %49 = vector.shape_cast %48 : vector<16x64xf32> to vector<2x8x64xf32>
    %50 = arith.truncf %49 : vector<2x8x64xf32> to vector<2x8x64xbf16>
    "tpu.trace_start"() <{level = 10 : i32, message = "bqd,bkd->bqk"}> : () -> ()
    %cst_24 = arith.constant dense<0.000000e+00> : vector<2x8x8xf32>
    %51 = tpu.matmul %44, %47, %cst_24 {dimension_numbers = #tpu.dot_dimension_numbers<[2], [2], [1], [1], [0, 0, 0, 1, 1, 1], [0], [0]>} : vector<2x8x64xbf16>, vector<2x8x64xbf16>, vector<2x8x8xf32> -> vector<2x8x8xf32>
    "tpu.trace_stop"() : () -> ()
    %cst_25 = arith.constant 1.250000e-01 : f32
    %52 = vector.broadcast %cst_25 : f32 to vector<2x8x8xf32>
    %53 = arith.mulf %51, %52 : vector<2x8x8xf32>
    %54 = vector.broadcast %30 : vector<2x1x8xf32> to vector<2x8x8xf32>
    %55 = arith.addf %53, %54 : vector<2x8x8xf32>
    %cst_26 = arith.constant dense<0xFF800000> : vector<2x8xf32>
    %56 = vector.multi_reduction <maximumf>, %55, %cst_26 [2] : vector<2x8x8xf32> to vector<2x8xf32>
    %57 = vector.shape_cast %56 : vector<2x8xf32> to vector<2x8x1xf32>
    %58 = vector.broadcast %57 : vector<2x8x1xf32> to vector<2x8x8xf32>
    %59 = arith.subf %55, %58 : vector<2x8x8xf32>
    %60 = math.exp %59 : vector<2x8x8xf32>
    %cst_27 = arith.constant dense<0.000000e+00> : vector<2x8xf32>
    %61 = vector.multi_reduction <add>, %60, %cst_27 [2] : vector<2x8x8xf32> to vector<2x8xf32>
    %62 = vector.shape_cast %61 : vector<2x8xf32> to vector<2x8x1xf32>
    %63 = tpu.reciprocal %62 {approx = true} : vector<2x8x1xf32> -> vector<2x8x1xf32>
    %64 = vector.broadcast %63 : vector<2x8x1xf32> to vector<2x8x8xf32>
    %65 = arith.mulf %60, %64 : vector<2x8x8xf32>
    %66 = arith.truncf %65 : vector<2x8x8xf32> to vector<2x8x8xbf16>
    "tpu.trace_start"() <{level = 10 : i32, message = "bqk,bkd->bqd"}> : () -> ()
    %cst_28 = arith.constant dense<0.000000e+00> : vector<2x8x64xf32>
    %67 = tpu.matmul %66, %50, %cst_28 {dimension_numbers = #tpu.dot_dimension_numbers<[2], [1], [1], [2], [0, 0, 0, 1, 1, 2], [0], [0]>} : vector<2x8x8xbf16>, vector<2x8x64xbf16>, vector<2x8x64xf32> -> vector<2x8x64xf32>
    "tpu.trace_stop"() : () -> ()
    %68 = vector.shape_cast %67 : vector<2x8x64xf32> to vector<16x64xf32>
    %69 = arith.truncf %68 : vector<16x64xf32> to vector<16x64xbf16>
    %70 = vector.extract_strided_slice %40 {offsets = [0, 0], sizes = [64, 128], strides = [1, 1]} : vector<128x128xbf16> to vector<64x128xbf16>
    %cst_29 = arith.constant dense<0.000000e+00> : vector<16x128xf32>
    %71 = tpu.matmul %69, %70, %cst_29 {dimension_numbers = #tpu.dot_dimension_numbers<[1], [0], [0], [1], [0, 0, 1, 1], [], []>} : vector<16x64xbf16>, vector<64x128xbf16>, vector<16x128xf32> -> vector<16x128xf32>
    %72 = arith.addf %41, %71 : vector<16x128xf32>
    %73 = vector.extract_strided_slice %38 {offsets = [0, 64], sizes = [16, 64], strides = [1, 1]} : vector<16x384xf32> to vector<16x64xf32>
    %74 = vector.shape_cast %73 : vector<16x64xf32> to vector<2x8x64xf32>
    %75 = arith.truncf %74 : vector<2x8x64xf32> to vector<2x8x64xbf16>
    %76 = vector.extract_strided_slice %38 {offsets = [0, 192], sizes = [16, 64], strides = [1, 1]} : vector<16x384xf32> to vector<16x64xf32>
    %77 = vector.shape_cast %76 : vector<16x64xf32> to vector<2x8x64xf32>
    %78 = arith.truncf %77 : vector<2x8x64xf32> to vector<2x8x64xbf16>
    %79 = vector.extract_strided_slice %38 {offsets = [0, 320], sizes = [16, 64], strides = [1, 1]} : vector<16x384xf32> to vector<16x64xf32>
    %80 = vector.shape_cast %79 : vector<16x64xf32> to vector<2x8x64xf32>
    %81 = arith.truncf %80 : vector<2x8x64xf32> to vector<2x8x64xbf16>
    "tpu.trace_start"() <{level = 10 : i32, message = "bqd,bkd->bqk"}> : () -> ()
    %cst_30 = arith.constant dense<0.000000e+00> : vector<2x8x8xf32>
    %82 = tpu.matmul %75, %78, %cst_30 {dimension_numbers = #tpu.dot_dimension_numbers<[2], [2], [1], [1], [0, 0, 0, 1, 1, 1], [0], [0]>} : vector<2x8x64xbf16>, vector<2x8x64xbf16>, vector<2x8x8xf32> -> vector<2x8x8xf32>
    "tpu.trace_stop"() : () -> ()
    %cst_31 = arith.constant 1.250000e-01 : f32
    %83 = vector.broadcast %cst_31 : f32 to vector<2x8x8xf32>
    %84 = arith.mulf %82, %83 : vector<2x8x8xf32>
    %85 = vector.broadcast %30 : vector<2x1x8xf32> to vector<2x8x8xf32>
    %86 = arith.addf %84, %85 : vector<2x8x8xf32>
    %cst_32 = arith.constant dense<0xFF800000> : vector<2x8xf32>
    %87 = vector.multi_reduction <maximumf>, %86, %cst_32 [2] : vector<2x8x8xf32> to vector<2x8xf32>
    %88 = vector.shape_cast %87 : vector<2x8xf32> to vector<2x8x1xf32>
    %89 = vector.broadcast %88 : vector<2x8x1xf32> to vector<2x8x8xf32>
    %90 = arith.subf %86, %89 : vector<2x8x8xf32>
    %91 = math.exp %90 : vector<2x8x8xf32>
    %cst_33 = arith.constant dense<0.000000e+00> : vector<2x8xf32>
    %92 = vector.multi_reduction <add>, %91, %cst_33 [2] : vector<2x8x8xf32> to vector<2x8xf32>
    %93 = vector.shape_cast %92 : vector<2x8xf32> to vector<2x8x1xf32>
    %94 = tpu.reciprocal %93 {approx = true} : vector<2x8x1xf32> -> vector<2x8x1xf32>
    %95 = vector.broadcast %94 : vector<2x8x1xf32> to vector<2x8x8xf32>
    %96 = arith.mulf %91, %95 : vector<2x8x8xf32>
    %97 = arith.truncf %96 : vector<2x8x8xf32> to vector<2x8x8xbf16>
    "tpu.trace_start"() <{level = 10 : i32, message = "bqk,bkd->bqd"}> : () -> ()
    %cst_34 = arith.constant dense<0.000000e+00> : vector<2x8x64xf32>
    %98 = tpu.matmul %97, %81, %cst_34 {dimension_numbers = #tpu.dot_dimension_numbers<[2], [1], [1], [2], [0, 0, 0, 1, 1, 2], [0], [0]>} : vector<2x8x8xbf16>, vector<2x8x64xbf16>, vector<2x8x64xf32> -> vector<2x8x64xf32>
    "tpu.trace_stop"() : () -> ()
    %99 = vector.shape_cast %98 : vector<2x8x64xf32> to vector<16x64xf32>
    %100 = arith.truncf %99 : vector<16x64xf32> to vector<16x64xbf16>
    %101 = vector.extract_strided_slice %40 {offsets = [64, 0], sizes = [64, 128], strides = [1, 1]} : vector<128x128xbf16> to vector<64x128xbf16>
    %cst_35 = arith.constant dense<0.000000e+00> : vector<16x128xf32>
    %102 = tpu.matmul %100, %101, %cst_35 {dimension_numbers = #tpu.dot_dimension_numbers<[1], [0], [0], [1], [0, 0, 1, 1], [], []>} : vector<16x64xbf16>, vector<64x128xbf16>, vector<16x128xf32> -> vector<16x128xf32>
    %103 = arith.addf %72, %102 : vector<16x128xf32>
    %c0_36 = arith.constant 0 : index
    %c0_37 = arith.constant 0 : index
    %c0_38 = arith.constant 0 : index
    %104 = vector.load %arg7[%c0_36, %c0_37, %c0_38] : memref<2x1x128xf32, #tpu.memory_space<vmem>>, vector<1x1x128xf32>
    %105 = vector.shape_cast %104 : vector<1x1x128xf32> to vector<1x128xf32>
    %106 = vector.broadcast %105 : vector<1x128xf32> to vector<16x128xf32>
    %107 = arith.addf %103, %106 : vector<16x128xf32>
    %108 = arith.addf %24, %107 : vector<16x128xf32>
    %c0_39 = arith.constant 0 : index
    %c0_40 = arith.constant 0 : index
    %c0_41 = arith.constant 0 : index
    %109 = vector.load %arg8[%c0_39, %c0_40, %c0_41] : memref<2x1x128xf32, #tpu.memory_space<vmem>>, vector<1x1x128xf32>
    %110 = vector.shape_cast %109 : vector<1x1x128xf32> to vector<1x128xf32>
    %c0_42 = arith.constant 0 : index
    %c0_43 = arith.constant 0 : index
    %c0_44 = arith.constant 0 : index
    %111 = vector.load %arg9[%c0_42, %c0_43, %c0_44] : memref<2x1x128xf32, #tpu.memory_space<vmem>>, vector<1x1x128xf32>
    %112 = vector.shape_cast %111 : vector<1x1x128xf32> to vector<1x128xf32>
    %cst_45 = arith.constant dense<0.000000e+00> : vector<16xf32>
    %113 = vector.multi_reduction <add>, %108, %cst_45 [1] : vector<16x128xf32> to vector<16xf32>
    %114 = vector.shape_cast %113 : vector<16xf32> to vector<16x1xf32>
    %cst_46 = arith.constant 1.280000e+02 : f32
    %115 = vector.broadcast %cst_46 : f32 to vector<16x1xf32>
    %116 = arith.divf %114, %115 : vector<16x1xf32>
    %117 = vector.broadcast %116 : vector<16x1xf32> to vector<16x128xf32>
    %118 = arith.subf %108, %117 : vector<16x128xf32>
    %119 = arith.mulf %118, %118 : vector<16x128xf32>
    %cst_47 = arith.constant dense<0.000000e+00> : vector<16xf32>
    %120 = vector.multi_reduction <add>, %119, %cst_47 [1] : vector<16x128xf32> to vector<16xf32>
    %121 = vector.shape_cast %120 : vector<16xf32> to vector<16x1xf32>
    %cst_48 = arith.constant 1.280000e+02 : f32
    %122 = vector.broadcast %cst_48 : f32 to vector<16x1xf32>
    %123 = arith.divf %121, %122 : vector<16x1xf32>
    %124 = vector.broadcast %116 : vector<16x1xf32> to vector<16x128xf32>
    %125 = arith.subf %108, %124 : vector<16x128xf32>
    %cst_49 = arith.constant 9.99999996E-13 : f32
    %126 = vector.broadcast %cst_49 : f32 to vector<16x1xf32>
    %127 = arith.addf %123, %126 : vector<16x1xf32>
    %128 = math.rsqrt %127 : vector<16x1xf32>
    %129 = vector.broadcast %128 : vector<16x1xf32> to vector<16x128xf32>
    %130 = arith.mulf %125, %129 : vector<16x128xf32>
    %131 = vector.broadcast %110 : vector<1x128xf32> to vector<16x128xf32>
    %132 = arith.mulf %130, %131 : vector<16x128xf32>
    %133 = vector.broadcast %112 : vector<1x128xf32> to vector<16x128xf32>
    %134 = arith.addf %132, %133 : vector<16x128xf32>
    %135 = arith.truncf %134 : vector<16x128xf32> to vector<16x128xbf16>
    %c0_50 = arith.constant 0 : index
    %c0_51 = arith.constant 0 : index
    %c0_52 = arith.constant 0 : index
    %136 = vector.load %arg10[%c0_50, %c0_51, %c0_52] : memref<2x128x256xbf16, #tpu.memory_space<vmem>>, vector<1x128x256xbf16>
    %137 = vector.shape_cast %136 : vector<1x128x256xbf16> to vector<128x256xbf16>
    %cst_53 = arith.constant dense<0.000000e+00> : vector<16x256xf32>
    %138 = tpu.matmul %135, %137, %cst_53 {dimension_numbers = #tpu.dot_dimension_numbers<[1], [0], [0], [1], [0, 0, 1, 1], [], []>} : vector<16x128xbf16>, vector<128x256xbf16>, vector<16x256xf32> -> vector<16x256xf32>
    %c0_54 = arith.constant 0 : index
    %c0_55 = arith.constant 0 : index
    %c0_56 = arith.constant 0 : index
    %139 = vector.load %arg11[%c0_54, %c0_55, %c0_56] : memref<2x1x256xf32, #tpu.memory_space<vmem>>, vector<1x1x256xf32>
    %140 = vector.shape_cast %139 : vector<1x1x256xf32> to vector<1x256xf32>
    %141 = vector.broadcast %140 : vector<1x256xf32> to vector<16x256xf32>
    %142 = arith.addf %138, %141 : vector<16x256xf32>
    %cst_57 = arith.constant 5.000000e-01 : f32
    %143 = vector.broadcast %cst_57 : f32 to vector<16x256xf32>
    %144 = arith.mulf %143, %142 : vector<16x256xf32>
    %cst_58 = arith.constant 4.471500e-02 : f32
    %145 = vector.broadcast %cst_58 : f32 to vector<16x256xf32>
    %146 = arith.mulf %145, %142 : vector<16x256xf32>
    %147 = arith.mulf %146, %142 : vector<16x256xf32>
    %148 = arith.mulf %147, %142 : vector<16x256xf32>
    %149 = arith.addf %142, %148 : vector<16x256xf32>
    %cst_59 = arith.constant 0.797884583 : f32
    %150 = vector.broadcast %cst_59 : f32 to vector<16x256xf32>
    %151 = arith.mulf %150, %149 : vector<16x256xf32>
    %152 = math.tanh %151 : vector<16x256xf32>
    %cst_60 = arith.constant 1.000000e+00 : f32
    %153 = vector.broadcast %cst_60 : f32 to vector<16x256xf32>
    %154 = arith.addf %153, %152 : vector<16x256xf32>
    %155 = arith.mulf %144, %154 : vector<16x256xf32>
    %156 = arith.truncf %155 : vector<16x256xf32> to vector<16x256xbf16>
    %c0_61 = arith.constant 0 : index
    %c0_62 = arith.constant 0 : index
    %c0_63 = arith.constant 0 : index
    %157 = vector.load %arg12[%c0_61, %c0_62, %c0_63] : memref<2x256x128xbf16, #tpu.memory_space<vmem>>, vector<1x256x128xbf16>
    %158 = vector.shape_cast %157 : vector<1x256x128xbf16> to vector<256x128xbf16>
    %cst_64 = arith.constant dense<0.000000e+00> : vector<16x128xf32>
    %159 = tpu.matmul %156, %158, %cst_64 {dimension_numbers = #tpu.dot_dimension_numbers<[1], [0], [0], [1], [0, 0, 1, 1], [], []>} : vector<16x256xbf16>, vector<256x128xbf16>, vector<16x128xf32> -> vector<16x128xf32>
    %c0_65 = arith.constant 0 : index
    %c0_66 = arith.constant 0 : index
    %c0_67 = arith.constant 0 : index
    %160 = vector.load %arg13[%c0_65, %c0_66, %c0_67] : memref<2x1x128xf32, #tpu.memory_space<vmem>>, vector<1x1x128xf32>
    %161 = vector.shape_cast %160 : vector<1x1x128xf32> to vector<1x128xf32>
    %162 = vector.broadcast %161 : vector<1x128xf32> to vector<16x128xf32>
    %163 = arith.addf %159, %162 : vector<16x128xf32>
    %164 = arith.addf %134, %163 : vector<16x128xf32>
    %c0_68 = arith.constant 0 : index
    %c0_69 = arith.constant 0 : index
    %c0_70 = arith.constant 0 : index
    %165 = vector.load %arg14[%c0_68, %c0_69, %c0_70] : memref<2x1x128xf32, #tpu.memory_space<vmem>>, vector<1x1x128xf32>
    %166 = vector.shape_cast %165 : vector<1x1x128xf32> to vector<1x128xf32>
    %c0_71 = arith.constant 0 : index
    %c0_72 = arith.constant 0 : index
    %c0_73 = arith.constant 0 : index
    %167 = vector.load %arg15[%c0_71, %c0_72, %c0_73] : memref<2x1x128xf32, #tpu.memory_space<vmem>>, vector<1x1x128xf32>
    %168 = vector.shape_cast %167 : vector<1x1x128xf32> to vector<1x128xf32>
    %cst_74 = arith.constant dense<0.000000e+00> : vector<16xf32>
    %169 = vector.multi_reduction <add>, %164, %cst_74 [1] : vector<16x128xf32> to vector<16xf32>
    %170 = vector.shape_cast %169 : vector<16xf32> to vector<16x1xf32>
    %cst_75 = arith.constant 1.280000e+02 : f32
    %171 = vector.broadcast %cst_75 : f32 to vector<16x1xf32>
    %172 = arith.divf %170, %171 : vector<16x1xf32>
    %173 = vector.broadcast %172 : vector<16x1xf32> to vector<16x128xf32>
    %174 = arith.subf %164, %173 : vector<16x128xf32>
    %175 = arith.mulf %174, %174 : vector<16x128xf32>
    %cst_76 = arith.constant dense<0.000000e+00> : vector<16xf32>
    %176 = vector.multi_reduction <add>, %175, %cst_76 [1] : vector<16x128xf32> to vector<16xf32>
    %177 = vector.shape_cast %176 : vector<16xf32> to vector<16x1xf32>
    %cst_77 = arith.constant 1.280000e+02 : f32
    %178 = vector.broadcast %cst_77 : f32 to vector<16x1xf32>
    %179 = arith.divf %177, %178 : vector<16x1xf32>
    %180 = vector.broadcast %172 : vector<16x1xf32> to vector<16x128xf32>
    %181 = arith.subf %164, %180 : vector<16x128xf32>
    %cst_78 = arith.constant 9.99999996E-13 : f32
    %182 = vector.broadcast %cst_78 : f32 to vector<16x1xf32>
    %183 = arith.addf %179, %182 : vector<16x1xf32>
    %184 = math.rsqrt %183 : vector<16x1xf32>
    %185 = vector.broadcast %184 : vector<16x1xf32> to vector<16x128xf32>
    %186 = arith.mulf %181, %185 : vector<16x128xf32>
    %187 = vector.broadcast %166 : vector<1x128xf32> to vector<16x128xf32>
    %188 = arith.mulf %186, %187 : vector<16x128xf32>
    %189 = vector.broadcast %168 : vector<1x128xf32> to vector<16x128xf32>
    %190 = arith.addf %188, %189 : vector<16x128xf32>
    %191 = arith.truncf %190 : vector<16x128xf32> to vector<16x128xbf16>
    %c1 = arith.constant 1 : index
    %c0_79 = arith.constant 0 : index
    %c0_80 = arith.constant 0 : index
    %192 = vector.load %arg4[%c1, %c0_79, %c0_80] : memref<2x128x384xbf16, #tpu.memory_space<vmem>>, vector<1x128x384xbf16>
    %193 = vector.shape_cast %192 : vector<1x128x384xbf16> to vector<128x384xbf16>
    %cst_81 = arith.constant dense<0.000000e+00> : vector<16x384xf32>
    %194 = tpu.matmul %191, %193, %cst_81 {dimension_numbers = #tpu.dot_dimension_numbers<[1], [0], [0], [1], [0, 0, 1, 1], [], []>} : vector<16x128xbf16>, vector<128x384xbf16>, vector<16x384xf32> -> vector<16x384xf32>
    %c1_82 = arith.constant 1 : index
    %c0_83 = arith.constant 0 : index
    %c0_84 = arith.constant 0 : index
    %195 = vector.load %arg5[%c1_82, %c0_83, %c0_84] : memref<2x1x384xf32, #tpu.memory_space<vmem>>, vector<1x1x384xf32>
    %196 = vector.shape_cast %195 : vector<1x1x384xf32> to vector<1x384xf32>
    %197 = vector.broadcast %196 : vector<1x384xf32> to vector<16x384xf32>
    %198 = arith.addf %194, %197 : vector<16x384xf32>
    %c1_85 = arith.constant 1 : index
    %c0_86 = arith.constant 0 : index
    %c0_87 = arith.constant 0 : index
    %199 = vector.load %arg6[%c1_85, %c0_86, %c0_87] : memref<2x128x128xbf16, #tpu.memory_space<vmem>>, vector<1x128x128xbf16>
    %200 = vector.shape_cast %199 : vector<1x128x128xbf16> to vector<128x128xbf16>
    %cst_88 = arith.constant 0.000000e+00 : f32
    %201 = vector.broadcast %cst_88 : f32 to vector<16x128xf32>
    %202 = vector.extract_strided_slice %198 {offsets = [0, 0], sizes = [16, 64], strides = [1, 1]} : vector<16x384xf32> to vector<16x64xf32>
    %203 = vector.shape_cast %202 : vector<16x64xf32> to vector<2x8x64xf32>
    %204 = arith.truncf %203 : vector<2x8x64xf32> to vector<2x8x64xbf16>
    %205 = vector.extract_strided_slice %198 {offsets = [0, 128], sizes = [16, 64], strides = [1, 1]} : vector<16x384xf32> to vector<16x64xf32>
    %206 = vector.shape_cast %205 : vector<16x64xf32> to vector<2x8x64xf32>
    %207 = arith.truncf %206 : vector<2x8x64xf32> to vector<2x8x64xbf16>
    %208 = vector.extract_strided_slice %198 {offsets = [0, 256], sizes = [16, 64], strides = [1, 1]} : vector<16x384xf32> to vector<16x64xf32>
    %209 = vector.shape_cast %208 : vector<16x64xf32> to vector<2x8x64xf32>
    %210 = arith.truncf %209 : vector<2x8x64xf32> to vector<2x8x64xbf16>
    "tpu.trace_start"() <{level = 10 : i32, message = "bqd,bkd->bqk"}> : () -> ()
    %cst_89 = arith.constant dense<0.000000e+00> : vector<2x8x8xf32>
    %211 = tpu.matmul %204, %207, %cst_89 {dimension_numbers = #tpu.dot_dimension_numbers<[2], [2], [1], [1], [0, 0, 0, 1, 1, 1], [0], [0]>} : vector<2x8x64xbf16>, vector<2x8x64xbf16>, vector<2x8x8xf32> -> vector<2x8x8xf32>
    "tpu.trace_stop"() : () -> ()
    %cst_90 = arith.constant 1.250000e-01 : f32
    %212 = vector.broadcast %cst_90 : f32 to vector<2x8x8xf32>
    %213 = arith.mulf %211, %212 : vector<2x8x8xf32>
    %214 = vector.broadcast %30 : vector<2x1x8xf32> to vector<2x8x8xf32>
    %215 = arith.addf %213, %214 : vector<2x8x8xf32>
    %cst_91 = arith.constant dense<0xFF800000> : vector<2x8xf32>
    %216 = vector.multi_reduction <maximumf>, %215, %cst_91 [2] : vector<2x8x8xf32> to vector<2x8xf32>
    %217 = vector.shape_cast %216 : vector<2x8xf32> to vector<2x8x1xf32>
    %218 = vector.broadcast %217 : vector<2x8x1xf32> to vector<2x8x8xf32>
    %219 = arith.subf %215, %218 : vector<2x8x8xf32>
    %220 = math.exp %219 : vector<2x8x8xf32>
    %cst_92 = arith.constant dense<0.000000e+00> : vector<2x8xf32>
    %221 = vector.multi_reduction <add>, %220, %cst_92 [2] : vector<2x8x8xf32> to vector<2x8xf32>
    %222 = vector.shape_cast %221 : vector<2x8xf32> to vector<2x8x1xf32>
    %223 = tpu.reciprocal %222 {approx = true} : vector<2x8x1xf32> -> vector<2x8x1xf32>
    %224 = vector.broadcast %223 : vector<2x8x1xf32> to vector<2x8x8xf32>
    %225 = arith.mulf %220, %224 : vector<2x8x8xf32>
    %226 = arith.truncf %225 : vector<2x8x8xf32> to vector<2x8x8xbf16>
    "tpu.trace_start"() <{level = 10 : i32, message = "bqk,bkd->bqd"}> : () -> ()
    %cst_93 = arith.constant dense<0.000000e+00> : vector<2x8x64xf32>
    %227 = tpu.matmul %226, %210, %cst_93 {dimension_numbers = #tpu.dot_dimension_numbers<[2], [1], [1], [2], [0, 0, 0, 1, 1, 2], [0], [0]>} : vector<2x8x8xbf16>, vector<2x8x64xbf16>, vector<2x8x64xf32> -> vector<2x8x64xf32>
    "tpu.trace_stop"() : () -> ()
    %228 = vector.shape_cast %227 : vector<2x8x64xf32> to vector<16x64xf32>
    %229 = arith.truncf %228 : vector<16x64xf32> to vector<16x64xbf16>
    %230 = vector.extract_strided_slice %200 {offsets = [0, 0], sizes = [64, 128], strides = [1, 1]} : vector<128x128xbf16> to vector<64x128xbf16>
    %cst_94 = arith.constant dense<0.000000e+00> : vector<16x128xf32>
    %231 = tpu.matmul %229, %230, %cst_94 {dimension_numbers = #tpu.dot_dimension_numbers<[1], [0], [0], [1], [0, 0, 1, 1], [], []>} : vector<16x64xbf16>, vector<64x128xbf16>, vector<16x128xf32> -> vector<16x128xf32>
    %232 = arith.addf %201, %231 : vector<16x128xf32>
    %233 = vector.extract_strided_slice %198 {offsets = [0, 64], sizes = [16, 64], strides = [1, 1]} : vector<16x384xf32> to vector<16x64xf32>
    %234 = vector.shape_cast %233 : vector<16x64xf32> to vector<2x8x64xf32>
    %235 = arith.truncf %234 : vector<2x8x64xf32> to vector<2x8x64xbf16>
    %236 = vector.extract_strided_slice %198 {offsets = [0, 192], sizes = [16, 64], strides = [1, 1]} : vector<16x384xf32> to vector<16x64xf32>
    %237 = vector.shape_cast %236 : vector<16x64xf32> to vector<2x8x64xf32>
    %238 = arith.truncf %237 : vector<2x8x64xf32> to vector<2x8x64xbf16>
    %239 = vector.extract_strided_slice %198 {offsets = [0, 320], sizes = [16, 64], strides = [1, 1]} : vector<16x384xf32> to vector<16x64xf32>
    %240 = vector.shape_cast %239 : vector<16x64xf32> to vector<2x8x64xf32>
    %241 = arith.truncf %240 : vector<2x8x64xf32> to vector<2x8x64xbf16>
    "tpu.trace_start"() <{level = 10 : i32, message = "bqd,bkd->bqk"}> : () -> ()
    %cst_95 = arith.constant dense<0.000000e+00> : vector<2x8x8xf32>
    %242 = tpu.matmul %235, %238, %cst_95 {dimension_numbers = #tpu.dot_dimension_numbers<[2], [2], [1], [1], [0, 0, 0, 1, 1, 1], [0], [0]>} : vector<2x8x64xbf16>, vector<2x8x64xbf16>, vector<2x8x8xf32> -> vector<2x8x8xf32>
    "tpu.trace_stop"() : () -> ()
    %cst_96 = arith.constant 1.250000e-01 : f32
    %243 = vector.broadcast %cst_96 : f32 to vector<2x8x8xf32>
    %244 = arith.mulf %242, %243 : vector<2x8x8xf32>
    %245 = vector.broadcast %30 : vector<2x1x8xf32> to vector<2x8x8xf32>
    %246 = arith.addf %244, %245 : vector<2x8x8xf32>
    %cst_97 = arith.constant dense<0xFF800000> : vector<2x8xf32>
    %247 = vector.multi_reduction <maximumf>, %246, %cst_97 [2] : vector<2x8x8xf32> to vector<2x8xf32>
    %248 = vector.shape_cast %247 : vector<2x8xf32> to vector<2x8x1xf32>
    %249 = vector.broadcast %248 : vector<2x8x1xf32> to vector<2x8x8xf32>
    %250 = arith.subf %246, %249 : vector<2x8x8xf32>
    %251 = math.exp %250 : vector<2x8x8xf32>
    %cst_98 = arith.constant dense<0.000000e+00> : vector<2x8xf32>
    %252 = vector.multi_reduction <add>, %251, %cst_98 [2] : vector<2x8x8xf32> to vector<2x8xf32>
    %253 = vector.shape_cast %252 : vector<2x8xf32> to vector<2x8x1xf32>
    %254 = tpu.reciprocal %253 {approx = true} : vector<2x8x1xf32> -> vector<2x8x1xf32>
    %255 = vector.broadcast %254 : vector<2x8x1xf32> to vector<2x8x8xf32>
    %256 = arith.mulf %251, %255 : vector<2x8x8xf32>
    %257 = arith.truncf %256 : vector<2x8x8xf32> to vector<2x8x8xbf16>
    "tpu.trace_start"() <{level = 10 : i32, message = "bqk,bkd->bqd"}> : () -> ()
    %cst_99 = arith.constant dense<0.000000e+00> : vector<2x8x64xf32>
    %258 = tpu.matmul %257, %241, %cst_99 {dimension_numbers = #tpu.dot_dimension_numbers<[2], [1], [1], [2], [0, 0, 0, 1, 1, 2], [0], [0]>} : vector<2x8x8xbf16>, vector<2x8x64xbf16>, vector<2x8x64xf32> -> vector<2x8x64xf32>
    "tpu.trace_stop"() : () -> ()
    %259 = vector.shape_cast %258 : vector<2x8x64xf32> to vector<16x64xf32>
    %260 = arith.truncf %259 : vector<16x64xf32> to vector<16x64xbf16>
    %261 = vector.extract_strided_slice %200 {offsets = [64, 0], sizes = [64, 128], strides = [1, 1]} : vector<128x128xbf16> to vector<64x128xbf16>
    %cst_100 = arith.constant dense<0.000000e+00> : vector<16x128xf32>
    %262 = tpu.matmul %260, %261, %cst_100 {dimension_numbers = #tpu.dot_dimension_numbers<[1], [0], [0], [1], [0, 0, 1, 1], [], []>} : vector<16x64xbf16>, vector<64x128xbf16>, vector<16x128xf32> -> vector<16x128xf32>
    %263 = arith.addf %232, %262 : vector<16x128xf32>
    %c1_101 = arith.constant 1 : index
    %c0_102 = arith.constant 0 : index
    %c0_103 = arith.constant 0 : index
    %264 = vector.load %arg7[%c1_101, %c0_102, %c0_103] : memref<2x1x128xf32, #tpu.memory_space<vmem>>, vector<1x1x128xf32>
    %265 = vector.shape_cast %264 : vector<1x1x128xf32> to vector<1x128xf32>
    %266 = vector.broadcast %265 : vector<1x128xf32> to vector<16x128xf32>
    %267 = arith.addf %263, %266 : vector<16x128xf32>
    %268 = arith.addf %190, %267 : vector<16x128xf32>
    %c1_104 = arith.constant 1 : index
    %c0_105 = arith.constant 0 : index
    %c0_106 = arith.constant 0 : index
    %269 = vector.load %arg8[%c1_104, %c0_105, %c0_106] : memref<2x1x128xf32, #tpu.memory_space<vmem>>, vector<1x1x128xf32>
    %270 = vector.shape_cast %269 : vector<1x1x128xf32> to vector<1x128xf32>
    %c1_107 = arith.constant 1 : index
    %c0_108 = arith.constant 0 : index
    %c0_109 = arith.constant 0 : index
    %271 = vector.load %arg9[%c1_107, %c0_108, %c0_109] : memref<2x1x128xf32, #tpu.memory_space<vmem>>, vector<1x1x128xf32>
    %272 = vector.shape_cast %271 : vector<1x1x128xf32> to vector<1x128xf32>
    %cst_110 = arith.constant dense<0.000000e+00> : vector<16xf32>
    %273 = vector.multi_reduction <add>, %268, %cst_110 [1] : vector<16x128xf32> to vector<16xf32>
    %274 = vector.shape_cast %273 : vector<16xf32> to vector<16x1xf32>
    %cst_111 = arith.constant 1.280000e+02 : f32
    %275 = vector.broadcast %cst_111 : f32 to vector<16x1xf32>
    %276 = arith.divf %274, %275 : vector<16x1xf32>
    %277 = vector.broadcast %276 : vector<16x1xf32> to vector<16x128xf32>
    %278 = arith.subf %268, %277 : vector<16x128xf32>
    %279 = arith.mulf %278, %278 : vector<16x128xf32>
    %cst_112 = arith.constant dense<0.000000e+00> : vector<16xf32>
    %280 = vector.multi_reduction <add>, %279, %cst_112 [1] : vector<16x128xf32> to vector<16xf32>
    %281 = vector.shape_cast %280 : vector<16xf32> to vector<16x1xf32>
    %cst_113 = arith.constant 1.280000e+02 : f32
    %282 = vector.broadcast %cst_113 : f32 to vector<16x1xf32>
    %283 = arith.divf %281, %282 : vector<16x1xf32>
    %284 = vector.broadcast %276 : vector<16x1xf32> to vector<16x128xf32>
    %285 = arith.subf %268, %284 : vector<16x128xf32>
    %cst_114 = arith.constant 9.99999996E-13 : f32
    %286 = vector.broadcast %cst_114 : f32 to vector<16x1xf32>
    %287 = arith.addf %283, %286 : vector<16x1xf32>
    %288 = math.rsqrt %287 : vector<16x1xf32>
    %289 = vector.broadcast %288 : vector<16x1xf32> to vector<16x128xf32>
    %290 = arith.mulf %285, %289 : vector<16x128xf32>
    %291 = vector.broadcast %270 : vector<1x128xf32> to vector<16x128xf32>
    %292 = arith.mulf %290, %291 : vector<16x128xf32>
    %293 = vector.broadcast %272 : vector<1x128xf32> to vector<16x128xf32>
    %294 = arith.addf %292, %293 : vector<16x128xf32>
    %295 = arith.truncf %294 : vector<16x128xf32> to vector<16x128xbf16>
    %c1_115 = arith.constant 1 : index
    %c0_116 = arith.constant 0 : index
    %c0_117 = arith.constant 0 : index
    %296 = vector.load %arg10[%c1_115, %c0_116, %c0_117] : memref<2x128x256xbf16, #tpu.memory_space<vmem>>, vector<1x128x256xbf16>
    %297 = vector.shape_cast %296 : vector<1x128x256xbf16> to vector<128x256xbf16>
    %cst_118 = arith.constant dense<0.000000e+00> : vector<16x256xf32>
    %298 = tpu.matmul %295, %297, %cst_118 {dimension_numbers = #tpu.dot_dimension_numbers<[1], [0], [0], [1], [0, 0, 1, 1], [], []>} : vector<16x128xbf16>, vector<128x256xbf16>, vector<16x256xf32> -> vector<16x256xf32>
    %c1_119 = arith.constant 1 : index
    %c0_120 = arith.constant 0 : index
    %c0_121 = arith.constant 0 : index
    %299 = vector.load %arg11[%c1_119, %c0_120, %c0_121] : memref<2x1x256xf32, #tpu.memory_space<vmem>>, vector<1x1x256xf32>
    %300 = vector.shape_cast %299 : vector<1x1x256xf32> to vector<1x256xf32>
    %301 = vector.broadcast %300 : vector<1x256xf32> to vector<16x256xf32>
    %302 = arith.addf %298, %301 : vector<16x256xf32>
    %cst_122 = arith.constant 5.000000e-01 : f32
    %303 = vector.broadcast %cst_122 : f32 to vector<16x256xf32>
    %304 = arith.mulf %303, %302 : vector<16x256xf32>
    %cst_123 = arith.constant 4.471500e-02 : f32
    %305 = vector.broadcast %cst_123 : f32 to vector<16x256xf32>
    %306 = arith.mulf %305, %302 : vector<16x256xf32>
    %307 = arith.mulf %306, %302 : vector<16x256xf32>
    %308 = arith.mulf %307, %302 : vector<16x256xf32>
    %309 = arith.addf %302, %308 : vector<16x256xf32>
    %cst_124 = arith.constant 0.797884583 : f32
    %310 = vector.broadcast %cst_124 : f32 to vector<16x256xf32>
    %311 = arith.mulf %310, %309 : vector<16x256xf32>
    %312 = math.tanh %311 : vector<16x256xf32>
    %cst_125 = arith.constant 1.000000e+00 : f32
    %313 = vector.broadcast %cst_125 : f32 to vector<16x256xf32>
    %314 = arith.addf %313, %312 : vector<16x256xf32>
    %315 = arith.mulf %304, %314 : vector<16x256xf32>
    %316 = arith.truncf %315 : vector<16x256xf32> to vector<16x256xbf16>
    %c1_126 = arith.constant 1 : index
    %c0_127 = arith.constant 0 : index
    %c0_128 = arith.constant 0 : index
    %317 = vector.load %arg12[%c1_126, %c0_127, %c0_128] : memref<2x256x128xbf16, #tpu.memory_space<vmem>>, vector<1x256x128xbf16>
    %318 = vector.shape_cast %317 : vector<1x256x128xbf16> to vector<256x128xbf16>
    %cst_129 = arith.constant dense<0.000000e+00> : vector<16x128xf32>
    %319 = tpu.matmul %316, %318, %cst_129 {dimension_numbers = #tpu.dot_dimension_numbers<[1], [0], [0], [1], [0, 0, 1, 1], [], []>} : vector<16x256xbf16>, vector<256x128xbf16>, vector<16x128xf32> -> vector<16x128xf32>
    %c1_130 = arith.constant 1 : index
    %c0_131 = arith.constant 0 : index
    %c0_132 = arith.constant 0 : index
    %320 = vector.load %arg13[%c1_130, %c0_131, %c0_132] : memref<2x1x128xf32, #tpu.memory_space<vmem>>, vector<1x1x128xf32>
    %321 = vector.shape_cast %320 : vector<1x1x128xf32> to vector<1x128xf32>
    %322 = vector.broadcast %321 : vector<1x128xf32> to vector<16x128xf32>
    %323 = arith.addf %319, %322 : vector<16x128xf32>
    %324 = arith.addf %294, %323 : vector<16x128xf32>
    %c1_133 = arith.constant 1 : index
    %c0_134 = arith.constant 0 : index
    %c0_135 = arith.constant 0 : index
    %325 = vector.load %arg14[%c1_133, %c0_134, %c0_135] : memref<2x1x128xf32, #tpu.memory_space<vmem>>, vector<1x1x128xf32>
    %326 = vector.shape_cast %325 : vector<1x1x128xf32> to vector<1x128xf32>
    %c1_136 = arith.constant 1 : index
    %c0_137 = arith.constant 0 : index
    %c0_138 = arith.constant 0 : index
    %327 = vector.load %arg15[%c1_136, %c0_137, %c0_138] : memref<2x1x128xf32, #tpu.memory_space<vmem>>, vector<1x1x128xf32>
    %328 = vector.shape_cast %327 : vector<1x1x128xf32> to vector<1x128xf32>
    %cst_139 = arith.constant dense<0.000000e+00> : vector<16xf32>
    %329 = vector.multi_reduction <add>, %324, %cst_139 [1] : vector<16x128xf32> to vector<16xf32>
    %330 = vector.shape_cast %329 : vector<16xf32> to vector<16x1xf32>
    %cst_140 = arith.constant 1.280000e+02 : f32
    %331 = vector.broadcast %cst_140 : f32 to vector<16x1xf32>
    %332 = arith.divf %330, %331 : vector<16x1xf32>
    %333 = vector.broadcast %332 : vector<16x1xf32> to vector<16x128xf32>
    %334 = arith.subf %324, %333 : vector<16x128xf32>
    %335 = arith.mulf %334, %334 : vector<16x128xf32>
    %cst_141 = arith.constant dense<0.000000e+00> : vector<16xf32>
    %336 = vector.multi_reduction <add>, %335, %cst_141 [1] : vector<16x128xf32> to vector<16xf32>
    %337 = vector.shape_cast %336 : vector<16xf32> to vector<16x1xf32>
    %cst_142 = arith.constant 1.280000e+02 : f32
    %338 = vector.broadcast %cst_142 : f32 to vector<16x1xf32>
    %339 = arith.divf %337, %338 : vector<16x1xf32>
    %340 = vector.broadcast %332 : vector<16x1xf32> to vector<16x128xf32>
    %341 = arith.subf %324, %340 : vector<16x128xf32>
    %cst_143 = arith.constant 9.99999996E-13 : f32
    %342 = vector.broadcast %cst_143 : f32 to vector<16x1xf32>
    %343 = arith.addf %339, %342 : vector<16x1xf32>
    %344 = math.rsqrt %343 : vector<16x1xf32>
    %345 = vector.broadcast %344 : vector<16x1xf32> to vector<16x128xf32>
    %346 = arith.mulf %341, %345 : vector<16x128xf32>
    %347 = vector.broadcast %326 : vector<1x128xf32> to vector<16x128xf32>
    %348 = arith.mulf %346, %347 : vector<16x128xf32>
    %349 = vector.broadcast %328 : vector<1x128xf32> to vector<16x128xf32>
    %350 = arith.addf %348, %349 : vector<16x128xf32>
    %351 = arith.truncf %350 : vector<16x128xf32> to vector<16x128xbf16>
    %c0_144 = arith.constant 0 : index
    %c0_145 = arith.constant 0 : index
    %352 = vector.load %arg16[%c0_144, %c0_145] : memref<128x128xbf16, #tpu.memory_space<vmem>>, vector<128x128xbf16>
    %cst_146 = arith.constant dense<0.000000e+00> : vector<16x128xf32>
    %353 = tpu.matmul %351, %352, %cst_146 {dimension_numbers = #tpu.dot_dimension_numbers<[1], [0], [0], [1], [0, 0, 1, 1], [], []>} : vector<16x128xbf16>, vector<128x128xbf16>, vector<16x128xf32> -> vector<16x128xf32>
    %c0_147 = arith.constant 0 : index
    %c0_148 = arith.constant 0 : index
    %354 = vector.load %arg17[%c0_147, %c0_148] : memref<1x128xf32, #tpu.memory_space<vmem>>, vector<1x128xf32>
    %355 = vector.broadcast %354 : vector<1x128xf32> to vector<16x128xf32>
    %356 = arith.addf %353, %355 : vector<16x128xf32>
    %c0_149 = arith.constant 0 : index
    %c0_150 = arith.constant 0 : index
    %357 = vector.load %arg18[%c0_149, %c0_150] : memref<16x128xf32, #tpu.memory_space<vmem>>, vector<16x128xf32>
    tpu.vector_store %arg18[%c0_149, %c0_150], %356 {strides = array<i32>} : memref<16x128xf32, #tpu.memory_space<vmem>>, vector<16x128xf32>,
    return
  }
}

</mosaic_0001>

<bundles_post_ra>
// kernel: custom-call.8
= control target key start
LH: loop header
LB: loop body
LE: loop exit
PB: predicated region body
PF: predicated region fallthrough
CT: control target
= control target key end

     0   :  { %s6_s0 = inlined_call_operand.vmem [shape: s32[7,2,5], index: 0, kind: output, shape index: {}]  }

// kernel: stacked_bert_with_crf_forward.2
= control target key start
LH: loop header
LB: loop body
LE: loop exit
PB: predicated region body
PF: predicated region fallthrough
CT: control target
= control target key end

     0   :  { %s4573_s0 = inlined_call_operand.vmem [shape: f32[16,128], index: 0, kind: input, shape index: {}]   ;;  %s4574_s1 = inlined_call_operand.vmem [shape: f32[2,8], index: 1, kind: input, shape index: {}]   ;;  %s4575_s2 = inlined_call_operand.vmem [shape: f32[1,128], index: 2, kind: input, shape index: {}]   ;;  %s4576_s3 = inlined_call_operand.vmem [shape: f32[1,128], index: 3, kind: input, shape index: {}]   ;;  %s4577_s4 = inlined_call_operand.hbm [shape: bf16[2,128,384], index: 4, kind: input, shape index: {}]   ;;  %s4578_s5 = inlined_call_operand.vmem [shape: f32[2,1,384], index: 5, kind: input, shape index: {}]   ;;  %s4579_s6 = inlined_call_operand.hbm [shape: bf16[2,128,128], index: 6, kind: input, shape index: {}]   ;;  %s4580_s7 = inlined_call_operand.vmem [shape: f32[2,1,128], index: 7, kind: input, shape index: {}]   ;;  %s4581_s8 = inlined_call_operand.vmem [shape: f32[2,1,128], index: 8, kind: input, shape index: {}]   ;;  %s4582_s9 = inlined_call_operand.vmem [shape: f32[2,1,128], index: 9, kind: input, shape index: {}]   ;;  %s4583_s10 = inlined_call_operand.vmem [shape: bf16[2,128,256], index: 10, kind: input, shape index: {}]   ;;  %s4584_s11 = inlined_call_operand.vmem [shape: f32[2,1,256], index: 11, kind: input, shape index: {}]   ;;  %s4585_s12 = inlined_call_operand.hbm [shape: bf16[2,256,128], index: 12, kind: input, shape index: {}]   ;;  %s4586_s13 = inlined_call_operand.vmem [shape: f32[2,1,128], index: 13, kind: input, shape index: {}]   ;;  %s4587_s14 = inlined_call_operand.hbm [shape: f32[2,1,128], index: 14, kind: input, shape index: {}]   ;;  %s4588_s15 = inlined_call_operand.hbm [shape: f32[2,1,128], index: 15, kind: input, shape index: {}]   ;;  %s4589_s16 = inlined_call_operand.vmem [shape: bf16[128,128], index: 16, kind: input, shape index: {}]   ;;  %s4590_s17 = inlined_call_operand.hbm [shape: f32[1,128], index: 17, kind: input, shape index: {}]   ;;  %s4591_s18 = inlined_call_operand.vmem [shape: f32[16,128], index: 18, kind: output, shape index: {}]  }
   0x1   :  { %4597 = sst [smem:[#allocation16_spill]] %s4573_s0 }
   0x2   :  { %4598 = sst [smem:[#allocation17_spill]] %s4574_s1 }
   0x3   :  { %4599 = sst [smem:[#allocation18_spill]] %s4575_s2 }
   0x4   :  { %23 = vsyncpa [#allocation3], 0 }
   0x5   :  { %24 = vsyncpa [#allocation5], 0 }
   0x6   :  { %25 = vsyncpa [#allocation8], 0 }
   0x7   :  { %26 = vsyncpa [#allocation11], 0  ;;  %s3915_s27 = smov [#allocation4]   ;;  %s3775_s0 = scalar_lea.hbm %s4579_s6, 2048 }
   0x8   :  { %s54_s28 = sshll.u32 %s3915_s27, 4  ;;  %p3776_p0 = scmp.ne.s32.totalorder %s4579_s6, %s3775_s0  ;;  %s55_s28 = int_to_ptr.vmem [resolvable:$true] %s54_s28 }
   0x9   :  { %p3779_p1 = scmp.lt.u32.totalorder %s3775_s0, %s4579_s6 }
   0xb   :  { %p3781_p2 = pnand %p3779_p1, %p3776_p0 }
   0xd   :  { %3784 = shalt.err (!%p3781_p2)
}
   0xe   :  { %s3785_s22 = scalar_lea.vmem %s55_s28, 2048  ;;  %p3790_p4 = scmp.lt.s32.totalorder %s55_s28, %s55_s28 }
   0xf   :  { %p3786_p3 = scmp.ne.s32.totalorder %s55_s28, %s3785_s22  ;;  %p3791_p5 = scmp.lt.s32.totalorder %s3785_s22, %s3785_s22 }
  0x11   :  { %p3792_p6 = por %p3791_p5, %p3790_p4 }
  0x13   :  { %p3793_p7 = pnand %p3792_p6, %p3786_p3 }
  0x15   :  { %3796 = shalt.err (!%p3793_p7)
}
  0x16   :  { %s4593_s2 = smov 64   ;;  %s3917_s23 = smov 4  }
  0x17   :  { %60 = dma.hbm_to_vmem [thread:$0]  %s4579_s6, 2048, %s55_s28, [#allocation5], %s4593_s2, %s4593_s2, %s3917_s23  }
  0x18   :  { %s3918_s26 = smov [#allocation7]   ;;  %s3797_s0 = scalar_lea.hbm %s4587_s14, 32 }
  0x19   :  { %s90_s27 = sshll.u32 %s3918_s26, 4  ;;  %p3798_p8 = scmp.ne.s32.totalorder %s4587_s14, %s3797_s0  ;;  %s91_s27 = int_to_ptr.vmem [resolvable:$true] %s90_s27 }
  0x1a   :  { %p3801_p9 = scmp.lt.u32.totalorder %s3797_s0, %s4587_s14 }
  0x1c   :  { %p3803_p10 = pnand %p3801_p9, %p3798_p8 }
  0x1e   :  { %3806 = shalt.err (!%p3803_p10)
}
  0x1f   :  { %s3807_s22 = scalar_lea.vmem %s91_s27, 32  ;;  %p3812_p12 = scmp.lt.s32.totalorder %s91_s27, %s91_s27 }
  0x20   :  { %p3808_p11 = scmp.ne.s32.totalorder %s91_s27, %s3807_s22  ;;  %p3813_p13 = scmp.lt.s32.totalorder %s3807_s22, %s3807_s22 }
  0x22   :  { %p3814_p0 = por %p3813_p13, %p3812_p12 }
  0x24   :  { %p3815_p1 = pnand %p3814_p0, %p3808_p11 }
  0x26   :  { %3818 = shalt.err (!%p3815_p1)
}
  0x27   :  { %s4595_s6 = smov 16   ;;  %s4596_s28 = smov 1  }
  0x28   :  { %96 = dma.hbm_to_vmem [thread:$0]  %s4587_s14, 32, %s91_s27, [#allocation8], %s4595_s6, %s4595_s6, %s4596_s28  }
  0x29   :  { %s3921_s26 = smov [#allocation2]   ;;  %s3819_s19 = scalar_lea.hbm %s4577_s4, 6144 }
  0x2a   :  { %s40_s29 = sshll.u32 %s3921_s26, 4  ;;  %p3820_p2 = scmp.ne.s32.totalorder %s4577_s4, %s3819_s19  ;;  %s41_s29 = int_to_ptr.vmem [resolvable:$true] %s40_s29 }
  0x2b   :  { %p3823_p3 = scmp.lt.u32.totalorder %s3819_s19, %s4577_s4 }
  0x2d   :  { %p3825_p4 = pnand %p3823_p3, %p3820_p2 }
  0x2f   :  { %3828 = shalt.err (!%p3825_p4)
}
  0x30   :  { %s3829_s2 = scalar_lea.vmem %s41_s29, 6144  ;;  %p3834_p6 = scmp.lt.s32.totalorder %s41_s29, %s41_s29 }
  0x31   :  { %p3830_p5 = scmp.ne.s32.totalorder %s41_s29, %s3829_s2  ;;  %p3835_p7 = scmp.lt.s32.totalorder %s3829_s2, %s3829_s2 }
  0x33   :  { %p3836_p8 = por %p3835_p7, %p3834_p6 }
  0x35   :  { %p3837_p9 = pnand %p3836_p8, %p3830_p5 }
  0x37   :  { %3840 = shalt.err (!%p3837_p9)
}
  0x38   :  { %s3922_s14 = smov 192   ;;  %s3923_s27 = smov 12  }
  0x39   :  { %46 = dma.hbm_to_vmem [thread:$0]  %s4577_s4, 6144, %s41_s29, [#allocation3], %s3922_s14, %s3922_s14, %s3923_s27  }
  0x3a   :  { %s3924_s26 = smov [#allocation6]   ;;  %s3925_s0 = smov [#allocation9]  }
  0x3b   :  { %s76_s30 = sshll.u32 %s3924_s26, 4  ;;  %s102_s19 = sshll.u32 %s3925_s0, 4  ;;  %s77_s30 = int_to_ptr.vmem [resolvable:$true] %s76_s30  ;;  %s103_s19 = int_to_ptr.vmem [resolvable:$true] %s102_s19 }
  0x3c   :  { %s3841_s21 = scalar_lea.hbm %s4585_s12, 4096 }
  0x3d   :  { %p3842_p10 = scmp.ne.s32.totalorder %s4585_s12, %s3841_s21  ;;  %p3845_p11 = scmp.lt.u32.totalorder %s3841_s21, %s4585_s12 }
  0x3f   :  { %p3847_p12 = pnand %p3845_p11, %p3842_p10 }
  0x41   :  { %3850 = shalt.err (!%p3847_p12)
}
  0x42   :  { %s3851_s4 = scalar_lea.vmem %s77_s30, 4096  ;;  %p3856_p0 = scmp.lt.s32.totalorder %s77_s30, %s77_s30 }
  0x43   :  { %p3852_p13 = scmp.ne.s32.totalorder %s77_s30, %s3851_s4  ;;  %p3857_p1 = scmp.lt.s32.totalorder %s3851_s4, %s3851_s4 }
  0x45   :  { %p3858_p2 = por %p3857_p1, %p3856_p0 }
  0x47   :  { %p3859_p3 = pnand %p3858_p2, %p3852_p13 }
  0x49   :  { %3862 = shalt.err (!%p3859_p3)
}
  0x4a   :  { %s4600_s29 = smov 64   ;;  %s3863_s28 = scalar_lea.hbm %s4588_s15, 32 }
  0x4b   :  { %82 = dma.hbm_to_vmem [thread:$0]  %s4585_s12, 4096, %s77_s30, [#allocation5], %s4600_s29, %s4600_s29, %s3917_s23  }
  0x4c   :  { %p3864_p4 = scmp.ne.s32.totalorder %s4588_s15, %s3863_s28  ;;  %p3867_p5 = scmp.lt.u32.totalorder %s3863_s28, %s4588_s15 }
  0x4e   :  { %p3869_p6 = pnand %p3867_p5, %p3864_p4 }
  0x50   :  { %3872 = shalt.err (!%p3869_p6)
}
  0x51   :  { %s3873_s20 = scalar_lea.vmem %s103_s19, 32  ;;  %p3878_p8 = scmp.lt.s32.totalorder %s103_s19, %s103_s19 }
  0x52   :  { %p3874_p7 = scmp.ne.s32.totalorder %s103_s19, %s3873_s20  ;;  %p3879_p9 = scmp.lt.s32.totalorder %s3873_s20, %s3873_s20 }
  0x54   :  { %p3880_p10 = por %p3879_p9, %p3878_p8 }
  0x56   :  { %p3881_p11 = pnand %p3880_p10, %p3874_p7 }
  0x58   :  { %3884 = shalt.err (!%p3881_p11)
}
  0x59   :  { %s4601_s12 = smov 1   ;;  %s4602_s23 = smov 16  }
  0x5a   :  { %108 = dma.hbm_to_vmem [thread:$0]  %s4588_s15, 32, %s103_s19, [#allocation8], %s4602_s23, %s4602_s23, %s4601_s12  }
  0x5b   :  { %s3926_s22 = smov [#allocation10]   ;;  %s3885_s27 = scalar_lea.hbm %s4590_s17, 16 }
  0x5c   :  { %s117_s2 = sshll.u32 %s3926_s22, 4  ;;  %p3886_p12 = scmp.ne.s32.totalorder %s4590_s17, %s3885_s27  ;;  %s118_s2 = int_to_ptr.vmem [resolvable:$true] %s117_s2 }
  0x5d   :  { %p3889_p13 = scmp.lt.u32.totalorder %s3885_s27, %s4590_s17 }
  0x5f   :  { %p3891_p0 = pnand %p3889_p13, %p3886_p12 }
  0x61   :  { %3894 = shalt.err (!%p3891_p0)
}
  0x62   :  { %s3895_s26 = scalar_lea.vmem %s118_s2, 16  ;;  %s3899_s15 = scalar_lea.vmem %s118_s2, 32 }
  0x63   :  { %p3896_p1 = scmp.ne.s32.totalorder %s118_s2, %s3895_s26  ;;  %p3900_p2 = scmp.lt.s32.totalorder %s118_s2, %s118_s2 }
  0x64   :  { %p3901_p3 = scmp.lt.s32.totalorder %s3899_s15, %s3895_s26 }
  0x66   :  { %p3902_p4 = por %p3901_p3, %p3900_p2 }
  0x68   :  { %p3903_p5 = pnand %p3902_p4, %p3896_p1 }
  0x6a   :  { %3906 = shalt.err (!%p3903_p5)
}
  0x6b   :  { %120 = dma.hbm_to_vmem [thread:$0]  %s4590_s17, 16, %s118_s2, [#allocation11]  }
  0x6c   :  { %3907 = dma.done.wait [#allocation3], 6144  }
  0x6d   :  { %3908 = vsyncadd [#allocation3], 4294961152 }
  0x6e   :  { %3909 = dma.done.wait [#allocation5], 6144  }
  0x6f   :  { %3910 = vsyncadd [#allocation5], 4294961152 }
  0x70   :  { %3911 = dma.done.wait [#allocation8], 64  }
  0x71   :  { %3912 = vsyncadd [#allocation8], 4294967232 }
  0x72   :  { %3913 = dma.done.wait [#allocation11], 16  }
  0x73   :  { %3914 = vsyncadd [#allocation11], 4294967280  ;;  %s4603_s12 = sld [smem:[#allocation16_spill]]  ;;  %v3539_v2 = vld [vmem:[#allocation2 + $0x4] ss:$12 sps:$4 sm:$0xff]   ;;  %v3927_v4 = vmov 0.0   ;;  %v190_v53 = vlaneseq }
  0x74   :  { %v3541_v3 = vld [vmem:[#allocation2] ss:$12 sps:$4 sm:$0xff]   ;;  %3319 = vmatprep.subr.bf16.mxu1 %v3927_v4  ;;  %v3542_v5 = vld [vmem:[#allocation2 + $0x8] ss:$12 sps:$4 sm:$0xff]   ;;  %387 = vmatprep.subr.bf16.mxu0 %v3539_v2  ;;  %v3545_v15 = vld [vmem:[#allocation2 + $0x18] ss:$12 sps:$4 sm:$0xff]  }
  0x75   :  { %v3543_v6 = vld [vmem:[#allocation2 + $0x1c] ss:$12 sps:$4 sm:$0xff]   ;;  %388 = vmatpush1.bf16.msra.mxu0 %v3541_v3  ;;  %3320 = vmatpush3.bf16.msra.mxu1 %v3542_v5  ;;  %v3546_v16 = vld [vmem:[#allocation2 + $0x20] ss:$12 sps:$4 sm:$0xff]   ;;  %v3550_v19 = vld [vmem:[#allocation2 + $0x38] ss:$12 sps:$4 sm:$0xff]  }
  0x76   :  { %389 = vmatprep.subr.bf16.mxu0 %v3543_v6  ;;  %3321 = vmatprep.subr.bf16.mxu1 %v3927_v4  ;;  %v3547_v17 = vld [vmem:[#allocation2 + $0x34] ss:$12 sps:$4 sm:$0xff]   ;;  %v3549_v18 = vld [vmem:[#allocation2 + $0x30] ss:$12 sps:$4 sm:$0xff]   ;;  %v3551_v20 = vld [vmem:[#allocation2 + $0x4c] ss:$12 sps:$4 sm:$0xff]  }
  0x77   :  { %v3553_v21 = vld [vmem:[#allocation2 + $0x48] ss:$12 sps:$4 sm:$0xff]   ;;  %v3554_v22 = vld [vmem:[#allocation2 + $0x50] ss:$12 sps:$4 sm:$0xff]   ;;  %v3557_v24 = vld [vmem:[#allocation2 + $0x60] ss:$12 sps:$4 sm:$0xff]  }
  0x78   :  { %v3555_v23 = vld [vmem:[#allocation2 + $0x64] ss:$12 sps:$4 sm:$0xff]   ;;  %v3558_v25 = vld [vmem:[#allocation2 + $0x68] ss:$12 sps:$4 sm:$0xff]   ;;  %v3562_v28 = vld [vmem:[#allocation2 + $0x80] ss:$12 sps:$4 sm:$0xff]  }
  0x79   :  { %v140_v0 = vld [vmem:[%s4603_s12] sm:$0xff]  ;;  %v141_v1 = vld [vmem:[%s4603_s12 + $0x8] sm:$0xff]  ;;  %390 = vmatpush1.bf16.msra.mxu0 %v3545_v15  ;;  %3322 = vmatpush3.bf16.msra.mxu1 %v3546_v16  ;;  %v3928_v30 = vmov 0   ;;  %vm3929_vm0 = vmmov 0   ;;  %v3565_v31 = vld [vmem:[#allocation2 + $0x90] ss:$12 sps:$4 sm:$0xff]  }
  0x7a   :  { %144 = vadd.xlane.f32.xlu0 %v140_v0  ;;  %3323 = vmatprep.subr.bf16.mxu1 %v3927_v4  ;;  %v3559_v26 = vld [vmem:[#allocation2 + $0x7c] ss:$12 sps:$4 sm:$0xff]   ;;  %v3561_v27 = vld [vmem:[#allocation2 + $0x78] ss:$12 sps:$4 sm:$0xff]   ;;  %v3563_v29 = vld [vmem:[#allocation2 + $0x94] ss:$12 sps:$4 sm:$0xff]  }
  0x7b   :  { %391 = vmatprep.subr.bf16.mxu0 %v3547_v17  ;;  %419 = vmatprep.mubr.bf16.mxu0 %v3928_v30  ;;  %v3566_v32 = vld [vmem:[#allocation2 + $0x98] ss:$12 sps:$4 sm:$0xff]   ;;  %v3569_v34 = vld [vmem:[#allocation2 + $0xa8] ss:$12 sps:$4 sm:$0xff]   ;;  %v3570_v35 = vld [vmem:[#allocation2 + $0xb0] ss:$12 sps:$4 sm:$0xff]  }
  0x7c   :  { %3335 = vmatprep.mubr.msk.bf16.mxu1 %vm3929_vm0, %v3927_v4  ;;  %v3567_v33 = vld [vmem:[#allocation2 + $0xac] ss:$12 sps:$4 sm:$0xff]   ;;  %s4604_s22 = sld [smem:[#allocation18_spill]]  ;;  %v3004_v48 = vld [vmem:[%s4576_s3] ss:$0 sm:$0xff]  ;;  %v4155_v54 = vshrl.u32 %v190_v53, 7 }
  0x7d   :  { %392 = vmatpush1.bf16.msra.mxu0 %v3549_v18  ;;  %3324 = vmatpush3.bf16.msra.mxu1 %v3550_v19  ;;  %v242_v56 = vld [vmem:[%s4578_s5] sm:$0x7]  ;;  %vm493_vm1 = vcmask 523264   ;;  %vm628_vm2 = vcmask 1043456   ;;  %s4605_s6 = sld [smem:[#allocation17_spill]]  ;;  %vm600_vm3 = vcmask 64512  }
  0x7e   :  { %146 = vadd.xlane.f32.xlu0 %v141_v1  ;;  %3325 = vmatprep.subr.bf16.mxu1 %v3927_v4  ;;  %v4158_v55 = vsub.s32 1, %v4155_v54  ;;  %v254_v57 = vsub.s32 2, %v4155_v54  ;;  %v4166_v59 = vsub.s32 0, %v4155_v54 }
  0x7f   :  { %393 = vmatprep.subr.bf16.mxu0 %v3551_v20 }
  0x80   :  { %v251_v58 = vrot.slane %v242_v56, %v4158_v55 }
  0x81   :  { %394 = vmatpush1.bf16.msra.mxu0 %v3553_v21  ;;  %3326 = vmatpush3.bf16.msra.mxu1 %v3554_v22 }
  0x82   :  { %3327 = vmatprep.subr.bf16.mxu1 %v3927_v4  ;;  %395 = vmatprep.subr.bf16.mxu0 %v3555_v23  ;;  %v3003_v44 = vld [vmem:[%s4604_s22] ss:$0 sm:$0xff]  ;;  %v3930_v23 = vmov 1966171168  }
  0x85   :  { %396 = vmatpush1.bf16.msra.mxu0 %v3557_v24  ;;  %3328 = vmatpush3.bf16.msra.mxu1 %v3558_v25  ;;  %v188_v24 = vunpack.c.l.s4 %v3930_v23  ;;  %v183_v25 = vld [vmem:[%s4605_s6] sm:$0x3] }
  0x86   :  { %397 = vmatprep.subr.bf16.mxu0 %v3559_v26  ;;  %3329 = vmatprep.subr.bf16.mxu1 %v3927_v4  ;;  %v184_v26 = vsub.f32 1.0, %v183_v25 }
  0x89   :  { %398 = vmatpush1.bf16.msra.mxu0 %v3561_v27  ;;  %3330 = vmatpush3.bf16.msra.mxu1 %v3562_v28  ;;  %v189_v27 = vunpack.c.0.s8 %v188_v24  ;;  %v185_v28 = vmul.f32 -1e+09, %v184_v26 }
  0x8a   :  { %399 = vmatprep.subr.bf16.mxu0 %v3563_v29  ;;  %3331 = vmatprep.subr.bf16.mxu1 %v3927_v4 }
  0x8b   :  { %v192_v29 = vsub.s32 %v189_v27, %v4155_v54 }
  0x8d   :  { %400 = vmatpush1.bf16.msra.mxu0 %v3565_v31  ;;  %3332 = vmatpush3.bf16.msra.mxu1 %v3566_v32  ;;  %v193_v31 = vrot.slane %v185_v28, %v192_v29 }
  0x8e   :  { %401 = vmatprep.subr.bf16.mxu0 %v3567_v33  ;;  %3333 = vmatprep.subr.bf16.mxu1 %v3927_v4 }
  0x8f   :  { %v194_v32 = vcombine.high %v193_v31, %v193_v31  ;;  %v201_v33 = vrot.slane %v193_v31, %v192_v29 }
  0x91   :  { %402 = vmatpush1.bf16.msra.mxu0 %v3569_v34  ;;  %3334 = vmatpush3.bf16.msra.mxu1 %v3570_v35  ;;  %v208_v34 = vrot.slane %v194_v32, %v192_v29  ;;  %v4199_v35 = vrot.slane %v201_v33, %v4166_v59 }
  0x92   :  { %3339 = vmatprep.subr.bf16.mxu0 %v3927_v4  ;;  %3345 = vmatprep.subr.bf16.mxu1 %v3927_v4 }
 0x107   :  { %v145_v7 = vpop.xlane.xlu0 %144 }
 0x108   :  { %v149_v8 = vmul.f32 0.0078125, %v145_v7  ;;  %v247_v7 = vrot.slane %v242_v56, %v4166_v59 }
 0x10a   :  { %v4118_v9 = vsub.f32 %v140_v0, %v149_v8  ;;  %v255_v0 = vrot.slane %v242_v56, %v254_v57 }
 0x10b   :  { %v147_v10 = vpop.xlane.xlu0 %146 }
 0x10c   :  { %v150_v11 = vmul.f32 0.0078125, %v147_v10  ;;  %v153_v12 = vmul.f32 %v4118_v9, %v4118_v9 }
 0x10e   :  { %v4122_v13 = vsub.f32 %v141_v1, %v150_v11  ;;  %155 = vadd.xlane.f32.xlu1 %v153_v12 }
 0x110   :  { %v154_v14 = vmul.f32 %v4122_v13, %v4122_v13 }
 0x112   :  { %157 = vadd.xlane.f32.xlu1 %v154_v14 }
 0x19b   :  { %v156_v36 = vpop.xlane.xlu1 %155 }
 0x19c   :  { %v159_v37 = vmul.f32 0.0078125, %v156_v36 }
 0x19e   :  { %v161_v38 = vadd.f32 1e-12, %v159_v37 }
 0x19f   :  { %v158_v39 = vpop.xlane.xlu1 %157 }
 0x1a0   :  { %3707 = vrsqrt.f32 %v161_v38  ;;  %v160_v40 = vmul.f32 0.0078125, %v158_v39  ;;  %v4202_v39 = vrot.slane %v208_v34, %v4166_v59 }
 0x1a2   :  { %v162_v41 = vadd.f32 1e-12, %v160_v40 }
 0x1a4   :  { %3709 = vrsqrt.f32 %v162_v41 }
 0x1aa   :  { %v3708_v42 = vpop.eup %3707 }
 0x1ab   :  { %v165_v43 = vmul.f32 %v3708_v42, %v4118_v9 }
 0x1ad   :  { %v173_v47 = vmul.f32 %v3003_v44, %v165_v43 }
 0x1ae   :  { %v3710_v45 = vpop.eup %3709 }
 0x1af   :  { %v166_v46 = vmul.f32 %v3710_v45, %v4122_v13  ;;  %v4145_v50 = vadd.f32 %v3004_v48, %v173_v47 }
 0x1b1   :  { %v174_v49 = vmul.f32 %v3003_v44, %v166_v46 }
 0x1b3   :  { %v4147_v51 = vadd.f32 %v3004_v48, %v174_v49 }
 0x1b5   :  { %v209_v52 = vpack.c.bf16 %v4147_v51, %v4145_v50 }
 0x1b7   :  { %420 = vmatmul.mubr.bf16.vlgmr.msra.gmra.mrb[0].mxu0 %v209_v52  ;;  %3336 = vmatmul.mubr.bf16.vlgmr.msra.gmra.mrb[0].mxu1 %v209_v52 }
 0x1b8   :  { %3341 = vmatprep.mubr.msk.bf16.mxu0 %vm3929_vm0, %v3927_v4  ;;  %3347 = vmatprep.mubr.msk.bf16.mxu1 %vm3929_vm0, %v3927_v4 }
 0x28a   :  { %v421_v60 = vpop.f32.mrb[0].mxu0  ;;  %v464_v61 = vpop.f32.mrb[0].mxu1 }
 0x28b   :  { %v423_v62 = vpop.f32.mrb[1].mxu0  ;;  %v3337_v63 = vpop.f32.mrb[1].mxu1  ;;  %v465_v10 = vadd.f32 %v464_v61, %v255_v0  ;;  %v422_v13 = vadd.f32 %v421_v60, %v247_v7 }
 0x28c   :  { %v424_v1 = vadd.f32 %v423_v62, %v251_v58  ;;  %v425_v2 = vpop.f32.mrb[2].mxu0  ;;  %v467_v3 = vpop.f32.mrb[2].mxu1 }
 0x28d   :  { %v427_v5 = vpop.f32.mrb[3].mxu0  ;;  %v3338_v6 = vpop.f32.mrb[3].mxu1  ;;  %v468_v14 = vadd.f32 %v467_v3, %v255_v0  ;;  %v4177_v16 = vpack.c.bf16 %v465_v10, %v465_v10  ;;  %v426_v17 = vadd.f32 %v425_v2, %v247_v7  ;;  %v487_v18 = vpack.c.bf16 %v422_v13, %v422_v13 }
 0x28e   :  { %v4171_v8 = vpack.c.bf16 %v424_v1, %v424_v1  ;;  %v428_v9 = vadd.f32 %v427_v5, %v251_v58 }
 0x28f   :  { %v4180_v19 = vpack.c.bf16 %v468_v14, %v468_v14  ;;  %v630_v20 = vsel %vm628_vm2, %v4177_v16, 0  ;;  %v488_v21 = vpack.c.bf16 %v426_v17, %v426_v17 }
 0x290   :  { %v498_v11 = vsel %vm493_vm1, %v4171_v8, 0  ;;  %v490_v12 = vpack.c.bf16 %v428_v9, %v428_v9 }
 0x291   :  { %3340 = vmatpush3.bf16.xpose.msra.mxu0 %v498_v11  ;;  %v676_v22 = vsel %vm628_vm2, %v4180_v19, 0 }
 0x292   :  { %v544_v15 = vsel %vm493_vm1, %v490_v12, 0  ;;  %3351 = vmatprep.subr.bf16.mxu0 %v3927_v4 }
 0x293   :  { %3346 = vmatpush3.bf16.xpose.msra.mxu1 %v544_v15 }
 0x294   :  { %3357 = vmatprep.subr.bf16.mxu1 %v3927_v4 }
 0x298   :  { %3342 = vmatmul.mubr.msk.bf16.vlgmr.msra.gmra.mrb[4].mxu0 %vm493_vm1, %v487_v18 }
 0x299   :  { %3352 = vmatpush3.bf16.msra.mxu0 %v630_v20  ;;  %3353 = vmatprep.mubr.msk.bf16.mxu0 %vm3929_vm0, %v3927_v4 }
 0x29a   :  { %3348 = vmatmul.mubr.msk.bf16.vlgmr.msra.gmra.mrb[4].mxu1 %vm493_vm1, %v488_v21  ;;  %3363 = vmatprep.subr.bf16.mxu0 %v3927_v4 }
 0x29b   :  { %3358 = vmatpush3.bf16.msra.mxu1 %v676_v22  ;;  %3359 = vmatprep.mubr.msk.bf16.mxu1 %vm3929_vm0, %v3927_v4 }
 0x29c   :  { %3369 = vmatprep.subr.bf16.mxu1 %v3927_v4 }
 0x36b   :  { %v534_v36 = vpop.f32.mrb[4].mxu0 }
 0x36c   :  { %v586_v37 = vmul.f32 0.125, %v534_v36  ;;  %v3343_v38 = vpop.f32.mrb[5].mxu0 }
 0x36d   :  { %v537_v40 = vpop.f32.mrb[6].mxu0  ;;  %v580_v41 = vpop.f32.mrb[4].mxu1 }
 0x36e   :  { %v587_v42 = vmul.f32 0.125, %v580_v41  ;;  %v3344_v43 = vpop.f32.mrb[7].mxu0  ;;  %v3349_v44 = vpop.f32.mrb[5].mxu1  ;;  %v598_v45 = vadd.f32 %v4199_v35, %v586_v37 }
 0x36f   :  { %v583_v46 = vpop.f32.mrb[6].mxu1 }
 0x370   :  { %v3350_v47 = vpop.f32.mrb[7].mxu1  ;;  %v601_v48 = vsel %vm600_vm3, %v598_v45, -inf  ;;  %v599_v49 = vadd.f32 %v4202_v39, %v587_v42 }
 0x371   :  { %602 = vmax.xlane.f32.xlu0 %v601_v48 }
 0x372   :  { %v604_v52 = vsel %vm600_vm3, %v599_v49, -inf }
 0x373   :  { %605 = vmax.xlane.f32.xlu1 %v604_v52 }
 0x384   :  { %775 = vrot.lane.b32.xlu1 %v490_v12, %s4600_s29 }
 0x3fe   :  { %v603_v53 = vpop.xlane.xlu0 %602 }
 0x3ff   :  { %v607_v56 = vsub.f32 %v598_v45, %v603_v53 }
 0x400   :  { %v606_v58 = vpop.xlane.xlu1 %605 }
 0x401   :  { %v609_v60 = vmul.f32 1.442695, %v607_v56  ;;  %v608_v61 = vsub.f32 %v599_v49, %v606_v58 }
 0x403   :  { %3711 = vpow2.f32 %v609_v60  ;;  %v611_v62 = vmul.f32 1.442695, %v608_v61 }
 0x404   :  { %v776_v3 = vpop.permute.xlu1 %775 }
 0x405   :  { %3713 = vpow2.f32 %v611_v62 }
 0x40d   :  { %v3712_v63 = vpop.eup %3711 }
 0x40e   :  { %v613_v0 = vsel %vm600_vm3, %v3712_v63, 0.0 }
 0x40f   :  { %v3714_v1 = vpop.eup %3713  ;;  %614 = vadd.xlane.f32.xlu0 %v613_v0 }
 0x410   :  { %v616_v2 = vsel %vm600_vm3, %v3714_v1, 0.0 }
 0x411   :  { %617 = vadd.xlane.f32.xlu1 %v616_v2 }
 0x422   :  { %720 = vrot.lane.b32.xlu1 %v487_v18, %s4600_s29 }
 0x425   :  { %723 = vrot.lane.b32.xlu0 %v4171_v8, %s4600_s29  ;;  %v781_v8 = vsel %vm493_vm1, %v776_v3, 0 }
 0x426   :  { %772 = vrot.lane.b32.xlu1 %v488_v21, %s4600_s29 }
 0x49c   :  { %v615_v5 = vpop.xlane.xlu0 %614 }
 0x49d   :  { %3715 = vrcp.f32 %v615_v5 }
 0x49e   :  { %v618_v6 = vpop.xlane.xlu1 %617 }
 0x49f   :  { %3717 = vrcp.f32 %v618_v6 }
 0x4a0   :  { %v724_v11 = vpop.permute.xlu0 %723 }
 0x4a1   :  { %v729_v14 = vsel %vm493_vm1, %v724_v11, 0 }
 0x4a2   :  { %v721_v17 = vpop.permute.xlu1 %720 }
 0x4a6   :  { %v773_v18 = vpop.permute.xlu1 %772 }
 0x4a7   :  { %v3716_v7 = vpop.eup %3715 }
 0x4a8   :  { %v621_v9 = vmul.f32 %v3716_v7, %v3712_v63 }
 0x4a9   :  { %v3718_v10 = vpop.eup %3717 }
 0x4aa   :  { %v622_v12 = vmul.f32 %v3718_v10, %v3714_v1  ;;  %v623_v13 = vpack.c.bf16 %v621_v9, %v621_v9  ;;  %v3571_v10 = vld [vmem:[#allocation4 + $0x20] sm:$0xff]  }
 0x4ac   :  { %3354 = vmatmul.mubr.msk.bf16.vlgmr.msra.gmra.mrb[8].mxu0 %vm600_vm3, %v623_v13  ;;  %v624_v15 = vpack.c.bf16 %v622_v12, %v622_v12  ;;  %v3573_v12 = vld [vmem:[#allocation4 + $0x30] sm:$0xff]   ;;  %v3574_v13 = vld [vmem:[#allocation4 + $0x38] sm:$0xff]  }
 0x4ad   :  { %3364 = vmatpush3.bf16.xpose.msra.mxu0 %v729_v14  ;;  %3365 = vmatprep.mubr.msk.bf16.mxu0 %vm3929_vm0, %v3927_v4 }
 0x4ae   :  { %3360 = vmatmul.mubr.msk.bf16.vlgmr.msra.gmra.mrb[8].mxu1 %vm600_vm3, %v624_v15  ;;  %3375 = vmatprep.subr.bf16.mxu0 %v3927_v4 }
 0x4af   :  { %3370 = vmatpush3.bf16.xpose.msra.mxu1 %v781_v8  ;;  %3371 = vmatprep.mubr.msk.bf16.mxu1 %vm3929_vm0, %v3927_v4 }
 0x4b0   :  { %3381 = vmatprep.subr.bf16.mxu1 %v3927_v4 }
 0x4b4   :  { %3366 = vmatmul.mubr.msk.bf16.vlgmr.msra.gmra.mrb[12].mxu0 %vm493_vm1, %v721_v17 }
 0x4b5   :  { %3377 = vmatprep.mubr.msk.bf16.mxu0 %vm3929_vm0, %v3927_v4 }
 0x4b6   :  { %3372 = vmatmul.mubr.msk.bf16.vlgmr.msra.gmra.mrb[12].mxu1 %vm493_vm1, %v773_v18 }
 0x4b7   :  { %3383 = vmatprep.mubr.msk.bf16.mxu1 %vm3929_vm0, %v3927_v4 }
 0x57f   :  { %v4231_v20 = vpop.f32.mrb[8].mxu0 }
 0x580   :  { %v3355_v21 = vpop.f32.mrb[9].mxu0 }
 0x581   :  { %v669_v22 = vpop.f32.mrb[10].mxu0  ;;  %v4233_v23 = vpop.f32.mrb[8].mxu1  ;;  %v3575_v21 = vld [vmem:[#allocation4] sm:$0xff]  }
 0x582   :  { %v718_v24 = vpack.c.bf16 %v4233_v23, %v4231_v20  ;;  %v3356_v25 = vpop.f32.mrb[11].mxu0  ;;  %v3361_v26 = vpop.f32.mrb[9].mxu1 }
 0x583   :  { %v715_v27 = vpop.f32.mrb[10].mxu1 }
 0x584   :  { %v3362_v28 = vpop.f32.mrb[11].mxu1 }
 0x585   :  { %v3576_v28 = vld [vmem:[#allocation4 + $0x8] sm:$0xff]  }
 0x587   :  { %v765_v29 = vpop.f32.mrb[12].mxu0 }
 0x588   :  { %v823_v31 = vmul.f32 0.125, %v765_v29  ;;  %v3367_v32 = vpop.f32.mrb[13].mxu0  ;;  %v3577_v29 = vld [vmem:[#allocation4 + $0x10] sm:$0xff]  }
 0x589   :  { %v768_v33 = vpop.f32.mrb[14].mxu0  ;;  %v817_v34 = vpop.f32.mrb[12].mxu1 }
 0x58a   :  { %v824_v36 = vmul.f32 0.125, %v817_v34  ;;  %v3368_v37 = vpop.f32.mrb[15].mxu0  ;;  %v3373_v38 = vpop.f32.mrb[13].mxu1  ;;  %v825_v40 = vadd.f32 %v823_v31, %v4199_v35  ;;  %v3578_v31 = vld [vmem:[#allocation4 + $0x18] sm:$0xff]  }
 0x58b   :  { %v820_v41 = vpop.f32.mrb[14].mxu1  ;;  %v3047_v38 = vld [vmem:[%s4580_s7] ss:$0 sm:$0xff] }
 0x58c   :  { %v3374_v42 = vpop.f32.mrb[15].mxu1  ;;  %v827_v43 = vsel %vm600_vm3, %v825_v40, -inf  ;;  %v826_v44 = vadd.f32 %v824_v36, %v4202_v39 }
 0x58d   :  { %828 = vmax.xlane.f32.xlu0 %v827_v43 }
 0x58e   :  { %v830_v45 = vsel %vm600_vm3, %v826_v44, -inf }
 0x58f   :  { %831 = vmax.xlane.f32.xlu1 %v830_v45 }
 0x5a0   :  { %901 = vrot.lane.b32.xlu1 %v4180_v19, %s4600_s29 }
 0x61a   :  { %v829_v46 = vpop.xlane.xlu0 %828 }
 0x61b   :  { %v833_v47 = vsub.f32 %v825_v40, %v829_v46 }
 0x61c   :  { %v832_v48 = vpop.xlane.xlu1 %831 }
 0x61d   :  { %v835_v49 = vmul.f32 1.442695, %v833_v47  ;;  %v834_v52 = vsub.f32 %v826_v44, %v832_v48  ;;  %v3581_v47 = vld [vmem:[%s4583_s10 + $0x4] ss:$8 sps:$4 sm:$0xff]   ;;  %v3584_v48 = vld [vmem:[%s4583_s10 + $0x14] ss:$8 sps:$4 sm:$0xff]  }
 0x61f   :  { %3719 = vpow2.f32 %v835_v49  ;;  %v837_v53 = vmul.f32 1.442695, %v834_v52 }
 0x620   :  { %v902_v56 = vpop.permute.xlu1 %901 }
 0x621   :  { %3721 = vpow2.f32 %v837_v53  ;;  %v907_v58 = vsel %vm628_vm2, %v902_v56, 0 }
 0x622   :  { %3382 = vmatpush3.bf16.msra.mxu1 %v907_v58 }
 0x623   :  { %3387 = vmatprep.subr.bf16.mxu1 %v3927_v4 }
 0x629   :  { %v3720_v60 = vpop.eup %3719 }
 0x62a   :  { %v839_v61 = vsel %vm600_vm3, %v3720_v60, 0.0 }
 0x62b   :  { %v3722_v62 = vpop.eup %3721  ;;  %840 = vadd.xlane.f32.xlu0 %v839_v61 }
 0x62c   :  { %v842_v19 = vsel %vm600_vm3, %v3722_v62, 0.0 }
 0x62f   :  { %843 = vadd.xlane.f32.xlu0 %v842_v19  ;;  %v3585_v19 = vld [vmem:[%s4583_s10 + $0x20] ss:$8 sps:$4 sm:$0xff]  }
 0x645   :  { %852 = vrot.lane.b32.xlu0 %v4177_v16, %s4600_s29  ;;  %v3572_v16 = vld [vmem:[#allocation4 + $0x28] sm:$0xff]  }
 0x6b8   :  { %v841_v63 = vpop.xlane.xlu0 %840 }
 0x6b9   :  { %3723 = vrcp.f32 %v841_v63  ;;  %v3590_v63 = vld [vmem:[%s4583_s10 + $0x34] ss:$8 sps:$4 sm:$0xff]  }
 0x6bc   :  { %v844_v0 = vpop.xlane.xlu0 %843 }
 0x6bd   :  { %3725 = vrcp.f32 %v844_v0  ;;  %v3588_v0 = vld [vmem:[%s4583_s10 + $0x30] ss:$8 sps:$4 sm:$0xff]  }
 0x6c0   :  { %v853_v1 = vpop.permute.xlu0 %852 }
 0x6c1   :  { %v858_v2 = vsel %vm628_vm2, %v853_v1, 0  ;;  %v3593_v1 = vld [vmem:[%s4583_s10 + $0x44] ss:$8 sps:$4 sm:$0xff]  }
 0x6c2   :  { %3376 = vmatpush3.bf16.msra.mxu0 %v858_v2  ;;  %v3591_v2 = vld [vmem:[%s4583_s10 + $0x40] ss:$8 sps:$4 sm:$0xff]  }
 0x6c3   :  { %v3724_v3 = vpop.eup %3723  ;;  %1246 = vmatprep.subr.bf16.mxu0 %v3581_v47  ;;  %v1154_v47 = vld [vmem:[%s4584_s11] sm:$0x3] }
 0x6c4   :  { %v847_v5 = vmul.f32 %v3724_v3, %v3720_v60  ;;  %v3596_v3 = vld [vmem:[%s4583_s10 + $0x54] ss:$8 sps:$4 sm:$0xff]  }
 0x6c6   :  { %v849_v6 = vpack.c.bf16 %v847_v5, %v847_v5  ;;  %v3594_v5 = vld [vmem:[%s4583_s10 + $0x50] ss:$8 sps:$4 sm:$0xff]  }
 0x6c7   :  { %v3726_v7 = vpop.eup %3725 }
 0x6c8   :  { %v848_v9 = vmul.f32 %v3726_v7, %v3722_v62  ;;  %3378 = vmatmul.mubr.msk.bf16.vlgmr.msra.gmra.mrb[16].mxu0 %vm600_vm3, %v849_v6  ;;  %v3587_v62 = vld [vmem:[%s4583_s10 + $0x24] ss:$8 sps:$4 sm:$0xff]   ;;  %v3597_v7 = vld [vmem:[%s4583_s10 + $0x60] ss:$8 sps:$4 sm:$0xff]  }
 0x6c9   :  { %1278 = vmatprep.mubr.bf16.mxu0 %v3928_v30  ;;  %v3599_v6 = vld [vmem:[%s4583_s10 + $0x64] ss:$8 sps:$4 sm:$0xff]  }
 0x6ca   :  { %v850_v11 = vpack.c.bf16 %v848_v9, %v848_v9  ;;  %v3602_v9 = vld [vmem:[%s4583_s10 + $0x74] ss:$8 sps:$4 sm:$0xff]  }
 0x6cc   :  { %3384 = vmatmul.mubr.msk.bf16.vlgmr.msra.gmra.mrb[16].mxu1 %vm600_vm3, %v850_v11 }
 0x6cd   :  { %3388 = vmatpush3.bf16.msra.mxu1 %v3571_v10  ;;  %3395 = vmatprep.mubr.msk.bf16.mxu1 %vm3929_vm0, %v3927_v4  ;;  %v3600_v10 = vld [vmem:[%s4583_s10 + $0x70] ss:$8 sps:$4 sm:$0xff]  }
 0x6ce   :  { %3389 = vmatprep.subr.bf16.mxu1 %v3927_v4 }
 0x6d1   :  { %3390 = vmatpush3.bf16.msra.mxu1 %v3572_v16 }
 0x6d2   :  { %3391 = vmatprep.subr.bf16.mxu1 %v3927_v4 }
 0x6d5   :  { %3392 = vmatpush3.bf16.msra.mxu1 %v3573_v12 }
 0x6d6   :  { %3393 = vmatprep.subr.bf16.mxu1 %v3927_v4 }
 0x6d9   :  { %3394 = vmatpush3.bf16.msra.mxu1 %v3574_v13 }
 0x6da   :  { %3399 = vmatprep.subr.bf16.mxu1 %v3927_v4 }
 0x79b   :  { %v894_v14 = vpop.f32.mrb[16].mxu0 }
 0x79c   :  { %v3379_v15 = vpop.f32.mrb[17].mxu0 }
 0x79d   :  { %v897_v8 = vpop.f32.mrb[18].mxu0 }
 0x79e   :  { %v3380_v17 = vpop.f32.mrb[19].mxu0 }
 0x79f   :  { %v943_v18 = vpop.f32.mrb[16].mxu1  ;;  %v3048_v17 = vld [vmem:[%s4581_s8] ss:$0 sm:$0xff] }
 0x7a0   :  { %v949_v22 = vpack.c.bf16 %v943_v18, %v894_v14  ;;  %v3385_v25 = vpop.f32.mrb[17].mxu1 }
 0x7a1   :  { %v946_v26 = vpop.f32.mrb[18].mxu1 }
 0x7a2   :  { %v3386_v27 = vpop.f32.mrb[19].mxu1  ;;  %3396 = vmatmul.mubr.msk.bf16.vlgmr.msra.gmra.mrb[20].mxu1 %vm493_vm1, %v949_v22  ;;  %v3049_v26 = vld [vmem:[%s4582_s9] ss:$0 sm:$0xff] }
 0x7a3   :  { %3400 = vmatpush3.bf16.msra.mxu1 %v3575_v21  ;;  %3407 = vmatprep.mubr.msk.bf16.mxu1 %vm3929_vm0, %v3927_v4 }
 0x7a4   :  { %3401 = vmatprep.subr.bf16.mxu1 %v3927_v4 }
 0x7a7   :  { %3402 = vmatpush3.bf16.msra.mxu1 %v3576_v28 }
 0x7a8   :  { %3403 = vmatprep.subr.bf16.mxu1 %v3927_v4 }
 0x7ab   :  { %3404 = vmatpush3.bf16.msra.mxu1 %v3577_v29 }
 0x7ac   :  { %3405 = vmatprep.subr.bf16.mxu1 %v3927_v4 }
 0x7af   :  { %3406 = vmatpush3.bf16.msra.mxu1 %v3578_v31 }
 0x7b2   :  { %3408 = vmatmul.mubr.msk.bf16.vlgmr.msra.gmra.mrb[24].mxu1 %vm493_vm1, %v718_v24  ;;  %v3579_v24 = vld [vmem:[%s4583_s10] ss:$8 sps:$4 sm:$0xff]  }
 0x7b3   :  { %1247 = vmatpush1.bf16.msra.mxu0 %v3579_v24  ;;  %v3618_v24 = vld [vmem:[#allocation6 + $0x38] sm:$0xff]  }
 0x7b4   :  { %1248 = vmatprep.subr.bf16.mxu0 %v3584_v48  ;;  %v1159_v48 = vrot.slane %v1154_v47, %v4166_v59 }
 0x875   :  { %v1011_v32 = vpop.f32.mrb[20].mxu1 }
 0x876   :  { %v3397_v33 = vpop.f32.mrb[21].mxu1 }
 0x877   :  { %v1014_v34 = vpop.f32.mrb[22].mxu1  ;;  %v3604_v33 = vld [vmem:[#allocation6] sm:$0xff]  }
 0x878   :  { %v3398_v36 = vpop.f32.mrb[23].mxu1 }
 0x879   :  { %v3606_v36 = vld [vmem:[#allocation6 + $0x8] sm:$0xff]  }
 0x885   :  { %v1079_v37 = vpop.f32.mrb[24].mxu1 }
 0x886   :  { %v1080_v40 = vadd.f32 %v1079_v37, %v1011_v32  ;;  %v3409_v41 = vpop.f32.mrb[25].mxu1  ;;  %v3603_v32 = vld [vmem:[#allocation6 + $0x40] sm:$0xff]   ;;  %v3607_v37 = vld [vmem:[#allocation6 + $0x50] sm:$0xff]  }
 0x887   :  { %v1082_v42 = vpop.f32.mrb[26].mxu1  ;;  %3231 = vmatprep.subr.bf16.mxu1 %v3603_v32  ;;  %v3610_v41 = vld [vmem:[#allocation6 + $0x18] sm:$0xff]  }
 0x888   :  { %v1093_v43 = vadd.f32 %v3047_v38, %v1080_v40  ;;  %v1083_v44 = vadd.f32 %v1082_v42, %v1014_v34  ;;  %v3410_v45 = vpop.f32.mrb[27].mxu1  ;;  %3232 = vmatpush3.bf16.msra.mxu1 %v3604_v33  ;;  %v3605_v34 = vld [vmem:[#allocation6 + $0x48] sm:$0xff]   ;;  %v3609_v40 = vld [vmem:[#allocation6 + $0x58] sm:$0xff]   ;;  %v3611_v42 = vld [vmem:[#allocation6 + $0x60] sm:$0xff]  }
 0x889   :  { %3233 = vmatprep.subr.bf16.mxu1 %v3605_v34  ;;  %v3614_v45 = vld [vmem:[#allocation6 + $0x28] sm:$0xff]  }
 0x88a   :  { %v1094_v46 = vadd.f32 %v3047_v38, %v1083_v44  ;;  %v1095_v20 = vadd.f32 %v1093_v43, %v4145_v50  ;;  %v3582_v50 = vld [vmem:[%s4583_s10 + $0x10] ss:$8 sps:$4 sm:$0xff]   ;;  %v3612_v43 = vld [vmem:[#allocation6 + $0x20] sm:$0xff]   ;;  %v3613_v44 = vld [vmem:[#allocation6 + $0x68] sm:$0xff]  }
 0x88b   :  { %1249 = vmatpush1.bf16.msra.mxu0 %v3582_v50  ;;  %v3608_v38 = vld [vmem:[#allocation6 + $0x10] sm:$0xff]   ;;  %v1163_v50 = vrot.slane %v1154_v47, %v4158_v55 }
 0x88c   :  { %1099 = vadd.xlane.f32.xlu1 %v1095_v20  ;;  %v1096_v23 = vadd.f32 %v1094_v46, %v4147_v51  ;;  %1250 = vmatprep.subr.bf16.mxu0 %v3587_v62  ;;  %v3615_v46 = vld [vmem:[#allocation6 + $0x70] sm:$0xff]  }
 0x88d   :  { %3234 = vmatpush3.bf16.msra.mxu1 %v3606_v36 }
 0x88e   :  { %1101 = vadd.xlane.f32.xlu0 %v1096_v23  ;;  %3235 = vmatprep.subr.bf16.mxu1 %v3607_v37 }
 0x88f   :  { %1251 = vmatpush1.bf16.msra.mxu0 %v3585_v19 }
 0x890   :  { %1252 = vmatprep.subr.bf16.mxu0 %v3590_v63 }
 0x891   :  { %3236 = vmatpush3.bf16.msra.mxu1 %v3608_v38 }
 0x892   :  { %3237 = vmatprep.subr.bf16.mxu1 %v3609_v40 }
 0x893   :  { %1253 = vmatpush1.bf16.msra.mxu0 %v3588_v0 }
 0x894   :  { %1254 = vmatprep.subr.bf16.mxu0 %v3593_v1 }
 0x895   :  { %3238 = vmatpush3.bf16.msra.mxu1 %v3610_v41 }
 0x896   :  { %3239 = vmatprep.subr.bf16.mxu1 %v3611_v42 }
 0x897   :  { %1255 = vmatpush1.bf16.msra.mxu0 %v3591_v2 }
 0x898   :  { %1256 = vmatprep.subr.bf16.mxu0 %v3596_v3 }
 0x899   :  { %3240 = vmatpush3.bf16.msra.mxu1 %v3612_v43 }
 0x89a   :  { %3241 = vmatprep.subr.bf16.mxu1 %v3613_v44 }
 0x89b   :  { %1257 = vmatpush1.bf16.msra.mxu0 %v3594_v5 }
 0x89c   :  { %1258 = vmatprep.subr.bf16.mxu0 %v3599_v6 }
 0x89d   :  { %3242 = vmatpush3.bf16.msra.mxu1 %v3614_v45 }
 0x89e   :  { %3243 = vmatprep.subr.bf16.mxu1 %v3615_v46  ;;  %v3066_v46 = vld [vmem:[%s4586_s13] ss:$0 sm:$0xff] }
 0x89f   :  { %1259 = vmatpush1.bf16.msra.mxu0 %v3597_v7 }
 0x8a0   :  { %1260 = vmatprep.subr.bf16.mxu0 %v3602_v9 }
 0x8a3   :  { %1261 = vmatpush1.bf16.msra.mxu0 %v3600_v10 }
 0x919   :  { %v1100_v51 = vpop.xlane.xlu1 %1099 }
 0x91a   :  { %v1103_v49 = vmul.f32 0.0078125, %v1100_v51 }
 0x91b   :  { %v1102_v52 = vpop.xlane.xlu0 %1101 }
 0x91c   :  { %v1105_v53 = vsub.f32 %v1095_v20, %v1103_v49  ;;  %v1104_v56 = vmul.f32 0.0078125, %v1102_v52  ;;  %v3616_v20 = vld [vmem:[#allocation6 + $0x30] sm:$0xff]  }
 0x91d   :  { %3244 = vmatpush3.bf16.msra.mxu1 %v3616_v20 }
 0x91e   :  { %v1106_v58 = vsub.f32 %v1096_v23, %v1104_v56  ;;  %v1107_v60 = vmul.f32 %v1105_v53, %v1105_v53  ;;  %v3617_v23 = vld [vmem:[#allocation6 + $0x78] sm:$0xff]  }
 0x91f   :  { %3245 = vmatprep.subr.bf16.mxu1 %v3617_v23 }
 0x920   :  { %1109 = vadd.xlane.f32.xlu0 %v1107_v60  ;;  %v1108_v61 = vmul.f32 %v1106_v58, %v1106_v58 }
 0x921   :  { %3246 = vmatpush3.bf16.msra.mxu1 %v3618_v24 }
 0x922   :  { %1111 = vadd.xlane.f32.xlu1 %v1108_v61  ;;  %3411 = vmatprep.subr.bf16.mxu1 %v3927_v4 }
 0x9ad   :  { %v1110_v11 = vpop.xlane.xlu0 %1109 }
 0x9ae   :  { %v1113_v16 = vmul.f32 0.0078125, %v1110_v11 }
 0x9af   :  { %v1112_v12 = vpop.xlane.xlu1 %1111 }
 0x9b0   :  { %v1115_v13 = vadd.f32 1e-12, %v1113_v16  ;;  %v1114_v14 = vmul.f32 0.0078125, %v1112_v12 }
 0x9b2   :  { %3727 = vrsqrt.f32 %v1115_v13  ;;  %v1116_v15 = vadd.f32 1e-12, %v1114_v14 }
 0x9b4   :  { %3729 = vrsqrt.f32 %v1116_v15 }
 0x9bc   :  { %v3728_v8 = vpop.eup %3727 }
 0x9bd   :  { %v1119_v18 = vmul.f32 %v3728_v8, %v1105_v53 }
 0x9be   :  { %v3730_v21 = vpop.eup %3729 }
 0x9bf   :  { %v1120_v22 = vmul.f32 %v3730_v21, %v1106_v58  ;;  %v1127_v25 = vmul.f32 %v3048_v17, %v1119_v18 }
 0x9c1   :  { %v1128_v27 = vmul.f32 %v3048_v17, %v1120_v22  ;;  %v4328_v28 = vadd.f32 %v3049_v26, %v1127_v25 }
 0x9c3   :  { %v4330_v29 = vadd.f32 %v3049_v26, %v1128_v27 }
 0x9c5   :  { %v1137_v31 = vpack.c.bf16 %v4330_v29, %v4328_v28 }
 0x9c7   :  { %1279 = vmatmul.mubr.bf16.vlgmr.msra.gmra.mrb[20].mxu0 %v1137_v31 }
 0x9c8   :  { %1757 = vmatprep.mubr.bf16.mxu0 %v3928_v30 }
 0xa9a   :  { %v1280_v51 = vpop.f32.mrb[20].mxu0 }
 0xa9b   :  { %v1281_v49 = vadd.f32 %v1280_v51, %v1159_v48  ;;  %v1282_v52 = vpop.f32.mrb[21].mxu0 }
 0xa9c   :  { %v1283_v53 = vadd.f32 %v1282_v52, %v1163_v50  ;;  %v1284_v56 = vpop.f32.mrb[22].mxu0 }
 0xa9d   :  { %v1293_v58 = vmul.f32 0.044715, %v1281_v49  ;;  %v1285_v60 = vadd.f32 %v1284_v56, %v1159_v48  ;;  %v1286_v61 = vpop.f32.mrb[23].mxu0  ;;  %v1289_v31 = vmul.f32 0.5, %v1281_v49  ;;  %v3621_v56 = vld [vmem:[#allocation2 + $0xc4] ss:$12 sps:$4 sm:$0xff]  }
 0xa9e   :  { %v1294_v62 = vmul.f32 0.044715, %v1283_v53  ;;  %v1287_v19 = vadd.f32 %v1286_v61, %v1163_v50  ;;  %v1290_v34 = vmul.f32 0.5, %v1283_v53  ;;  %1725 = vmatprep.subr.bf16.mxu0 %v3621_v56  ;;  %v3626_v61 = vld [vmem:[#allocation2 + $0xe0] ss:$12 sps:$4 sm:$0xff]  }
 0xa9f   :  { %v1297_v63 = vmul.f32 %v1293_v58, %v1281_v49  ;;  %v1295_v0 = vmul.f32 0.044715, %v1285_v60  ;;  %v1291_v32 = vmul.f32 0.5, %v1285_v60  ;;  %v3622_v58 = vld [vmem:[#allocation2 + $0xc8] ss:$12 sps:$4 sm:$0xff]  }
 0xaa0   :  { %v1298_v1 = vmul.f32 %v1294_v62, %v1283_v53  ;;  %v1296_v2 = vmul.f32 0.044715, %v1287_v19  ;;  %v1292_v36 = vmul.f32 0.5, %v1287_v19  ;;  %v3623_v62 = vld [vmem:[#allocation2 + $0xd8] ss:$12 sps:$4 sm:$0xff]  }
 0xaa1   :  { %v1301_v3 = vmul.f32 %v1297_v63, %v1281_v49  ;;  %v1299_v5 = vmul.f32 %v1295_v0, %v1285_v60 }
 0xaa2   :  { %v1302_v6 = vmul.f32 %v1298_v1, %v1283_v53  ;;  %v1300_v7 = vmul.f32 %v1296_v2, %v1287_v19 }
 0xaa3   :  { %v1305_v9 = vadd.f32 %v1301_v3, %v1281_v49  ;;  %v1303_v10 = vmul.f32 %v1299_v5, %v1285_v60  ;;  %v3629_v5 = vld [vmem:[#allocation2 + $0xf4] ss:$12 sps:$4 sm:$0xff]  }
 0xaa4   :  { %v1304_v11 = vmul.f32 %v1300_v7, %v1287_v19  ;;  %v1306_v16 = vadd.f32 %v1302_v6, %v1283_v53  ;;  %v3619_v53 = vld [vmem:[#allocation2 + $0xc0] ss:$12 sps:$4 sm:$0xff]   ;;  %v3627_v6 = vld [vmem:[#allocation2 + $0xf0] ss:$12 sps:$4 sm:$0xff]   ;;  %v3630_v7 = vld [vmem:[#allocation2 + $0xf8] ss:$12 sps:$4 sm:$0xff]  }
 0xaa5   :  { %v1309_v12 = vmul.f32 0.7978846, %v1305_v9  ;;  %v1307_v13 = vadd.f32 %v1303_v10, %v1285_v60  ;;  %v3625_v60 = vld [vmem:[#allocation2 + $0xdc] ss:$12 sps:$4 sm:$0xff]   ;;  %1726 = vmatpush1.bf16.msra.mxu0 %v3619_v53  ;;  %v3633_v9 = vld [vmem:[#allocation2 + $0x10c] ss:$12 sps:$4 sm:$0xff]  }
 0xaa6   :  { %v1308_v14 = vadd.f32 %v1304_v11, %v1287_v19  ;;  %v1310_v15 = vmul.f32 0.7978846, %v1306_v16  ;;  %1727 = vmatprep.subr.bf16.mxu0 %v3625_v60  ;;  %v3631_v10 = vld [vmem:[#allocation2 + $0x108] ss:$12 sps:$4 sm:$0xff]   ;;  %v3634_v11 = vld [vmem:[#allocation2 + $0x110] ss:$12 sps:$4 sm:$0xff]  }
 0xaa7   :  { %3731 = vtanh.f32 %v1309_v12  ;;  %v1311_v8 = vmul.f32 0.7978846, %v1307_v13  ;;  %v3637_v16 = vld [vmem:[#allocation2 + $0x124] ss:$12 sps:$4 sm:$0xff]   ;;  %v3635_v12 = vld [vmem:[#allocation2 + $0x120] ss:$12 sps:$4 sm:$0xff]  }
 0xaa8   :  { %v1312_v17 = vmul.f32 0.7978846, %v1308_v14  ;;  %3733 = vtanh.f32 %v1310_v15  ;;  %v3638_v13 = vld [vmem:[#allocation2 + $0x128] ss:$12 sps:$4 sm:$0xff]   ;;  %v3639_v15 = vld [vmem:[#allocation2 + $0x138] ss:$12 sps:$4 sm:$0xff]  }
 0xaa9   :  { %3735 = vtanh.f32 %v1311_v8  ;;  %1728 = vmatpush1.bf16.msra.mxu0 %v3623_v62  ;;  %v3641_v14 = vld [vmem:[#allocation2 + $0x13c] ss:$12 sps:$4 sm:$0xff]   ;;  %v3642_v8 = vld [vmem:[#allocation2 + $0x140] ss:$12 sps:$4 sm:$0xff]  }
 0xaaa   :  { %3737 = vtanh.f32 %v1312_v17  ;;  %1729 = vmatprep.subr.bf16.mxu0 %v3629_v5  ;;  %v3645_v17 = vld [vmem:[#allocation2 + $0x154] ss:$12 sps:$4 sm:$0xff]  }
 0xaad   :  { %1730 = vmatpush1.bf16.msra.mxu0 %v3627_v6 }
 0xaae   :  { %1731 = vmatprep.subr.bf16.mxu0 %v3633_v9 }
 0xab1   :  { %v3732_v18 = vpop.eup %3731  ;;  %1732 = vmatpush1.bf16.msra.mxu0 %v3631_v10 }
 0xab2   :  { %v3734_v21 = vpop.eup %3733  ;;  %v1317_v22 = vadd.f32 1.0, %v3732_v18  ;;  %1733 = vmatprep.subr.bf16.mxu0 %v3637_v16  ;;  %v3643_v18 = vld [vmem:[#allocation2 + $0x150] ss:$12 sps:$4 sm:$0xff]  }
 0xab3   :  { %v3736_v25 = vpop.eup %3735  ;;  %v1318_v26 = vadd.f32 1.0, %v3734_v21  ;;  %v3646_v21 = vld [vmem:[#allocation2 + $0x158] ss:$12 sps:$4 sm:$0xff]  }
 0xab4   :  { %v3738_v27 = vpop.eup %3737  ;;  %v1319_v33 = vadd.f32 1.0, %v3736_v25  ;;  %v1321_v38 = vmul.f32 %v1317_v22, %v1289_v31  ;;  %v3649_v22 = vld [vmem:[#allocation2 + $0x16c] ss:$12 sps:$4 sm:$0xff]   ;;  %v3647_v25 = vld [vmem:[#allocation2 + $0x168] ss:$12 sps:$4 sm:$0xff]  }
 0xab5   :  { %v1320_v37 = vadd.f32 1.0, %v3738_v27  ;;  %v1322_v41 = vmul.f32 %v1318_v26, %v1290_v34  ;;  %1734 = vmatpush1.bf16.msra.mxu0 %v3635_v12  ;;  %v3650_v26 = vld [vmem:[#allocation2 + $0x170] ss:$12 sps:$4 sm:$0xff]  }
 0xab6   :  { %v1323_v40 = vmul.f32 %v1319_v33, %v1291_v32  ;;  %1735 = vmatprep.subr.bf16.mxu0 %v3641_v14 }
 0xab7   :  { %v1324_v42 = vmul.f32 %v1320_v37, %v1292_v36 }
 0xab8   :  { %v1325_v43 = vpack.c.bf16 %v1323_v40, %v1321_v38  ;;  %v3083_v38 = vld [vmem:[#allocation7] ss:$0 sm:$0xff] }
 0xab9   :  { %v1326_v44 = vpack.c.bf16 %v1324_v42, %v1322_v41  ;;  %1736 = vmatpush1.bf16.msra.mxu0 %v3639_v15 }
 0xaba   :  { %1737 = vmatprep.subr.bf16.mxu0 %v3645_v17 }
 0xabb   :  { %1494 = vmatprep.mubr.bf16.mxu1 %v1326_v44  ;;  %v3084_v44 = vld [vmem:[#allocation9] ss:$0 sm:$0xff] }
 0xabc   :  { %1495 = vmatmul.mubr.bf16.vlgmr.msra.gmra.mrb[28].mxu1 %v1325_v43 }
 0xabd   :  { %3427 = vmatprep.mubr.msk.bf16.mxu1 %vm3929_vm0, %v3927_v4  ;;  %3412 = vmatpush3.bf16.msra.mxu1 %v3622_v58 }
 0xabe   :  { %3413 = vmatprep.subr.bf16.mxu1 %v3927_v4  ;;  %1738 = vmatpush1.bf16.msra.mxu0 %v3643_v18 }
 0xabf   :  { %1739 = vmatprep.subr.bf16.mxu0 %v3649_v22 }
 0xac1   :  { %3414 = vmatpush3.bf16.msra.mxu1 %v3626_v61 }
 0xac2   :  { %3415 = vmatprep.subr.bf16.mxu1 %v3927_v4  ;;  %1740 = vmatpush1.bf16.msra.mxu0 %v3647_v25 }
 0xac3   :  { %3431 = vmatprep.subr.bf16.mxu0 %v3927_v4 }
 0xac5   :  { %3416 = vmatpush3.bf16.msra.mxu1 %v3630_v7 }
 0xac6   :  { %3417 = vmatprep.subr.bf16.mxu1 %v3927_v4 }
 0xac9   :  { %3418 = vmatpush3.bf16.msra.mxu1 %v3634_v11 }
 0xaca   :  { %3419 = vmatprep.subr.bf16.mxu1 %v3927_v4 }
 0xacd   :  { %3420 = vmatpush3.bf16.msra.mxu1 %v3638_v13 }
 0xace   :  { %3421 = vmatprep.subr.bf16.mxu1 %v3927_v4 }
 0xad1   :  { %3422 = vmatpush3.bf16.msra.mxu1 %v3642_v8 }
 0xad2   :  { %3423 = vmatprep.subr.bf16.mxu1 %v3927_v4 }
 0xad5   :  { %3424 = vmatpush3.bf16.msra.mxu1 %v3646_v21 }
 0xad6   :  { %3425 = vmatprep.subr.bf16.mxu1 %v3927_v4 }
 0xad9   :  { %3426 = vmatpush3.bf16.msra.mxu1 %v3650_v26 }
 0xada   :  { %3437 = vmatprep.subr.bf16.mxu1 %v3927_v4 }
 0xb8f   :  { %v3247_v45 = vpop.f32.mrb[28].mxu1 }
 0xb90   :  { %v3248_v20 = vpop.f32.mrb[29].mxu1 }
 0xb91   :  { %v3249_v23 = vadd.f32 %v3248_v20, %v3247_v45  ;;  %v3250_v24 = vpop.f32.mrb[30].mxu1 }
 0xb92   :  { %v3251_v47 = vpop.f32.mrb[31].mxu1 }
 0xb93   :  { %v1497_v48 = vadd.f32 %v3249_v23, %v3066_v46  ;;  %v3252_v50 = vadd.f32 %v3251_v47, %v3250_v24  ;;  %v3085_v24 = vld [vmem:[%s4578_s5 + $0x3] sm:$0x7] }
 0xb94   :  { %v1589_v47 = vrot.slane %v3085_v24, %v4158_v55  ;;  %v1585_v62 = vrot.slane %v3085_v24, %v4166_v59 }
 0xb95   :  { %v1500_v51 = vadd.f32 %v3252_v50, %v3066_v46  ;;  %v1503_v49 = vadd.f32 %v1497_v48, %v4328_v28 }
 0xb97   :  { %1507 = vadd.xlane.f32.xlu0 %v1503_v49  ;;  %v1504_v52 = vadd.f32 %v1500_v51, %v4330_v29 }
 0xb99   :  { %1509 = vadd.xlane.f32.xlu1 %v1504_v52 }
 0xc24   :  { %v1508_v28 = vpop.xlane.xlu0 %1507 }
 0xc25   :  { %v1511_v19 = vmul.f32 0.0078125, %v1508_v28 }
 0xc26   :  { %v1510_v29 = vpop.xlane.xlu1 %1509 }
 0xc27   :  { %v1513_v63 = vsub.f32 %v1503_v49, %v1511_v19  ;;  %v1512_v0 = vmul.f32 0.0078125, %v1510_v29 }
 0xc29   :  { %v1514_v1 = vsub.f32 %v1504_v52, %v1512_v0  ;;  %v1515_v2 = vmul.f32 %v1513_v63, %v1513_v63  ;;  %v1593_v52 = vrot.slane %v3085_v24, %v254_v57 }
 0xc2b   :  { %1517 = vadd.xlane.f32.xlu0 %v1515_v2  ;;  %v1516_v3 = vmul.f32 %v1514_v1, %v1514_v1 }
 0xc2d   :  { %1519 = vadd.xlane.f32.xlu1 %v1516_v3 }
 0xcb8   :  { %v1518_v27 = vpop.xlane.xlu0 %1517 }
 0xcb9   :  { %v1521_v31 = vmul.f32 0.0078125, %v1518_v27 }
 0xcba   :  { %v1520_v32 = vpop.xlane.xlu1 %1519 }
 0xcbb   :  { %v1523_v33 = vadd.f32 1e-12, %v1521_v31  ;;  %v1522_v34 = vmul.f32 0.0078125, %v1520_v32 }
 0xcbd   :  { %3739 = vrsqrt.f32 %v1523_v33  ;;  %v1524_v36 = vadd.f32 1e-12, %v1522_v34 }
 0xcbf   :  { %3741 = vrsqrt.f32 %v1524_v36 }
 0xcc7   :  { %v3740_v37 = vpop.eup %3739 }
 0xcc8   :  { %v1527_v40 = vmul.f32 %v3740_v37, %v1513_v63 }
 0xcc9   :  { %v3742_v41 = vpop.eup %3741 }
 0xcca   :  { %v1528_v42 = vmul.f32 %v3742_v41, %v1514_v1  ;;  %v1535_v43 = vmul.f32 %v3083_v38, %v1527_v40 }
 0xccc   :  { %v1536_v45 = vmul.f32 %v3083_v38, %v1528_v42  ;;  %v4357_v46 = vadd.f32 %v3084_v44, %v1535_v43 }
 0xcce   :  { %v4359_v20 = vadd.f32 %v3084_v44, %v1536_v45 }
 0xcd0   :  { %v1545_v23 = vpack.c.bf16 %v4359_v20, %v4357_v46 }
 0xcd2   :  { %1758 = vmatmul.mubr.bf16.vlgmr.msra.gmra.mrb[24].mxu0 %v1545_v23  ;;  %3428 = vmatmul.mubr.bf16.vlgmr.msra.gmra.mrb[32].mxu1 %v1545_v23 }
 0xcd3   :  { %3433 = vmatprep.mubr.msk.bf16.mxu0 %vm3929_vm0, %v3927_v4  ;;  %3439 = vmatprep.mubr.msk.bf16.mxu1 %vm3929_vm0, %v3927_v4 }
 0xda5   :  { %v1759_v48 = vpop.f32.mrb[24].mxu0  ;;  %v1802_v50 = vpop.f32.mrb[32].mxu1 }
 0xda6   :  { %v1761_v51 = vpop.f32.mrb[25].mxu0  ;;  %v3429_v49 = vpop.f32.mrb[33].mxu1  ;;  %v1803_v29 = vadd.f32 %v1802_v50, %v1593_v52  ;;  %v1760_v1 = vadd.f32 %v1759_v48, %v1585_v62 }
 0xda7   :  { %v1762_v53 = vadd.f32 %v1761_v51, %v1589_v47  ;;  %v1763_v56 = vpop.f32.mrb[26].mxu0  ;;  %v1805_v58 = vpop.f32.mrb[34].mxu1 }
 0xda8   :  { %v1765_v60 = vpop.f32.mrb[27].mxu0  ;;  %v3430_v61 = vpop.f32.mrb[35].mxu1  ;;  %v1806_v2 = vadd.f32 %v1805_v58, %v1593_v52  ;;  %v4377_v54 = vpack.c.bf16 %v1803_v29, %v1803_v29  ;;  %v1764_v57 = vadd.f32 %v1763_v56, %v1585_v62  ;;  %v1826_v5 = vpack.c.bf16 %v1760_v1, %v1760_v1 }
 0xda9   :  { %v1828_v28 = vpack.c.bf16 %v1762_v53, %v1762_v53  ;;  %v1766_v19 = vadd.f32 %v1765_v60, %v1589_v47 }
 0xdaa   :  { %v4380_v6 = vpack.c.bf16 %v1806_v2, %v1806_v2  ;;  %v1956_v7 = vsel %vm628_vm2, %v4377_v54, 0  ;;  %v1827_v9 = vpack.c.bf16 %v1764_v57, %v1764_v57 }
 0xdab   :  { %v1836_v63 = vsel %vm493_vm1, %v1828_v28, 0  ;;  %v1829_v0 = vpack.c.bf16 %v1766_v19, %v1766_v19 }
 0xdac   :  { %3432 = vmatpush3.bf16.xpose.msra.mxu0 %v1836_v63  ;;  %v2002_v10 = vsel %vm628_vm2, %v4380_v6, 0 }
 0xdad   :  { %v1882_v3 = vsel %vm493_vm1, %v1829_v0, 0  ;;  %3443 = vmatprep.subr.bf16.mxu0 %v3927_v4 }
 0xdae   :  { %3438 = vmatpush3.bf16.xpose.msra.mxu1 %v1882_v3 }
 0xdaf   :  { %3449 = vmatprep.subr.bf16.mxu1 %v3927_v4 }
 0xdb3   :  { %3434 = vmatmul.mubr.msk.bf16.vlgmr.msra.gmra.mrb[28].mxu0 %vm493_vm1, %v1826_v5 }
 0xdb4   :  { %3444 = vmatpush3.bf16.msra.mxu0 %v1956_v7  ;;  %3445 = vmatprep.mubr.msk.bf16.mxu0 %vm3929_vm0, %v3927_v4 }
 0xdb5   :  { %3440 = vmatmul.mubr.msk.bf16.vlgmr.msra.gmra.mrb[36].mxu1 %vm493_vm1, %v1827_v9  ;;  %3455 = vmatprep.subr.bf16.mxu0 %v3927_v4 }
 0xdb6   :  { %3450 = vmatpush3.bf16.msra.mxu1 %v2002_v10  ;;  %3451 = vmatprep.mubr.msk.bf16.mxu1 %vm3929_vm0, %v3927_v4 }
 0xdb7   :  { %3461 = vmatprep.subr.bf16.mxu1 %v3927_v4 }
 0xe86   :  { %v1872_v11 = vpop.f32.mrb[28].mxu0 }
 0xe87   :  { %v1924_v16 = vmul.f32 0.125, %v1872_v11  ;;  %v3435_v12 = vpop.f32.mrb[29].mxu0 }
 0xe88   :  { %v1875_v13 = vpop.f32.mrb[30].mxu0  ;;  %v1918_v14 = vpop.f32.mrb[36].mxu1 }
 0xe89   :  { %v1925_v15 = vmul.f32 0.125, %v1918_v14  ;;  %v3436_v8 = vpop.f32.mrb[31].mxu0  ;;  %v3441_v17 = vpop.f32.mrb[37].mxu1  ;;  %v1926_v18 = vadd.f32 %v1924_v16, %v4199_v35 }
 0xe8a   :  { %v1921_v21 = vpop.f32.mrb[38].mxu1 }
 0xe8b   :  { %v3442_v22 = vpop.f32.mrb[39].mxu1  ;;  %v1928_v25 = vsel %vm600_vm3, %v1926_v18, -inf  ;;  %v1927_v26 = vadd.f32 %v1925_v15, %v4202_v39 }
 0xe8c   :  { %1929 = vmax.xlane.f32.xlu0 %v1928_v25 }
 0xe8d   :  { %v1931_v27 = vsel %vm600_vm3, %v1927_v26, -inf }
 0xe8e   :  { %1932 = vmax.xlane.f32.xlu1 %v1931_v27 }
 0xe9f   :  { %2101 = vrot.lane.b32.xlu1 %v1829_v0, %s4600_s29 }
 0xf19   :  { %v1930_v31 = vpop.xlane.xlu0 %1929 }
 0xf1a   :  { %v1934_v32 = vsub.f32 %v1926_v18, %v1930_v31 }
 0xf1b   :  { %v1933_v33 = vpop.xlane.xlu1 %1932 }
 0xf1c   :  { %v1936_v34 = vmul.f32 1.442695, %v1934_v32  ;;  %v1935_v36 = vsub.f32 %v1927_v26, %v1933_v33 }
 0xf1e   :  { %3743 = vpow2.f32 %v1936_v34  ;;  %v1938_v37 = vmul.f32 1.442695, %v1935_v36 }
 0xf1f   :  { %v2102_v43 = vpop.permute.xlu1 %2101 }
 0xf20   :  { %3745 = vpow2.f32 %v1938_v37  ;;  %v2107_v53 = vsel %vm493_vm1, %v2102_v43, 0 }
 0xf28   :  { %v3744_v38 = vpop.eup %3743 }
 0xf29   :  { %v1940_v40 = vsel %vm600_vm3, %v3744_v38, 0.0 }
 0xf2a   :  { %v3746_v41 = vpop.eup %3745  ;;  %1941 = vadd.xlane.f32.xlu0 %v1940_v40 }
 0xf2b   :  { %v1943_v42 = vsel %vm600_vm3, %v3746_v41, 0.0 }
 0xf2c   :  { %1944 = vadd.xlane.f32.xlu1 %v1943_v42 }
 0xf3d   :  { %2046 = vrot.lane.b32.xlu1 %v1826_v5, %s4600_s29 }
 0xf40   :  { %2049 = vrot.lane.b32.xlu0 %v1828_v28, %s4600_s29 }
 0xf41   :  { %2098 = vrot.lane.b32.xlu1 %v1827_v9, %s4600_s29 }
 0xfb7   :  { %v1942_v44 = vpop.xlane.xlu0 %1941 }
 0xfb8   :  { %3747 = vrcp.f32 %v1942_v44 }
 0xfb9   :  { %v1945_v45 = vpop.xlane.xlu1 %1944 }
 0xfba   :  { %3749 = vrcp.f32 %v1945_v45  ;;  %v3651_v45 = vld [vmem:[#allocation4 + $0x40] sm:$0xff]  }
 0xfbb   :  { %v2050_v48 = vpop.permute.xlu0 %2049 }
 0xfbc   :  { %v2055_v49 = vsel %vm493_vm1, %v2050_v48, 0  ;;  %v3654_v48 = vld [vmem:[#allocation4 + $0x58] sm:$0xff]  }
 0xfbd   :  { %v2047_v56 = vpop.permute.xlu1 %2046 }
 0xfc1   :  { %v2099_v58 = vpop.permute.xlu1 %2098 }
 0xfc2   :  { %v3748_v23 = vpop.eup %3747 }
 0xfc3   :  { %v1948_v24 = vmul.f32 %v3748_v23, %v3744_v38  ;;  %v3656_v23 = vld [vmem:[#allocation4 + $0x68] sm:$0xff]  }
 0xfc4   :  { %v3750_v47 = vpop.eup %3749 }
 0xfc5   :  { %v1949_v50 = vmul.f32 %v3750_v47, %v3746_v41  ;;  %v1950_v51 = vpack.c.bf16 %v1948_v24, %v1948_v24  ;;  %v3655_v41 = vld [vmem:[#allocation4 + $0x60] sm:$0xff]   ;;  %v3652_v24 = vld [vmem:[#allocation4 + $0x48] sm:$0xff]   ;;  %v3653_v47 = vld [vmem:[#allocation4 + $0x50] sm:$0xff]  }
 0xfc7   :  { %3446 = vmatmul.mubr.msk.bf16.vlgmr.msra.gmra.mrb[32].mxu0 %vm600_vm3, %v1950_v51  ;;  %v1951_v52 = vpack.c.bf16 %v1949_v50, %v1949_v50  ;;  %v3657_v50 = vld [vmem:[#allocation4 + $0x70] sm:$0xff]   ;;  %v3658_v51 = vld [vmem:[#allocation4 + $0x78] sm:$0xff]  }
 0xfc8   :  { %3456 = vmatpush3.bf16.xpose.msra.mxu0 %v2055_v49  ;;  %3457 = vmatprep.mubr.msk.bf16.mxu0 %vm3929_vm0, %v3927_v4 }
 0xfc9   :  { %3452 = vmatmul.mubr.msk.bf16.vlgmr.msra.gmra.mrb[40].mxu1 %vm600_vm3, %v1951_v52  ;;  %3467 = vmatprep.subr.bf16.mxu0 %v3927_v4 }
 0xfca   :  { %3462 = vmatpush3.bf16.xpose.msra.mxu1 %v2107_v53  ;;  %3463 = vmatprep.mubr.msk.bf16.mxu1 %vm3929_vm0, %v3927_v4 }
 0xfcb   :  { %3473 = vmatprep.subr.bf16.mxu1 %v3927_v4 }
 0xfcf   :  { %3458 = vmatmul.mubr.msk.bf16.vlgmr.msra.gmra.mrb[36].mxu0 %vm493_vm1, %v2047_v56 }
 0xfd0   :  { %3469 = vmatprep.mubr.msk.bf16.mxu0 %vm3929_vm0, %v3927_v4 }
 0xfd1   :  { %3464 = vmatmul.mubr.msk.bf16.vlgmr.msra.gmra.mrb[44].mxu1 %vm493_vm1, %v2099_v58 }
 0xfd2   :  { %3475 = vmatprep.mubr.msk.bf16.mxu1 %vm3929_vm0, %v3927_v4 }
0x109a   :  { %v4420_v60 = vpop.f32.mrb[32].mxu0 }
0x109b   :  { %v3447_v61 = vpop.f32.mrb[33].mxu0 }
0x109c   :  { %v1995_v62 = vpop.f32.mrb[34].mxu0  ;;  %v4422_v28 = vpop.f32.mrb[40].mxu1 }
0x109d   :  { %v2044_v19 = vpack.c.bf16 %v4422_v28, %v4420_v60  ;;  %v3448_v29 = vpop.f32.mrb[35].mxu0  ;;  %v3453_v63 = vpop.f32.mrb[41].mxu1 }
0x109e   :  { %v2041_v0 = vpop.f32.mrb[42].mxu1 }
0x109f   :  { %v3454_v1 = vpop.f32.mrb[43].mxu1 }
0x10a2   :  { %v2091_v2 = vpop.f32.mrb[36].mxu0 }
0x10a3   :  { %v2149_v3 = vmul.f32 0.125, %v2091_v2  ;;  %v3459_v57 = vpop.f32.mrb[37].mxu0  ;;  %v3129_v2 = vld [vmem:[%s4580_s7 + $0x1] ss:$0 sm:$0xff] }
0x10a4   :  { %v2094_v5 = vpop.f32.mrb[38].mxu0  ;;  %v2143_v7 = vpop.f32.mrb[44].mxu1 }
0x10a5   :  { %v2150_v9 = vmul.f32 0.125, %v2143_v7  ;;  %v3460_v10 = vpop.f32.mrb[39].mxu0  ;;  %v3465_v11 = vpop.f32.mrb[45].mxu1  ;;  %v2151_v16 = vadd.f32 %v2149_v3, %v4199_v35 }
0x10a6   :  { %v2146_v12 = vpop.f32.mrb[46].mxu1 }
0x10a7   :  { %v3466_v13 = vpop.f32.mrb[47].mxu1  ;;  %v2153_v14 = vsel %vm600_vm3, %v2151_v16, -inf  ;;  %v2152_v15 = vadd.f32 %v2150_v9, %v4202_v39  ;;  %v3659_v12 = vld [vmem:[%s4583_s10 + $0x80] ss:$8 sps:$4 sm:$0xff]  }
0x10a8   :  { %2154 = vmax.xlane.f32.xlu0 %v2153_v14  ;;  %v3661_v13 = vld [vmem:[%s4583_s10 + $0x84] ss:$8 sps:$4 sm:$0xff]   ;;  %v3664_v14 = vld [vmem:[%s4583_s10 + $0x94] ss:$8 sps:$4 sm:$0xff]  }
0x10a9   :  { %v2156_v8 = vsel %vm600_vm3, %v2152_v15, -inf }
0x10aa   :  { %2157 = vmax.xlane.f32.xlu1 %v2156_v8 }
0x10bb   :  { %2227 = vrot.lane.b32.xlu1 %v4380_v6, %s4600_s29 }
0x1135   :  { %v2155_v17 = vpop.xlane.xlu0 %2154 }
0x1136   :  { %v2159_v18 = vsub.f32 %v2151_v16, %v2155_v17 }
0x1137   :  { %v2158_v21 = vpop.xlane.xlu1 %2157 }
0x1138   :  { %v2161_v22 = vmul.f32 1.442695, %v2159_v18  ;;  %v2160_v25 = vsub.f32 %v2152_v15, %v2158_v21 }
0x113a   :  { %3751 = vpow2.f32 %v2161_v22  ;;  %v2163_v35 = vmul.f32 1.442695, %v2160_v25 }
0x113b   :  { %v2228_v26 = vpop.permute.xlu1 %2227 }
0x113c   :  { %3753 = vpow2.f32 %v2163_v35  ;;  %v2233_v27 = vsel %vm628_vm2, %v2228_v26, 0  ;;  %v3667_v35 = vld [vmem:[%s4583_s10 + $0xa4] ss:$8 sps:$4 sm:$0xff]   ;;  %v3665_v26 = vld [vmem:[%s4583_s10 + $0xa0] ss:$8 sps:$4 sm:$0xff]  }
0x113d   :  { %3474 = vmatpush3.bf16.msra.mxu1 %v2233_v27  ;;  %v3670_v27 = vld [vmem:[%s4583_s10 + $0xb4] ss:$8 sps:$4 sm:$0xff]  }
0x113e   :  { %3491 = vmatprep.subr.bf16.mxu1 %v3927_v4 }
0x1144   :  { %v3752_v39 = vpop.eup %3751 }
0x1145   :  { %v2165_v31 = vsel %vm600_vm3, %v3752_v39, 0.0 }
0x1146   :  { %v3754_v32 = vpop.eup %3753  ;;  %2166 = vadd.xlane.f32.xlu0 %v2165_v31  ;;  %v3673_v31 = vld [vmem:[%s4583_s10 + $0xc4] ss:$8 sps:$4 sm:$0xff]  }
0x1147   :  { %v2168_v6 = vsel %vm600_vm3, %v3754_v32, 0.0 }
0x114a   :  { %2169 = vadd.xlane.f32.xlu0 %v2168_v6  ;;  %v3676_v6 = vld [vmem:[%s4583_s10 + $0xd4] ss:$8 sps:$4 sm:$0xff]  }
0x1160   :  { %2178 = vrot.lane.b32.xlu0 %v4377_v54, %s4600_s29 }
0x11d3   :  { %v2167_v33 = vpop.xlane.xlu0 %2166 }
0x11d4   :  { %3755 = vrcp.f32 %v2167_v33  ;;  %v3674_v33 = vld [vmem:[%s4583_s10 + $0xd0] ss:$8 sps:$4 sm:$0xff]  }
0x11d7   :  { %v2170_v34 = vpop.xlane.xlu0 %2169 }
0x11d8   :  { %3757 = vrcp.f32 %v2170_v34  ;;  %v3679_v34 = vld [vmem:[%s4583_s10 + $0xe4] ss:$8 sps:$4 sm:$0xff]  }
0x11db   :  { %v2179_v36 = vpop.permute.xlu0 %2178 }
0x11dc   :  { %v2184_v37 = vsel %vm628_vm2, %v2179_v36, 0  ;;  %v3677_v36 = vld [vmem:[%s4583_s10 + $0xe0] ss:$8 sps:$4 sm:$0xff]  }
0x11dd   :  { %3468 = vmatpush3.bf16.msra.mxu0 %v2184_v37  ;;  %v3682_v37 = vld [vmem:[%s4583_s10 + $0xf4] ss:$8 sps:$4 sm:$0xff]  }
0x11de   :  { %v3756_v38 = vpop.eup %3755  ;;  %3479 = vmatprep.subr.bf16.mxu0 %v3927_v4 }
0x11df   :  { %v2173_v40 = vmul.f32 %v3756_v38, %v3752_v39  ;;  %v3668_v39 = vld [vmem:[%s4583_s10 + $0xb0] ss:$8 sps:$4 sm:$0xff]  }
0x11e0   :  { %v3680_v38 = vld [vmem:[%s4583_s10 + $0xf0] ss:$8 sps:$4 sm:$0xff]  }
0x11e1   :  { %v2175_v42 = vpack.c.bf16 %v2173_v40, %v2173_v40 }
0x11e2   :  { %v3758_v43 = vpop.eup %3757 }
0x11e3   :  { %v2174_v44 = vmul.f32 %v3758_v43, %v3754_v32  ;;  %3470 = vmatmul.mubr.msk.bf16.vlgmr.msra.gmra.mrb[40].mxu0 %vm600_vm3, %v2175_v42  ;;  %v3671_v32 = vld [vmem:[%s4583_s10 + $0xc0] ss:$8 sps:$4 sm:$0xff]  }
0x11e4   :  { %3480 = vmatpush3.bf16.msra.mxu0 %v3655_v41  ;;  %3487 = vmatprep.mubr.msk.bf16.mxu0 %vm3929_vm0, %v3927_v4 }
0x11e5   :  { %v2176_v54 = vpack.c.bf16 %v2174_v44, %v2174_v44  ;;  %3481 = vmatprep.subr.bf16.mxu0 %v3927_v4 }
0x11e7   :  { %3476 = vmatmul.mubr.msk.bf16.vlgmr.msra.gmra.mrb[48].mxu1 %vm600_vm3, %v2176_v54 }
0x11e8   :  { %3492 = vmatpush3.bf16.msra.mxu1 %v3651_v45  ;;  %3499 = vmatprep.mubr.msk.bf16.mxu1 %vm3929_vm0, %v3927_v4 }
0x11e9   :  { %3493 = vmatprep.subr.bf16.mxu1 %v3927_v4  ;;  %3482 = vmatpush3.bf16.msra.mxu0 %v3656_v23  ;;  %v3132_v23 = vld [vmem:[%s4581_s8 + $0x1] ss:$0 sm:$0xff] }
0x11ea   :  { %3483 = vmatprep.subr.bf16.mxu0 %v3927_v4 }
0x11ec   :  { %3494 = vmatpush3.bf16.msra.mxu1 %v3652_v24 }
0x11ed   :  { %3495 = vmatprep.subr.bf16.mxu1 %v3927_v4  ;;  %3484 = vmatpush3.bf16.msra.mxu0 %v3657_v50 }
0x11ee   :  { %3485 = vmatprep.subr.bf16.mxu0 %v3927_v4 }
0x11f0   :  { %3496 = vmatpush3.bf16.msra.mxu1 %v3653_v47 }
0x11f1   :  { %3497 = vmatprep.subr.bf16.mxu1 %v3927_v4  ;;  %3486 = vmatpush3.bf16.msra.mxu0 %v3658_v51  ;;  %v3133_v51 = vld [vmem:[%s4582_s9 + $0x1] ss:$0 sm:$0xff] }
0x11f2   :  { %2577 = vmatprep.subr.bf16.mxu0 %v3661_v13 }
0x11f4   :  { %3498 = vmatpush3.bf16.msra.mxu1 %v3654_v48 }
0x11f7   :  { %3500 = vmatmul.mubr.msk.bf16.vlgmr.msra.gmra.mrb[52].mxu1 %vm493_vm1, %v2044_v19 }
0x12b6   :  { %v2220_v49 = vpop.f32.mrb[40].mxu0 }
0x12b7   :  { %v3471_v52 = vpop.f32.mrb[41].mxu0 }
0x12b8   :  { %v2223_v53 = vpop.f32.mrb[42].mxu0 }
0x12b9   :  { %v3472_v56 = vpop.f32.mrb[43].mxu0 }
0x12ba   :  { %v2269_v58 = vpop.f32.mrb[48].mxu1 }
0x12bb   :  { %v2275_v61 = vpack.c.bf16 %v2269_v58, %v2220_v49  ;;  %v3477_v62 = vpop.f32.mrb[49].mxu1  ;;  %v3683_v58 = vld [vmem:[#allocation6 + $0xc0] sm:$0xff]  }
0x12bc   :  { %v2272_v29 = vpop.f32.mrb[50].mxu1  ;;  %3288 = vmatprep.subr.bf16.mxu1 %v3683_v58  ;;  %v3685_v62 = vld [vmem:[#allocation6 + $0xc8] sm:$0xff]  }
0x12bd   :  { %v3478_v63 = vpop.f32.mrb[51].mxu1  ;;  %3488 = vmatmul.mubr.msk.bf16.vlgmr.msra.gmra.mrb[44].mxu0 %vm493_vm1, %v2275_v61  ;;  %v3684_v61 = vld [vmem:[#allocation6 + $0x80] sm:$0xff]   ;;  %v3686_v29 = vld [vmem:[#allocation6 + $0x88] sm:$0xff]  }
0x12be   :  { %2609 = vmatprep.mubr.bf16.mxu0 %v3928_v30  ;;  %2578 = vmatpush1.bf16.msra.mxu0 %v3659_v12  ;;  %v3687_v63 = vld [vmem:[#allocation6 + $0xd0] sm:$0xff]  }
0x12bf   :  { %2579 = vmatprep.subr.bf16.mxu0 %v3664_v14  ;;  %3289 = vmatpush3.bf16.msra.mxu1 %v3684_v61 }
0x12c0   :  { %3290 = vmatprep.subr.bf16.mxu1 %v3685_v62 }
0x12c3   :  { %3291 = vmatpush3.bf16.msra.mxu1 %v3686_v29 }
0x12c4   :  { %3292 = vmatprep.subr.bf16.mxu1 %v3687_v63 }
0x12ca   :  { %v2405_v60 = vpop.f32.mrb[52].mxu1 }
0x12cb   :  { %v3501_v28 = vpop.f32.mrb[53].mxu1 }
0x12cc   :  { %v2408_v19 = vpop.f32.mrb[54].mxu1  ;;  %v3689_v28 = vld [vmem:[#allocation6 + $0xd8] sm:$0xff]  }
0x12cd   :  { %v3502_v0 = vpop.f32.mrb[55].mxu1 }
0x12ce   :  { %v3691_v0 = vld [vmem:[#allocation6 + $0xe0] sm:$0xff]  }
0x1390   :  { %v2337_v1 = vpop.f32.mrb[44].mxu0 }
0x1391   :  { %v2406_v3 = vadd.f32 %v2405_v60, %v2337_v1  ;;  %v3489_v57 = vpop.f32.mrb[45].mxu0  ;;  %v3688_v60 = vld [vmem:[#allocation6 + $0x90] sm:$0xff]   ;;  %v3692_v1 = vld [vmem:[#allocation6 + $0xa0] sm:$0xff]  }
0x1392   :  { %v2340_v5 = vpop.f32.mrb[46].mxu0  ;;  %3293 = vmatpush3.bf16.msra.mxu1 %v3688_v60  ;;  %v3695_v57 = vld [vmem:[#allocation6 + $0xf0] sm:$0xff]   ;;  %v3168_v60 = vld [vmem:[%s4586_s13 + $0x1] ss:$0 sm:$0xff] }
0x1393   :  { %v2420_v7 = vadd.f32 %v3129_v2, %v2406_v3  ;;  %v2409_v9 = vadd.f32 %v2408_v19, %v2340_v5  ;;  %v3490_v10 = vpop.f32.mrb[47].mxu0  ;;  %v3690_v19 = vld [vmem:[#allocation6 + $0x98] sm:$0xff]   ;;  %3294 = vmatprep.subr.bf16.mxu1 %v3689_v28  ;;  %v3694_v3 = vld [vmem:[#allocation6 + $0xa8] sm:$0xff]   ;;  %v3696_v5 = vld [vmem:[#allocation6 + $0xb0] sm:$0xff]  }
0x1394   :  { %v3150_v10 = vld [vmem:[%s4584_s11 + $0x2] sm:$0x3] }
0x1395   :  { %v2421_v11 = vadd.f32 %v3129_v2, %v2409_v9  ;;  %v2422_v16 = vadd.f32 %v2420_v7, %v4357_v46  ;;  %v3662_v46 = vld [vmem:[%s4583_s10 + $0x90] ss:$8 sps:$4 sm:$0xff]   ;;  %v3693_v2 = vld [vmem:[#allocation6 + $0xe8] sm:$0xff]  }
0x1396   :  { %2580 = vmatpush1.bf16.msra.mxu0 %v3662_v46  ;;  %3295 = vmatpush3.bf16.msra.mxu1 %v3690_v19  ;;  %v3697_v7 = vld [vmem:[#allocation6 + $0xf8] sm:$0xff]  }
0x1397   :  { %2428 = vadd.xlane.f32.xlu1 %v2422_v16  ;;  %v2423_v30 = vadd.f32 %v2421_v11, %v4359_v20  ;;  %2581 = vmatprep.subr.bf16.mxu0 %v3667_v35  ;;  %v3698_v9 = vld [vmem:[#allocation6 + $0xb8] sm:$0xff]   ;;  %v2490_v11 = vrot.slane %v3150_v10, %v4166_v59 }
0x1398   :  { %3296 = vmatprep.subr.bf16.mxu1 %v3691_v0 }
0x1399   :  { %2430 = vadd.xlane.f32.xlu0 %v2423_v30 }
0x139a   :  { %2582 = vmatpush1.bf16.msra.mxu0 %v3665_v26  ;;  %3297 = vmatpush3.bf16.msra.mxu1 %v3692_v1 }
0x139b   :  { %2583 = vmatprep.subr.bf16.mxu0 %v3670_v27  ;;  %3298 = vmatprep.subr.bf16.mxu1 %v3693_v2 }
0x139e   :  { %2584 = vmatpush1.bf16.msra.mxu0 %v3668_v39  ;;  %3299 = vmatpush3.bf16.msra.mxu1 %v3694_v3 }
0x139f   :  { %2585 = vmatprep.subr.bf16.mxu0 %v3673_v31  ;;  %3300 = vmatprep.subr.bf16.mxu1 %v3695_v57 }
0x13a2   :  { %2586 = vmatpush1.bf16.msra.mxu0 %v3671_v32  ;;  %3301 = vmatpush3.bf16.msra.mxu1 %v3696_v5 }
0x13a3   :  { %2587 = vmatprep.subr.bf16.mxu0 %v3676_v6  ;;  %3302 = vmatprep.subr.bf16.mxu1 %v3697_v7 }
0x13a6   :  { %2588 = vmatpush1.bf16.msra.mxu0 %v3674_v33  ;;  %3303 = vmatpush3.bf16.msra.mxu1 %v3698_v9  ;;  %v3699_v9 = vld [vmem:[%s4589_s16] sm:$0xff]  }
0x13a7   :  { %2589 = vmatprep.subr.bf16.mxu0 %v3679_v34 }
0x13aa   :  { %2590 = vmatpush1.bf16.msra.mxu0 %v3677_v36 }
0x13ab   :  { %2591 = vmatprep.subr.bf16.mxu0 %v3682_v37 }
0x13ae   :  { %2592 = vmatpush1.bf16.msra.mxu0 %v3680_v38 }
0x13af   :  { %3503 = vmatprep.subr.bf16.mxu0 %v3927_v4 }
0x1424   :  { %v2429_v20 = vpop.xlane.xlu1 %2428 }
0x1425   :  { %v2432_v15 = vmul.f32 0.0078125, %v2429_v20 }
0x1426   :  { %v2431_v8 = vpop.xlane.xlu0 %2430 }
0x1427   :  { %v2434_v17 = vsub.f32 %v2422_v16, %v2432_v15  ;;  %v2433_v18 = vmul.f32 0.0078125, %v2431_v8  ;;  %v2494_v16 = vrot.slane %v3150_v10, %v4158_v55  ;;  %v3700_v10 = vld [vmem:[%s4589_s16 + $0x8] sm:$0xff]  }
0x1429   :  { %v2435_v21 = vsub.f32 %v2423_v30, %v2433_v18  ;;  %v2436_v22 = vmul.f32 %v2434_v17, %v2434_v17 }
0x142b   :  { %2438 = vadd.xlane.f32.xlu0 %v2436_v22  ;;  %v2437_v25 = vmul.f32 %v2435_v21, %v2435_v21 }
0x142d   :  { %2440 = vadd.xlane.f32.xlu1 %v2437_v25 }
0x14b8   :  { %v2439_v40 = vpop.xlane.xlu0 %2438 }
0x14b9   :  { %v2442_v41 = vmul.f32 0.0078125, %v2439_v40 }
0x14ba   :  { %v2441_v42 = vpop.xlane.xlu1 %2440 }
0x14bb   :  { %v2444_v43 = vadd.f32 1e-12, %v2442_v41  ;;  %v2443_v44 = vmul.f32 0.0078125, %v2441_v42 }
0x14bd   :  { %3759 = vrsqrt.f32 %v2444_v43  ;;  %v2445_v45 = vadd.f32 1e-12, %v2443_v44 }
0x14bf   :  { %3761 = vrsqrt.f32 %v2445_v45 }
0x14c7   :  { %v3760_v54 = vpop.eup %3759 }
0x14c8   :  { %v2448_v24 = vmul.f32 %v3760_v54, %v2434_v17 }
0x14c9   :  { %v3762_v47 = vpop.eup %3761 }
0x14ca   :  { %v2449_v48 = vmul.f32 %v3762_v47, %v2435_v21  ;;  %v2456_v50 = vmul.f32 %v3132_v23, %v2448_v24 }
0x14cc   :  { %v2457_v49 = vmul.f32 %v3132_v23, %v2449_v48  ;;  %v4518_v52 = vadd.f32 %v3133_v51, %v2456_v50 }
0x14ce   :  { %v4520_v53 = vadd.f32 %v3133_v51, %v2457_v49 }
0x14d0   :  { %v2466_v56 = vpack.c.bf16 %v4520_v53, %v4518_v52 }
0x14d2   :  { %2610 = vmatmul.mubr.bf16.vlgmr.msra.gmra.mrb[48].mxu0 %v2466_v56 }
0x14d3   :  { %3519 = vmatprep.mubr.msk.bf16.mxu0 %vm3929_vm0, %v3927_v4  ;;  %3504 = vmatpush3.bf16.msra.mxu0 %v3699_v9 }
0x14d4   :  { %3505 = vmatprep.subr.bf16.mxu0 %v3927_v4 }
0x14d7   :  { %3506 = vmatpush3.bf16.msra.mxu0 %v3700_v10 }
0x14d8   :  { %3507 = vmatprep.subr.bf16.mxu0 %v3927_v4 }
0x15a5   :  { %v2611_v30 = vpop.f32.mrb[48].mxu0 }
0x15a6   :  { %v2612_v12 = vadd.f32 %v2611_v30, %v2490_v11  ;;  %v2613_v13 = vpop.f32.mrb[49].mxu0 }
0x15a7   :  { %v2614_v14 = vadd.f32 %v2613_v13, %v2494_v16  ;;  %v2615_v46 = vpop.f32.mrb[50].mxu0 }
0x15a8   :  { %v2624_v20 = vmul.f32 0.044715, %v2612_v12  ;;  %v2616_v15 = vadd.f32 %v2615_v46, %v2490_v11  ;;  %v2617_v8 = vpop.f32.mrb[51].mxu0  ;;  %v2620_v23 = vmul.f32 0.5, %v2612_v12  ;;  %v3701_v46 = vld [vmem:[%s4589_s16 + $0x10] sm:$0xff]  }
0x15a9   :  { %v2625_v17 = vmul.f32 0.044715, %v2614_v14  ;;  %v2618_v18 = vadd.f32 %v2617_v8, %v2494_v16  ;;  %v2621_v48 = vmul.f32 0.5, %v2614_v14  ;;  %3508 = vmatpush3.bf16.msra.mxu0 %v3701_v46  ;;  %v3704_v8 = vld [vmem:[%s4589_s16 + $0x28] sm:$0xff]  }
0x15aa   :  { %v2628_v21 = vmul.f32 %v2624_v20, %v2612_v12  ;;  %v2626_v22 = vmul.f32 0.044715, %v2616_v15  ;;  %v2622_v24 = vmul.f32 0.5, %v2616_v15  ;;  %3509 = vmatprep.subr.bf16.mxu0 %v3927_v4  ;;  %v3702_v20 = vld [vmem:[%s4589_s16 + $0x18] sm:$0xff]  }
0x15ab   :  { %v2629_v25 = vmul.f32 %v2625_v17, %v2614_v14  ;;  %v2627_v35 = vmul.f32 0.044715, %v2618_v18  ;;  %v2623_v50 = vmul.f32 0.5, %v2618_v18  ;;  %v3705_v17 = vld [vmem:[%s4589_s16 + $0x30] sm:$0xff]  }
0x15ac   :  { %v2632_v26 = vmul.f32 %v2628_v21, %v2612_v12  ;;  %v2630_v27 = vmul.f32 %v2626_v22, %v2616_v15 }
0x15ad   :  { %v2633_v39 = vmul.f32 %v2629_v25, %v2614_v14  ;;  %v2631_v59 = vmul.f32 %v2627_v35, %v2618_v18  ;;  %3510 = vmatpush3.bf16.msra.mxu0 %v3702_v20 }
0x15ae   :  { %v2636_v31 = vadd.f32 %v2632_v26, %v2612_v12  ;;  %v2634_v55 = vmul.f32 %v2630_v27, %v2616_v15  ;;  %3511 = vmatprep.subr.bf16.mxu0 %v3927_v4 }
0x15af   :  { %v2635_v32 = vmul.f32 %v2631_v59, %v2618_v18  ;;  %v2637_v6 = vadd.f32 %v2633_v39, %v2614_v14  ;;  %v3185_v59 = vld [vmem:[#allocation7 + $0x1] ss:$0 sm:$0xff] }
0x15b0   :  { %v2640_v33 = vmul.f32 0.7978846, %v2636_v31  ;;  %v2638_v34 = vadd.f32 %v2634_v55, %v2616_v15  ;;  %v3703_v15 = vld [vmem:[%s4589_s16 + $0x20] sm:$0xff]  }
0x15b1   :  { %v2639_v36 = vadd.f32 %v2635_v32, %v2618_v18  ;;  %v2641_v37 = vmul.f32 0.7978846, %v2637_v6  ;;  %3512 = vmatpush3.bf16.msra.mxu0 %v3703_v15  ;;  %v3706_v18 = vld [vmem:[%s4589_s16 + $0x38] sm:$0xff]  }
0x15b2   :  { %3763 = vtanh.f32 %v2640_v33  ;;  %v2642_v38 = vmul.f32 0.7978846, %v2638_v34  ;;  %3513 = vmatprep.subr.bf16.mxu0 %v3927_v4  ;;  %v3186_v33 = vld [vmem:[#allocation9 + $0x1] ss:$0 sm:$0xff] }
0x15b3   :  { %v2643_v40 = vmul.f32 0.7978846, %v2639_v36  ;;  %3765 = vtanh.f32 %v2641_v37 }
0x15b4   :  { %3767 = vtanh.f32 %v2642_v38  ;;  %v3187_v38 = vld [vmem:[#allocation10] ss:$0 sm:$0xff] }
0x15b5   :  { %3769 = vtanh.f32 %v2643_v40  ;;  %3514 = vmatpush3.bf16.msra.mxu0 %v3704_v8 }
0x15b6   :  { %3515 = vmatprep.subr.bf16.mxu0 %v3927_v4 }
0x15b9   :  { %3516 = vmatpush3.bf16.msra.mxu0 %v3705_v17 }
0x15ba   :  { %3517 = vmatprep.subr.bf16.mxu0 %v3927_v4 }
0x15bc   :  { %v3764_v41 = vpop.eup %3763 }
0x15bd   :  { %v3766_v42 = vpop.eup %3765  ;;  %v2648_v43 = vadd.f32 1.0, %v3764_v41  ;;  %3518 = vmatpush3.bf16.msra.mxu0 %v3706_v18 }
0x15be   :  { %v3768_v44 = vpop.eup %3767  ;;  %v2649_v45 = vadd.f32 1.0, %v3766_v42 }
0x15bf   :  { %v3770_v54 = vpop.eup %3769  ;;  %v2650_v47 = vadd.f32 1.0, %v3768_v44  ;;  %v2652_v49 = vmul.f32 %v2648_v43, %v2620_v23 }
0x15c0   :  { %v2651_v51 = vadd.f32 1.0, %v3770_v54  ;;  %v2653_v58 = vmul.f32 %v2649_v45, %v2621_v48 }
0x15c1   :  { %v2654_v56 = vmul.f32 %v2650_v47, %v2622_v24 }
0x15c2   :  { %v2655_v61 = vmul.f32 %v2651_v51, %v2623_v50 }
0x15c3   :  { %v2656_v62 = vpack.c.bf16 %v2654_v56, %v2652_v49 }
0x15c4   :  { %v2657_v29 = vpack.c.bf16 %v2655_v61, %v2653_v58 }
0x15c6   :  { %2827 = vmatprep.mubr.bf16.mxu1 %v2657_v29 }
0x15c7   :  { %2828 = vmatmul.mubr.bf16.vlgmr.msra.gmra.mrb[56].mxu1 %v2656_v62 }
0x169a   :  { %v3304_v63 = vpop.f32.mrb[56].mxu1 }
0x169b   :  { %v3305_v28 = vpop.f32.mrb[57].mxu1 }
0x169c   :  { %v3306_v19 = vadd.f32 %v3305_v28, %v3304_v63  ;;  %v3307_v0 = vpop.f32.mrb[58].mxu1 }
0x169d   :  { %v3308_v1 = vpop.f32.mrb[59].mxu1 }
0x169e   :  { %v2830_v2 = vadd.f32 %v3306_v19, %v3168_v60  ;;  %v3309_v3 = vadd.f32 %v3308_v1, %v3307_v0 }
0x16a0   :  { %v2833_v57 = vadd.f32 %v3309_v3, %v3168_v60  ;;  %v2836_v5 = vadd.f32 %v2830_v2, %v4518_v52 }
0x16a2   :  { %2842 = vadd.xlane.f32.xlu0 %v2836_v5  ;;  %v2837_v7 = vadd.f32 %v2833_v57, %v4520_v53 }
0x16a4   :  { %2844 = vadd.xlane.f32.xlu1 %v2837_v7 }
0x172f   :  { %v2843_v11 = vpop.xlane.xlu0 %2842 }
0x1730   :  { %v2846_v52 = vmul.f32 0.0078125, %v2843_v11 }
0x1731   :  { %v2845_v16 = vpop.xlane.xlu1 %2844 }
0x1732   :  { %v2848_v30 = vsub.f32 %v2836_v5, %v2846_v52  ;;  %v2847_v53 = vmul.f32 0.0078125, %v2845_v16 }
0x1734   :  { %v2849_v12 = vsub.f32 %v2837_v7, %v2847_v53  ;;  %v2850_v13 = vmul.f32 %v2848_v30, %v2848_v30 }
0x1736   :  { %2852 = vadd.xlane.f32.xlu0 %v2850_v13  ;;  %v2851_v14 = vmul.f32 %v2849_v12, %v2849_v12 }
0x1738   :  { %2854 = vadd.xlane.f32.xlu1 %v2851_v14 }
0x17c3   :  { %v2853_v21 = vpop.xlane.xlu0 %2852 }
0x17c4   :  { %v2856_v22 = vmul.f32 0.0078125, %v2853_v21 }
0x17c5   :  { %v2855_v25 = vpop.xlane.xlu1 %2854 }
0x17c6   :  { %v2858_v35 = vadd.f32 1e-12, %v2856_v22  ;;  %v2857_v26 = vmul.f32 0.0078125, %v2855_v25 }
0x17c8   :  { %3771 = vrsqrt.f32 %v2858_v35  ;;  %v2859_v27 = vadd.f32 1e-12, %v2857_v26 }
0x17ca   :  { %3773 = vrsqrt.f32 %v2859_v27 }
0x17d2   :  { %v3772_v39 = vpop.eup %3771 }
0x17d3   :  { %v2862_v31 = vmul.f32 %v3772_v39, %v2848_v30 }
0x17d4   :  { %v3774_v55 = vpop.eup %3773 }
0x17d5   :  { %v2863_v32 = vmul.f32 %v3774_v55, %v2849_v12  ;;  %v2870_v6 = vmul.f32 %v3185_v59, %v2862_v31 }
0x17d7   :  { %v2871_v34 = vmul.f32 %v3185_v59, %v2863_v32  ;;  %v2878_v36 = vadd.f32 %v3186_v33, %v2870_v6 }
0x17d9   :  { %v2879_v37 = vadd.f32 %v3186_v33, %v2871_v34 }
0x17db   :  { %v2880_v4 = vpack.c.bf16 %v2879_v37, %v2878_v36 }
0x17dd   :  { %3520 = vmatmul.mubr.bf16.vlgmr.msra.gmra.mrb[52].mxu0 %v2880_v4 }
0x18b0   :  { %v2986_v40 = vpop.f32.mrb[52].mxu0 }
0x18b1   :  { %v2987_v41 = vadd.f32 %v3187_v38, %v2986_v40  ;;  %v3521_v42 = vpop.f32.mrb[53].mxu0 }
0x18b2   :  { %v2989_v43 = vpop.f32.mrb[54].mxu0 }
0x18b3   :  { %2993 = vst [vmem:[%s4591_s18] sm:$0xff] %v2987_v41  ;;  %v2990_v44 = vadd.f32 %v3187_v38, %v2989_v43  ;;  %v3522_v45 = vpop.f32.mrb[55].mxu0 }
0x18b5   :  { %2994 = vst [vmem:[%s4591_s18 + $0x8] sm:$0xff] %v2990_v44 }
0x18b6   :  { %2999 = vsyncpa [#allocation3], 1 }
0x18b7   :  { %3000 = vsyncpa [#allocation5], 1 }
0x18b8   :  { %3001 = vsyncpa [#allocation8], 1 }
0x18b9   :  { %3002 = vsyncpa [#allocation11], 1 }

// kernel: stacked_bert_with_crf_forward.3
= control target key start
LH: loop header
LB: loop body
LE: loop exit
PB: predicated region body
PF: predicated region fallthrough
CT: control target
= control target key end

     0   :  { %v3762_v3 = vmov 0.0   ;;  %v3763_v30 = vmov 0   ;;  %vm3764_vm0 = vmmov 0   ;;  %v110_v53 = vlaneseq  ;;  %s4628_s0 = inlined_call_operand.vmem [shape: f32[16,128], index: 0, kind: input, shape index: {}]   ;;  %s4629_s4 = inlined_call_operand.vmem [shape: bf16[2,128,384], index: 4, kind: input, shape index: {}]   ;;  %s4630_s2 = inlined_call_operand.vmem [shape: f32[1,128], index: 2, kind: input, shape index: {}]   ;;  %s4631_s3 = inlined_call_operand.vmem [shape: f32[1,128], index: 3, kind: input, shape index: {}]   ;;  %s4632_s5 = inlined_call_operand.vmem [shape: f32[2,1,384], index: 5, kind: input, shape index: {}]   ;;  %s4633_s1 = inlined_call_operand.vmem [shape: f32[2,8], index: 1, kind: input, shape index: {}]   ;;  %s4634_s6 = inlined_call_operand.vmem [shape: bf16[2,128,128], index: 6, kind: input, shape index: {}]   ;;  %s4635_s7 = inlined_call_operand.vmem [shape: f32[2,1,128], index: 7, kind: input, shape index: {}]   ;;  %s4636_s10 = inlined_call_operand.vmem [shape: bf16[2,128,256], index: 10, kind: input, shape index: {}]   ;;  %s4637_s8 = inlined_call_operand.vmem [shape: f32[2,1,128], index: 8, kind: input, shape index: {}]   ;;  %s4638_s9 = inlined_call_operand.vmem [shape: f32[2,1,128], index: 9, kind: input, shape index: {}]   ;;  %s4639_s12 = inlined_call_operand.vmem [shape: bf16[2,256,128], index: 12, kind: input, shape index: {}]   ;;  %s4640_s11 = inlined_call_operand.vmem [shape: f32[2,1,256], index: 11, kind: input, shape index: {}]   ;;  %s4641_s13 = inlined_call_operand.vmem [shape: f32[2,1,128], index: 13, kind: input, shape index: {}]   ;;  %s4642_s14 = inlined_call_operand.vmem [shape: f32[2,1,128], index: 14, kind: input, shape index: {}]   ;;  %s4643_s15 = inlined_call_operand.vmem [shape: f32[2,1,128], index: 15, kind: input, shape index: {}]   ;;  %s4644_s16 = inlined_call_operand.vmem [shape: bf16[128,128], index: 16, kind: input, shape index: {}]   ;;  %s4645_s17 = inlined_call_operand.vmem [shape: f32[1,128], index: 17, kind: input, shape index: {}]   ;;  %s4646_s18 = inlined_call_operand.vmem [shape: f32[16,128], index: 18, kind: output, shape index: {}]  }
   0x1   :  { %4649 = sst [smem:[#allocation2_spill]] %s4628_s0  ;;  %3317 = vmatprep.subr.bf16.mxu1 %v3762_v3  ;;  %339 = vmatprep.mubr.bf16.mxu0 %v3763_v30  ;;  %v2920_v48 = vld [vmem:[%s4631_s3] ss:$0 sm:$0xff]  ;;  %vm413_vm1 = vcmask 523264   ;;  %vm548_vm2 = vcmask 1043456   ;;  %vm520_vm3 = vcmask 64512  }
   0x2   :  { %4650 = sst [smem:[#allocation3_spill]] %s4629_s4  ;;  %s4652_s29 = sld [smem:[#allocation2_spill]]  ;;  %3333 = vmatprep.mubr.msk.bf16.mxu1 %vm3764_vm0, %v3762_v3  ;;  %v3979_v54 = vshrl.u32 %v110_v53, 7  ;;  %v162_v56 = vld [vmem:[%s4632_s5] sm:$0x7] }
   0x3   :  { %4651 = sst [smem:[#allocation4_spill]] %s4630_s2  ;;  %s4653_s20 = sld [smem:[#allocation3_spill]] }
   0x4   :  { %s4654_s26 = sld [smem:[#allocation4_spill]]  ;;  %v3982_v55 = vsub.s32 1, %v3979_v54  ;;  %v174_v57 = vsub.s32 2, %v3979_v54  ;;  %v3990_v59 = vsub.s32 0, %v3979_v54 }
   0x6   :  { %v171_v58 = vrot.slane %v162_v56, %v3982_v55 }
   0x8   :  { %v60_v0 = vld [vmem:[%s4652_s29] sm:$0xff]  ;;  %v61_v1 = vld [vmem:[%s4652_s29 + $0x8] sm:$0xff] }
   0x9   :  { %64 = vadd.xlane.f32.xlu0 %v60_v0  ;;  %v3526_v2 = vld [vmem:[%s4653_s20 + $0x4] ss:$12 sps:$4 sm:$0xff]   ;;  %v3528_v4 = vld [vmem:[%s4653_s20] ss:$12 sps:$4 sm:$0xff]   ;;  %v3529_v5 = vld [vmem:[%s4653_s20 + $0x8] ss:$12 sps:$4 sm:$0xff]  }
   0xa   :  { %307 = vmatprep.subr.bf16.mxu0 %v3526_v2  ;;  %v3530_v6 = vld [vmem:[%s4653_s20 + $0x1c] ss:$12 sps:$4 sm:$0xff]   ;;  %3318 = vmatpush3.bf16.msra.mxu1 %v3529_v5  ;;  %v3532_v15 = vld [vmem:[%s4653_s20 + $0x18] ss:$12 sps:$4 sm:$0xff]   ;;  %v3533_v16 = vld [vmem:[%s4653_s20 + $0x20] ss:$12 sps:$4 sm:$0xff]  }
   0xb   :  { %308 = vmatpush1.bf16.msra.mxu0 %v3528_v4  ;;  %3319 = vmatprep.subr.bf16.mxu1 %v3762_v3  ;;  %v3534_v17 = vld [vmem:[%s4653_s20 + $0x34] ss:$12 sps:$4 sm:$0xff]   ;;  %v3536_v18 = vld [vmem:[%s4653_s20 + $0x30] ss:$12 sps:$4 sm:$0xff]   ;;  %v3537_v19 = vld [vmem:[%s4653_s20 + $0x38] ss:$12 sps:$4 sm:$0xff]  }
   0xc   :  { %309 = vmatprep.subr.bf16.mxu0 %v3530_v6  ;;  %v3538_v20 = vld [vmem:[%s4653_s20 + $0x4c] ss:$12 sps:$4 sm:$0xff]   ;;  %v3540_v21 = vld [vmem:[%s4653_s20 + $0x48] ss:$12 sps:$4 sm:$0xff]   ;;  %v3541_v22 = vld [vmem:[%s4653_s20 + $0x50] ss:$12 sps:$4 sm:$0xff]  }
   0xd   :  { %66 = vadd.xlane.f32.xlu0 %v61_v1  ;;  %v3542_v23 = vld [vmem:[%s4653_s20 + $0x64] ss:$12 sps:$4 sm:$0xff]   ;;  %v3544_v24 = vld [vmem:[%s4653_s20 + $0x60] ss:$12 sps:$4 sm:$0xff]   ;;  %v3545_v25 = vld [vmem:[%s4653_s20 + $0x68] ss:$12 sps:$4 sm:$0xff]  }
   0xe   :  { %3320 = vmatpush3.bf16.msra.mxu1 %v3533_v16  ;;  %v3546_v26 = vld [vmem:[%s4653_s20 + $0x7c] ss:$12 sps:$4 sm:$0xff]   ;;  %v3548_v27 = vld [vmem:[%s4653_s20 + $0x78] ss:$12 sps:$4 sm:$0xff]   ;;  %v3549_v28 = vld [vmem:[%s4653_s20 + $0x80] ss:$12 sps:$4 sm:$0xff]  }
   0xf   :  { %310 = vmatpush1.bf16.msra.mxu0 %v3532_v15  ;;  %3321 = vmatprep.subr.bf16.mxu1 %v3762_v3  ;;  %v3550_v29 = vld [vmem:[%s4653_s20 + $0x94] ss:$12 sps:$4 sm:$0xff]   ;;  %v3552_v31 = vld [vmem:[%s4653_s20 + $0x90] ss:$12 sps:$4 sm:$0xff]   ;;  %v3553_v32 = vld [vmem:[%s4653_s20 + $0x98] ss:$12 sps:$4 sm:$0xff]  }
  0x10   :  { %311 = vmatprep.subr.bf16.mxu0 %v3534_v17  ;;  %v3554_v33 = vld [vmem:[%s4653_s20 + $0xac] ss:$12 sps:$4 sm:$0xff]   ;;  %v3556_v34 = vld [vmem:[%s4653_s20 + $0xa8] ss:$12 sps:$4 sm:$0xff]   ;;  %v3557_v35 = vld [vmem:[%s4653_s20 + $0xb0] ss:$12 sps:$4 sm:$0xff]  }
  0x11   :  { %v2919_v44 = vld [vmem:[%s4654_s26] ss:$0 sm:$0xff] }
  0x12   :  { %3322 = vmatpush3.bf16.msra.mxu1 %v3537_v19 }
  0x13   :  { %312 = vmatpush1.bf16.msra.mxu0 %v3536_v18  ;;  %3323 = vmatprep.subr.bf16.mxu1 %v3762_v3 }
  0x14   :  { %313 = vmatprep.subr.bf16.mxu0 %v3538_v20 }
  0x16   :  { %3324 = vmatpush3.bf16.msra.mxu1 %v3541_v22 }
  0x17   :  { %314 = vmatpush1.bf16.msra.mxu0 %v3540_v21  ;;  %3325 = vmatprep.subr.bf16.mxu1 %v3762_v3 }
  0x18   :  { %315 = vmatprep.subr.bf16.mxu0 %v3542_v23  ;;  %v3765_v23 = vmov 1966171168  }
  0x1a   :  { %3326 = vmatpush3.bf16.msra.mxu1 %v3545_v25  ;;  %v103_v25 = vld [vmem:[%s4633_s1] sm:$0x3]  ;;  %s3766_s1 = smov 64  }
  0x1b   :  { %316 = vmatpush1.bf16.msra.mxu0 %v3544_v24  ;;  %3327 = vmatprep.subr.bf16.mxu1 %v3762_v3  ;;  %v108_v24 = vunpack.c.l.s4 %v3765_v23 }
  0x1c   :  { %317 = vmatprep.subr.bf16.mxu0 %v3546_v26  ;;  %v104_v26 = vsub.f32 1.0, %v103_v25 }
  0x1e   :  { %3328 = vmatpush3.bf16.msra.mxu1 %v3549_v28  ;;  %v105_v28 = vmul.f32 -1e+09, %v104_v26 }
  0x1f   :  { %318 = vmatpush1.bf16.msra.mxu0 %v3548_v27  ;;  %3329 = vmatprep.subr.bf16.mxu1 %v3762_v3  ;;  %v109_v27 = vunpack.c.0.s8 %v108_v24 }
  0x20   :  { %319 = vmatprep.subr.bf16.mxu0 %v3550_v29 }
  0x21   :  { %v112_v29 = vsub.s32 %v109_v27, %v3979_v54 }
  0x22   :  { %3330 = vmatpush3.bf16.msra.mxu1 %v3553_v32 }
  0x23   :  { %320 = vmatpush1.bf16.msra.mxu0 %v3552_v31  ;;  %3331 = vmatprep.subr.bf16.mxu1 %v3762_v3  ;;  %v113_v31 = vrot.slane %v105_v28, %v112_v29 }
  0x24   :  { %321 = vmatprep.subr.bf16.mxu0 %v3554_v33 }
  0x25   :  { %v114_v32 = vcombine.high %v113_v31, %v113_v31  ;;  %v121_v33 = vrot.slane %v113_v31, %v112_v29 }
  0x26   :  { %3332 = vmatpush3.bf16.msra.mxu1 %v3557_v35 }
  0x27   :  { %322 = vmatpush1.bf16.msra.mxu0 %v3556_v34  ;;  %3343 = vmatprep.subr.bf16.mxu1 %v3762_v3  ;;  %v128_v34 = vrot.slane %v114_v32, %v112_v29  ;;  %v4023_v35 = vrot.slane %v121_v33, %v3990_v59 }
  0x28   :  { %3337 = vmatprep.subr.bf16.mxu0 %v3762_v3 }
  0x96   :  { %v65_v7 = vpop.xlane.xlu0 %64 }
  0x97   :  { %v69_v8 = vmul.f32 0.0078125, %v65_v7  ;;  %v167_v7 = vrot.slane %v162_v56, %v3990_v59 }
  0x99   :  { %v3882_v9 = vsub.f32 %v60_v0, %v69_v8  ;;  %v175_v0 = vrot.slane %v162_v56, %v174_v57 }
  0x9a   :  { %v67_v10 = vpop.xlane.xlu0 %66 }
  0x9b   :  { %v70_v11 = vmul.f32 0.0078125, %v67_v10  ;;  %v73_v12 = vmul.f32 %v3882_v9, %v3882_v9 }
  0x9d   :  { %v3886_v13 = vsub.f32 %v61_v1, %v70_v11  ;;  %75 = vadd.xlane.f32.xlu1 %v73_v12 }
  0x9f   :  { %v74_v14 = vmul.f32 %v3886_v13, %v3886_v13 }
  0xa1   :  { %77 = vadd.xlane.f32.xlu1 %v74_v14 }
 0x12a   :  { %v76_v36 = vpop.xlane.xlu1 %75 }
 0x12b   :  { %v79_v37 = vmul.f32 0.0078125, %v76_v36 }
 0x12d   :  { %v81_v38 = vadd.f32 1e-12, %v79_v37 }
 0x12e   :  { %v78_v39 = vpop.xlane.xlu1 %77 }
 0x12f   :  { %3694 = vrsqrt.f32 %v81_v38  ;;  %v80_v40 = vmul.f32 0.0078125, %v78_v39  ;;  %v4026_v39 = vrot.slane %v128_v34, %v3990_v59 }
 0x131   :  { %v82_v41 = vadd.f32 1e-12, %v80_v40 }
 0x133   :  { %3696 = vrsqrt.f32 %v82_v41 }
 0x139   :  { %v3695_v42 = vpop.eup %3694 }
 0x13a   :  { %v85_v43 = vmul.f32 %v3695_v42, %v3882_v9 }
 0x13c   :  { %v93_v47 = vmul.f32 %v2919_v44, %v85_v43 }
 0x13d   :  { %v3697_v45 = vpop.eup %3696 }
 0x13e   :  { %v86_v46 = vmul.f32 %v3697_v45, %v3886_v13  ;;  %v3969_v50 = vadd.f32 %v2920_v48, %v93_v47 }
 0x140   :  { %v94_v49 = vmul.f32 %v2919_v44, %v86_v46 }
 0x142   :  { %v3971_v51 = vadd.f32 %v2920_v48, %v94_v49 }
 0x144   :  { %v129_v52 = vpack.c.bf16 %v3971_v51, %v3969_v50 }
 0x146   :  { %340 = vmatmul.mubr.bf16.vlgmr.msra.gmra.mrb[0].mxu0 %v129_v52  ;;  %3334 = vmatmul.mubr.bf16.vlgmr.msra.gmra.mrb[0].mxu1 %v129_v52 }
 0x147   :  { %3339 = vmatprep.mubr.msk.bf16.mxu0 %vm3764_vm0, %v3762_v3  ;;  %3345 = vmatprep.mubr.msk.bf16.mxu1 %vm3764_vm0, %v3762_v3 }
 0x219   :  { %v341_v60 = vpop.f32.mrb[0].mxu0  ;;  %v384_v61 = vpop.f32.mrb[0].mxu1 }
 0x21a   :  { %v343_v62 = vpop.f32.mrb[1].mxu0  ;;  %v3335_v63 = vpop.f32.mrb[1].mxu1  ;;  %v385_v10 = vadd.f32 %v384_v61, %v175_v0  ;;  %v342_v13 = vadd.f32 %v341_v60, %v167_v7 }
 0x21b   :  { %v344_v1 = vadd.f32 %v343_v62, %v171_v58  ;;  %v345_v2 = vpop.f32.mrb[2].mxu0  ;;  %v387_v4 = vpop.f32.mrb[2].mxu1 }
 0x21c   :  { %v347_v5 = vpop.f32.mrb[3].mxu0  ;;  %v3336_v6 = vpop.f32.mrb[3].mxu1  ;;  %v388_v14 = vadd.f32 %v387_v4, %v175_v0  ;;  %v4001_v16 = vpack.c.bf16 %v385_v10, %v385_v10  ;;  %v346_v17 = vadd.f32 %v345_v2, %v167_v7  ;;  %v407_v18 = vpack.c.bf16 %v342_v13, %v342_v13 }
 0x21d   :  { %v3995_v8 = vpack.c.bf16 %v344_v1, %v344_v1  ;;  %v348_v9 = vadd.f32 %v347_v5, %v171_v58 }
 0x21e   :  { %v4004_v19 = vpack.c.bf16 %v388_v14, %v388_v14  ;;  %v550_v20 = vsel %vm548_vm2, %v4001_v16, 0  ;;  %v408_v21 = vpack.c.bf16 %v346_v17, %v346_v17 }
 0x21f   :  { %v418_v11 = vsel %vm413_vm1, %v3995_v8, 0  ;;  %v410_v12 = vpack.c.bf16 %v348_v9, %v348_v9 }
 0x220   :  { %3338 = vmatpush3.bf16.xpose.msra.mxu0 %v418_v11  ;;  %v596_v22 = vsel %vm548_vm2, %v4004_v19, 0 }
 0x221   :  { %v464_v15 = vsel %vm413_vm1, %v410_v12, 0  ;;  %3349 = vmatprep.subr.bf16.mxu0 %v3762_v3 }
 0x222   :  { %3344 = vmatpush3.bf16.xpose.msra.mxu1 %v464_v15 }
 0x223   :  { %3355 = vmatprep.subr.bf16.mxu1 %v3762_v3 }
 0x227   :  { %3340 = vmatmul.mubr.msk.bf16.vlgmr.msra.gmra.mrb[4].mxu0 %vm413_vm1, %v407_v18 }
 0x228   :  { %3350 = vmatpush3.bf16.msra.mxu0 %v550_v20  ;;  %3351 = vmatprep.mubr.msk.bf16.mxu0 %vm3764_vm0, %v3762_v3 }
 0x229   :  { %3346 = vmatmul.mubr.msk.bf16.vlgmr.msra.gmra.mrb[4].mxu1 %vm413_vm1, %v408_v21  ;;  %3361 = vmatprep.subr.bf16.mxu0 %v3762_v3 }
 0x22a   :  { %3356 = vmatpush3.bf16.msra.mxu1 %v596_v22  ;;  %3357 = vmatprep.mubr.msk.bf16.mxu1 %vm3764_vm0, %v3762_v3 }
 0x22b   :  { %3367 = vmatprep.subr.bf16.mxu1 %v3762_v3 }
 0x2fa   :  { %v454_v36 = vpop.f32.mrb[4].mxu0 }
 0x2fb   :  { %v506_v37 = vmul.f32 0.125, %v454_v36  ;;  %v3341_v38 = vpop.f32.mrb[5].mxu0 }
 0x2fc   :  { %v457_v40 = vpop.f32.mrb[6].mxu0  ;;  %v500_v41 = vpop.f32.mrb[4].mxu1 }
 0x2fd   :  { %v507_v42 = vmul.f32 0.125, %v500_v41  ;;  %v3342_v43 = vpop.f32.mrb[7].mxu0  ;;  %v3347_v44 = vpop.f32.mrb[5].mxu1  ;;  %v518_v45 = vadd.f32 %v4023_v35, %v506_v37 }
 0x2fe   :  { %v503_v46 = vpop.f32.mrb[6].mxu1 }
 0x2ff   :  { %v3348_v47 = vpop.f32.mrb[7].mxu1  ;;  %v521_v48 = vsel %vm520_vm3, %v518_v45, -inf  ;;  %v519_v49 = vadd.f32 %v4026_v39, %v507_v42 }
 0x300   :  { %522 = vmax.xlane.f32.xlu0 %v521_v48 }
 0x301   :  { %v524_v52 = vsel %vm520_vm3, %v519_v49, -inf }
 0x302   :  { %525 = vmax.xlane.f32.xlu1 %v524_v52 }
 0x313   :  { %695 = vrot.lane.b32.xlu1 %v410_v12, %s3766_s1 }
 0x38d   :  { %v523_v53 = vpop.xlane.xlu0 %522 }
 0x38e   :  { %v527_v56 = vsub.f32 %v518_v45, %v523_v53 }
 0x38f   :  { %v526_v58 = vpop.xlane.xlu1 %525 }
 0x390   :  { %v529_v60 = vmul.f32 1.442695, %v527_v56  ;;  %v528_v61 = vsub.f32 %v519_v49, %v526_v58 }
 0x392   :  { %3698 = vpow2.f32 %v529_v60  ;;  %v531_v62 = vmul.f32 1.442695, %v528_v61 }
 0x393   :  { %v696_v4 = vpop.permute.xlu1 %695 }
 0x394   :  { %3700 = vpow2.f32 %v531_v62 }
 0x39c   :  { %v3699_v63 = vpop.eup %3698 }
 0x39d   :  { %v533_v0 = vsel %vm520_vm3, %v3699_v63, 0.0 }
 0x39e   :  { %v3701_v1 = vpop.eup %3700  ;;  %534 = vadd.xlane.f32.xlu0 %v533_v0 }
 0x39f   :  { %v536_v2 = vsel %vm520_vm3, %v3701_v1, 0.0 }
 0x3a0   :  { %537 = vadd.xlane.f32.xlu1 %v536_v2 }
 0x3b1   :  { %640 = vrot.lane.b32.xlu1 %v407_v18, %s3766_s1 }
 0x3b4   :  { %643 = vrot.lane.b32.xlu0 %v3995_v8, %s3766_s1  ;;  %v701_v8 = vsel %vm413_vm1, %v696_v4, 0 }
 0x3b5   :  { %692 = vrot.lane.b32.xlu1 %v408_v21, %s3766_s1 }
 0x42b   :  { %v535_v5 = vpop.xlane.xlu0 %534 }
 0x42c   :  { %3702 = vrcp.f32 %v535_v5 }
 0x42d   :  { %v538_v6 = vpop.xlane.xlu1 %537 }
 0x42e   :  { %3704 = vrcp.f32 %v538_v6 }
 0x42f   :  { %v644_v11 = vpop.permute.xlu0 %643 }
 0x430   :  { %v649_v14 = vsel %vm413_vm1, %v644_v11, 0  ;;  %v3559_v11 = vld [vmem:[%s4634_s6 + $0x28] sm:$0xff]  }
 0x431   :  { %v641_v17 = vpop.permute.xlu1 %640 }
 0x435   :  { %v693_v18 = vpop.permute.xlu1 %692 }
 0x436   :  { %v3703_v7 = vpop.eup %3702 }
 0x437   :  { %v541_v9 = vmul.f32 %v3703_v7, %v3699_v63 }
 0x438   :  { %v3705_v10 = vpop.eup %3704 }
 0x439   :  { %v542_v12 = vmul.f32 %v3705_v10, %v3701_v1  ;;  %v543_v13 = vpack.c.bf16 %v541_v9, %v541_v9  ;;  %v3558_v10 = vld [vmem:[%s4634_s6 + $0x20] sm:$0xff]  }
 0x43b   :  { %3352 = vmatmul.mubr.msk.bf16.vlgmr.msra.gmra.mrb[8].mxu0 %vm520_vm3, %v543_v13  ;;  %v544_v15 = vpack.c.bf16 %v542_v12, %v542_v12  ;;  %v3560_v12 = vld [vmem:[%s4634_s6 + $0x30] sm:$0xff]   ;;  %v3561_v13 = vld [vmem:[%s4634_s6 + $0x38] sm:$0xff]  }
 0x43c   :  { %3362 = vmatpush3.bf16.xpose.msra.mxu0 %v649_v14  ;;  %3363 = vmatprep.mubr.msk.bf16.mxu0 %vm3764_vm0, %v3762_v3 }
 0x43d   :  { %3358 = vmatmul.mubr.msk.bf16.vlgmr.msra.gmra.mrb[8].mxu1 %vm520_vm3, %v544_v15  ;;  %3373 = vmatprep.subr.bf16.mxu0 %v3762_v3 }
 0x43e   :  { %3368 = vmatpush3.bf16.xpose.msra.mxu1 %v701_v8  ;;  %3369 = vmatprep.mubr.msk.bf16.mxu1 %vm3764_vm0, %v3762_v3 }
 0x43f   :  { %3379 = vmatprep.subr.bf16.mxu1 %v3762_v3 }
 0x443   :  { %3364 = vmatmul.mubr.msk.bf16.vlgmr.msra.gmra.mrb[12].mxu0 %vm413_vm1, %v641_v17 }
 0x444   :  { %3375 = vmatprep.mubr.msk.bf16.mxu0 %vm3764_vm0, %v3762_v3 }
 0x445   :  { %3370 = vmatmul.mubr.msk.bf16.vlgmr.msra.gmra.mrb[12].mxu1 %vm413_vm1, %v693_v18 }
 0x446   :  { %3381 = vmatprep.mubr.msk.bf16.mxu1 %vm3764_vm0, %v3762_v3 }
 0x50e   :  { %v4055_v20 = vpop.f32.mrb[8].mxu0 }
 0x50f   :  { %v3353_v21 = vpop.f32.mrb[9].mxu0 }
 0x510   :  { %v589_v22 = vpop.f32.mrb[10].mxu0  ;;  %v4057_v23 = vpop.f32.mrb[8].mxu1  ;;  %v3562_v21 = vld [vmem:[%s4634_s6] sm:$0xff]  }
 0x511   :  { %v638_v24 = vpack.c.bf16 %v4057_v23, %v4055_v20  ;;  %v3354_v25 = vpop.f32.mrb[11].mxu0  ;;  %v3359_v26 = vpop.f32.mrb[9].mxu1 }
 0x512   :  { %v635_v27 = vpop.f32.mrb[10].mxu1 }
 0x513   :  { %v3360_v28 = vpop.f32.mrb[11].mxu1 }
 0x514   :  { %v3563_v28 = vld [vmem:[%s4634_s6 + $0x8] sm:$0xff]  }
 0x516   :  { %v685_v29 = vpop.f32.mrb[12].mxu0 }
 0x517   :  { %v743_v31 = vmul.f32 0.125, %v685_v29  ;;  %v3365_v32 = vpop.f32.mrb[13].mxu0  ;;  %v3564_v29 = vld [vmem:[%s4634_s6 + $0x10] sm:$0xff]  }
 0x518   :  { %v688_v33 = vpop.f32.mrb[14].mxu0  ;;  %v737_v34 = vpop.f32.mrb[12].mxu1 }
 0x519   :  { %v744_v36 = vmul.f32 0.125, %v737_v34  ;;  %v3366_v37 = vpop.f32.mrb[15].mxu0  ;;  %v3371_v38 = vpop.f32.mrb[13].mxu1  ;;  %v745_v40 = vadd.f32 %v743_v31, %v4023_v35  ;;  %v3565_v31 = vld [vmem:[%s4634_s6 + $0x18] sm:$0xff]  }
 0x51a   :  { %v740_v41 = vpop.f32.mrb[14].mxu1  ;;  %v2963_v38 = vld [vmem:[%s4635_s7] ss:$0 sm:$0xff] }
 0x51b   :  { %v3372_v42 = vpop.f32.mrb[15].mxu1  ;;  %v747_v43 = vsel %vm520_vm3, %v745_v40, -inf  ;;  %v746_v44 = vadd.f32 %v744_v36, %v4026_v39 }
 0x51c   :  { %748 = vmax.xlane.f32.xlu0 %v747_v43 }
 0x51d   :  { %v750_v45 = vsel %vm520_vm3, %v746_v44, -inf }
 0x51e   :  { %751 = vmax.xlane.f32.xlu1 %v750_v45 }
 0x52f   :  { %821 = vrot.lane.b32.xlu1 %v4004_v19, %s3766_s1 }
 0x5a9   :  { %v749_v46 = vpop.xlane.xlu0 %748 }
 0x5aa   :  { %v753_v47 = vsub.f32 %v745_v40, %v749_v46 }
 0x5ab   :  { %v752_v48 = vpop.xlane.xlu1 %751 }
 0x5ac   :  { %v755_v49 = vmul.f32 1.442695, %v753_v47  ;;  %v754_v52 = vsub.f32 %v746_v44, %v752_v48  ;;  %v3568_v47 = vld [vmem:[%s4636_s10 + $0x4] ss:$8 sps:$4 sm:$0xff]   ;;  %v3569_v48 = vld [vmem:[%s4636_s10 + $0x10] ss:$8 sps:$4 sm:$0xff]  }
 0x5ae   :  { %3706 = vpow2.f32 %v755_v49  ;;  %v757_v53 = vmul.f32 1.442695, %v754_v52 }
 0x5af   :  { %v822_v56 = vpop.permute.xlu1 %821 }
 0x5b0   :  { %3708 = vpow2.f32 %v757_v53  ;;  %v827_v58 = vsel %vm548_vm2, %v822_v56, 0 }
 0x5b1   :  { %3380 = vmatpush3.bf16.msra.mxu1 %v827_v58 }
 0x5b2   :  { %3385 = vmatprep.subr.bf16.mxu1 %v3762_v3 }
 0x5b8   :  { %v3707_v60 = vpop.eup %3706 }
 0x5b9   :  { %v759_v61 = vsel %vm520_vm3, %v3707_v60, 0.0 }
 0x5ba   :  { %v3709_v62 = vpop.eup %3708  ;;  %760 = vadd.xlane.f32.xlu0 %v759_v61 }
 0x5bb   :  { %v762_v19 = vsel %vm520_vm3, %v3709_v62, 0.0 }
 0x5be   :  { %763 = vadd.xlane.f32.xlu0 %v762_v19  ;;  %v3572_v19 = vld [vmem:[%s4636_s10 + $0x20] ss:$8 sps:$4 sm:$0xff]  }
 0x5d4   :  { %772 = vrot.lane.b32.xlu0 %v4001_v16, %s3766_s1 }
 0x647   :  { %v761_v63 = vpop.xlane.xlu0 %760 }
 0x648   :  { %3710 = vrcp.f32 %v761_v63  ;;  %v3577_v63 = vld [vmem:[%s4636_s10 + $0x34] ss:$8 sps:$4 sm:$0xff]  }
 0x64b   :  { %v764_v0 = vpop.xlane.xlu0 %763 }
 0x64c   :  { %3712 = vrcp.f32 %v764_v0  ;;  %v3575_v0 = vld [vmem:[%s4636_s10 + $0x30] ss:$8 sps:$4 sm:$0xff]  }
 0x64f   :  { %v773_v1 = vpop.permute.xlu0 %772 }
 0x650   :  { %v778_v2 = vsel %vm548_vm2, %v773_v1, 0  ;;  %v3580_v1 = vld [vmem:[%s4636_s10 + $0x44] ss:$8 sps:$4 sm:$0xff]  }
 0x651   :  { %3374 = vmatpush3.bf16.msra.mxu0 %v778_v2  ;;  %v3578_v2 = vld [vmem:[%s4636_s10 + $0x40] ss:$8 sps:$4 sm:$0xff]  }
 0x652   :  { %v3711_v4 = vpop.eup %3710  ;;  %1166 = vmatprep.subr.bf16.mxu0 %v3568_v47  ;;  %v1074_v47 = vld [vmem:[%s4640_s11] sm:$0x3] }
 0x653   :  { %v767_v5 = vmul.f32 %v3711_v4, %v3707_v60  ;;  %v3583_v4 = vld [vmem:[%s4636_s10 + $0x54] ss:$8 sps:$4 sm:$0xff]  }
 0x655   :  { %v769_v6 = vpack.c.bf16 %v767_v5, %v767_v5  ;;  %v3581_v5 = vld [vmem:[%s4636_s10 + $0x50] ss:$8 sps:$4 sm:$0xff]  }
 0x656   :  { %v3713_v7 = vpop.eup %3712 }
 0x657   :  { %v768_v9 = vmul.f32 %v3713_v7, %v3709_v62  ;;  %3376 = vmatmul.mubr.msk.bf16.vlgmr.msra.gmra.mrb[16].mxu0 %vm520_vm3, %v769_v6  ;;  %v3574_v62 = vld [vmem:[%s4636_s10 + $0x24] ss:$8 sps:$4 sm:$0xff]   ;;  %v3584_v7 = vld [vmem:[%s4636_s10 + $0x60] ss:$8 sps:$4 sm:$0xff]  }
 0x658   :  { %1198 = vmatprep.mubr.bf16.mxu0 %v3763_v30  ;;  %v3586_v6 = vld [vmem:[%s4636_s10 + $0x64] ss:$8 sps:$4 sm:$0xff]  }
 0x659   :  { %v770_v16 = vpack.c.bf16 %v768_v9, %v768_v9  ;;  %v3589_v9 = vld [vmem:[%s4636_s10 + $0x74] ss:$8 sps:$4 sm:$0xff]  }
 0x65b   :  { %3382 = vmatmul.mubr.msk.bf16.vlgmr.msra.gmra.mrb[16].mxu1 %vm520_vm3, %v770_v16 }
 0x65c   :  { %3386 = vmatpush3.bf16.msra.mxu1 %v3558_v10  ;;  %3393 = vmatprep.mubr.msk.bf16.mxu1 %vm3764_vm0, %v3762_v3  ;;  %v3587_v10 = vld [vmem:[%s4636_s10 + $0x70] ss:$8 sps:$4 sm:$0xff]  }
 0x65d   :  { %3387 = vmatprep.subr.bf16.mxu1 %v3762_v3 }
 0x660   :  { %3388 = vmatpush3.bf16.msra.mxu1 %v3559_v11 }
 0x661   :  { %3389 = vmatprep.subr.bf16.mxu1 %v3762_v3 }
 0x664   :  { %3390 = vmatpush3.bf16.msra.mxu1 %v3560_v12 }
 0x665   :  { %3391 = vmatprep.subr.bf16.mxu1 %v3762_v3 }
 0x668   :  { %3392 = vmatpush3.bf16.msra.mxu1 %v3561_v13 }
 0x669   :  { %3397 = vmatprep.subr.bf16.mxu1 %v3762_v3 }
 0x72a   :  { %v814_v14 = vpop.f32.mrb[16].mxu0 }
 0x72b   :  { %v3377_v15 = vpop.f32.mrb[17].mxu0 }
 0x72c   :  { %v817_v8 = vpop.f32.mrb[18].mxu0 }
 0x72d   :  { %v3378_v17 = vpop.f32.mrb[19].mxu0 }
 0x72e   :  { %v863_v18 = vpop.f32.mrb[16].mxu1  ;;  %v2964_v17 = vld [vmem:[%s4637_s8] ss:$0 sm:$0xff] }
 0x72f   :  { %v869_v22 = vpack.c.bf16 %v863_v18, %v814_v14  ;;  %v3383_v25 = vpop.f32.mrb[17].mxu1 }
 0x730   :  { %v866_v26 = vpop.f32.mrb[18].mxu1 }
 0x731   :  { %v3384_v27 = vpop.f32.mrb[19].mxu1  ;;  %3394 = vmatmul.mubr.msk.bf16.vlgmr.msra.gmra.mrb[20].mxu1 %vm413_vm1, %v869_v22  ;;  %v2965_v26 = vld [vmem:[%s4638_s9] ss:$0 sm:$0xff] }
 0x732   :  { %3398 = vmatpush3.bf16.msra.mxu1 %v3562_v21  ;;  %3405 = vmatprep.mubr.msk.bf16.mxu1 %vm3764_vm0, %v3762_v3 }
 0x733   :  { %3399 = vmatprep.subr.bf16.mxu1 %v3762_v3 }
 0x736   :  { %3400 = vmatpush3.bf16.msra.mxu1 %v3563_v28 }
 0x737   :  { %3401 = vmatprep.subr.bf16.mxu1 %v3762_v3 }
 0x73a   :  { %3402 = vmatpush3.bf16.msra.mxu1 %v3564_v29 }
 0x73b   :  { %3403 = vmatprep.subr.bf16.mxu1 %v3762_v3 }
 0x73e   :  { %3404 = vmatpush3.bf16.msra.mxu1 %v3565_v31 }
 0x741   :  { %3406 = vmatmul.mubr.msk.bf16.vlgmr.msra.gmra.mrb[24].mxu1 %vm413_vm1, %v638_v24  ;;  %v3566_v24 = vld [vmem:[%s4636_s10] ss:$8 sps:$4 sm:$0xff]  }
 0x742   :  { %1167 = vmatpush1.bf16.msra.mxu0 %v3566_v24  ;;  %v3605_v24 = vld [vmem:[%s4639_s12 + $0x38] sm:$0xff]  }
 0x804   :  { %v931_v32 = vpop.f32.mrb[20].mxu1 }
 0x805   :  { %v3395_v33 = vpop.f32.mrb[21].mxu1 }
 0x806   :  { %v934_v34 = vpop.f32.mrb[22].mxu1  ;;  %v3591_v33 = vld [vmem:[%s4639_s12] sm:$0xff]  }
 0x807   :  { %v3396_v36 = vpop.f32.mrb[23].mxu1 }
 0x808   :  { %v3593_v36 = vld [vmem:[%s4639_s12 + $0x8] sm:$0xff]  }
 0x814   :  { %v999_v37 = vpop.f32.mrb[24].mxu1 }
 0x815   :  { %v1000_v40 = vadd.f32 %v999_v37, %v931_v32  ;;  %v3407_v41 = vpop.f32.mrb[25].mxu1  ;;  %v3590_v32 = vld [vmem:[%s4639_s12 + $0x40] sm:$0xff]   ;;  %v3594_v37 = vld [vmem:[%s4639_s12 + $0x50] sm:$0xff]  }
 0x816   :  { %v1002_v42 = vpop.f32.mrb[26].mxu1  ;;  %3229 = vmatprep.subr.bf16.mxu1 %v3590_v32  ;;  %v3597_v41 = vld [vmem:[%s4639_s12 + $0x18] sm:$0xff]  }
 0x817   :  { %v1013_v43 = vadd.f32 %v2963_v38, %v1000_v40  ;;  %v1003_v44 = vadd.f32 %v1002_v42, %v934_v34  ;;  %v3408_v45 = vpop.f32.mrb[27].mxu1  ;;  %3230 = vmatpush3.bf16.msra.mxu1 %v3591_v33  ;;  %v3592_v34 = vld [vmem:[%s4639_s12 + $0x48] sm:$0xff]   ;;  %v3596_v40 = vld [vmem:[%s4639_s12 + $0x58] sm:$0xff]   ;;  %v3598_v42 = vld [vmem:[%s4639_s12 + $0x60] sm:$0xff]  }
 0x818   :  { %3231 = vmatprep.subr.bf16.mxu1 %v3592_v34  ;;  %v3601_v45 = vld [vmem:[%s4639_s12 + $0x28] sm:$0xff]  }
 0x819   :  { %v1014_v46 = vadd.f32 %v2963_v38, %v1003_v44  ;;  %v1015_v20 = vadd.f32 %v1013_v43, %v3969_v50  ;;  %v3571_v50 = vld [vmem:[%s4636_s10 + $0x14] ss:$8 sps:$4 sm:$0xff]   ;;  %v3599_v43 = vld [vmem:[%s4639_s12 + $0x20] sm:$0xff]   ;;  %v3600_v44 = vld [vmem:[%s4639_s12 + $0x68] sm:$0xff]  }
 0x81a   :  { %1168 = vmatprep.subr.bf16.mxu0 %v3571_v50  ;;  %v3595_v38 = vld [vmem:[%s4639_s12 + $0x10] sm:$0xff]   ;;  %v1083_v50 = vrot.slane %v1074_v47, %v3982_v55 }
 0x81b   :  { %1019 = vadd.xlane.f32.xlu1 %v1015_v20  ;;  %v1016_v23 = vadd.f32 %v1014_v46, %v3971_v51  ;;  %1169 = vmatpush1.bf16.msra.mxu0 %v3569_v48  ;;  %v3602_v46 = vld [vmem:[%s4639_s12 + $0x70] sm:$0xff]   ;;  %v1079_v48 = vrot.slane %v1074_v47, %v3990_v59 }
 0x81c   :  { %1170 = vmatprep.subr.bf16.mxu0 %v3574_v62  ;;  %3232 = vmatpush3.bf16.msra.mxu1 %v3593_v36 }
 0x81d   :  { %1021 = vadd.xlane.f32.xlu0 %v1016_v23  ;;  %3233 = vmatprep.subr.bf16.mxu1 %v3594_v37 }
 0x81f   :  { %1171 = vmatpush1.bf16.msra.mxu0 %v3572_v19 }
 0x820   :  { %1172 = vmatprep.subr.bf16.mxu0 %v3577_v63  ;;  %3234 = vmatpush3.bf16.msra.mxu1 %v3595_v38 }
 0x821   :  { %3235 = vmatprep.subr.bf16.mxu1 %v3596_v40 }
 0x823   :  { %1173 = vmatpush1.bf16.msra.mxu0 %v3575_v0 }
 0x824   :  { %1174 = vmatprep.subr.bf16.mxu0 %v3580_v1  ;;  %3236 = vmatpush3.bf16.msra.mxu1 %v3597_v41 }
 0x825   :  { %3237 = vmatprep.subr.bf16.mxu1 %v3598_v42 }
 0x827   :  { %1175 = vmatpush1.bf16.msra.mxu0 %v3578_v2 }
 0x828   :  { %1176 = vmatprep.subr.bf16.mxu0 %v3583_v4  ;;  %3238 = vmatpush3.bf16.msra.mxu1 %v3599_v43 }
 0x829   :  { %3239 = vmatprep.subr.bf16.mxu1 %v3600_v44 }
 0x82b   :  { %1177 = vmatpush1.bf16.msra.mxu0 %v3581_v5 }
 0x82c   :  { %1178 = vmatprep.subr.bf16.mxu0 %v3586_v6  ;;  %3240 = vmatpush3.bf16.msra.mxu1 %v3601_v45 }
 0x82d   :  { %3241 = vmatprep.subr.bf16.mxu1 %v3602_v46  ;;  %v2982_v46 = vld [vmem:[%s4641_s13] ss:$0 sm:$0xff] }
 0x82f   :  { %1179 = vmatpush1.bf16.msra.mxu0 %v3584_v7 }
 0x830   :  { %1180 = vmatprep.subr.bf16.mxu0 %v3589_v9 }
 0x833   :  { %1181 = vmatpush1.bf16.msra.mxu0 %v3587_v10 }
 0x8a8   :  { %v1020_v51 = vpop.xlane.xlu1 %1019 }
 0x8a9   :  { %v1023_v49 = vmul.f32 0.0078125, %v1020_v51 }
 0x8aa   :  { %v1022_v52 = vpop.xlane.xlu0 %1021 }
 0x8ab   :  { %v1025_v53 = vsub.f32 %v1015_v20, %v1023_v49  ;;  %v1024_v56 = vmul.f32 0.0078125, %v1022_v52  ;;  %v3603_v20 = vld [vmem:[%s4639_s12 + $0x30] sm:$0xff]  }
 0x8ac   :  { %3242 = vmatpush3.bf16.msra.mxu1 %v3603_v20 }
 0x8ad   :  { %v1026_v58 = vsub.f32 %v1016_v23, %v1024_v56  ;;  %v1027_v60 = vmul.f32 %v1025_v53, %v1025_v53  ;;  %v3604_v23 = vld [vmem:[%s4639_s12 + $0x78] sm:$0xff]  }
 0x8ae   :  { %3243 = vmatprep.subr.bf16.mxu1 %v3604_v23 }
 0x8af   :  { %1029 = vadd.xlane.f32.xlu0 %v1027_v60  ;;  %v1028_v61 = vmul.f32 %v1026_v58, %v1026_v58 }
 0x8b0   :  { %3244 = vmatpush3.bf16.msra.mxu1 %v3605_v24 }
 0x8b1   :  { %1031 = vadd.xlane.f32.xlu1 %v1028_v61  ;;  %3409 = vmatprep.subr.bf16.mxu1 %v3762_v3 }
 0x93c   :  { %v1030_v16 = vpop.xlane.xlu0 %1029 }
 0x93d   :  { %v1033_v11 = vmul.f32 0.0078125, %v1030_v16 }
 0x93e   :  { %v1032_v12 = vpop.xlane.xlu1 %1031 }
 0x93f   :  { %v1035_v13 = vadd.f32 1e-12, %v1033_v11  ;;  %v1034_v14 = vmul.f32 0.0078125, %v1032_v12 }
 0x941   :  { %3714 = vrsqrt.f32 %v1035_v13  ;;  %v1036_v15 = vadd.f32 1e-12, %v1034_v14 }
 0x943   :  { %3716 = vrsqrt.f32 %v1036_v15 }
 0x94b   :  { %v3715_v8 = vpop.eup %3714 }
 0x94c   :  { %v1039_v18 = vmul.f32 %v3715_v8, %v1025_v53 }
 0x94d   :  { %v3717_v21 = vpop.eup %3716 }
 0x94e   :  { %v1040_v22 = vmul.f32 %v3717_v21, %v1026_v58  ;;  %v1047_v25 = vmul.f32 %v2964_v17, %v1039_v18 }
 0x950   :  { %v1048_v27 = vmul.f32 %v2964_v17, %v1040_v22  ;;  %v4176_v28 = vadd.f32 %v2965_v26, %v1047_v25 }
 0x952   :  { %v4178_v29 = vadd.f32 %v2965_v26, %v1048_v27 }
 0x954   :  { %v1057_v31 = vpack.c.bf16 %v4178_v29, %v4176_v28 }
 0x956   :  { %1199 = vmatmul.mubr.bf16.vlgmr.msra.gmra.mrb[20].mxu0 %v1057_v31 }
 0x957   :  { %1677 = vmatprep.mubr.bf16.mxu0 %v3763_v30 }
 0xa29   :  { %v1200_v51 = vpop.f32.mrb[20].mxu0 }
 0xa2a   :  { %v1201_v49 = vadd.f32 %v1200_v51, %v1079_v48  ;;  %v1202_v52 = vpop.f32.mrb[21].mxu0 }
 0xa2b   :  { %v1203_v53 = vadd.f32 %v1202_v52, %v1083_v50  ;;  %v1204_v56 = vpop.f32.mrb[22].mxu0 }
 0xa2c   :  { %v1213_v58 = vmul.f32 0.044715, %v1201_v49  ;;  %v1205_v60 = vadd.f32 %v1204_v56, %v1079_v48  ;;  %v1206_v61 = vpop.f32.mrb[23].mxu0  ;;  %v1209_v31 = vmul.f32 0.5, %v1201_v49  ;;  %v3608_v56 = vld [vmem:[%s4653_s20 + $0xc4] ss:$12 sps:$4 sm:$0xff]  }
 0xa2d   :  { %v1214_v62 = vmul.f32 0.044715, %v1203_v53  ;;  %v1207_v19 = vadd.f32 %v1206_v61, %v1083_v50  ;;  %v1210_v34 = vmul.f32 0.5, %v1203_v53  ;;  %1645 = vmatprep.subr.bf16.mxu0 %v3608_v56 }
 0xa2e   :  { %v1217_v63 = vmul.f32 %v1213_v58, %v1201_v49  ;;  %v1215_v0 = vmul.f32 0.044715, %v1205_v60  ;;  %v1211_v32 = vmul.f32 0.5, %v1205_v60  ;;  %v3609_v58 = vld [vmem:[%s4653_s20 + $0xc8] ss:$12 sps:$4 sm:$0xff]  }
 0xa2f   :  { %v1218_v1 = vmul.f32 %v1214_v62, %v1203_v53  ;;  %v1216_v2 = vmul.f32 0.044715, %v1207_v19  ;;  %v1212_v36 = vmul.f32 0.5, %v1207_v19 }
 0xa30   :  { %v1221_v4 = vmul.f32 %v1217_v63, %v1201_v49  ;;  %v1219_v5 = vmul.f32 %v1215_v0, %v1205_v60 }
 0xa31   :  { %v1222_v6 = vmul.f32 %v1218_v1, %v1203_v53  ;;  %v1220_v7 = vmul.f32 %v1216_v2, %v1207_v19 }
 0xa32   :  { %v1225_v9 = vadd.f32 %v1221_v4, %v1201_v49  ;;  %v1223_v10 = vmul.f32 %v1219_v5, %v1205_v60  ;;  %v3616_v5 = vld [vmem:[%s4653_s20 + $0xf4] ss:$12 sps:$4 sm:$0xff]  }
 0xa33   :  { %v1224_v16 = vmul.f32 %v1220_v7, %v1207_v19  ;;  %v1226_v11 = vadd.f32 %v1222_v6, %v1203_v53  ;;  %v3606_v53 = vld [vmem:[%s4653_s20 + $0xc0] ss:$12 sps:$4 sm:$0xff]   ;;  %v3614_v6 = vld [vmem:[%s4653_s20 + $0xf0] ss:$12 sps:$4 sm:$0xff]   ;;  %v3617_v7 = vld [vmem:[%s4653_s20 + $0xf8] ss:$12 sps:$4 sm:$0xff]  }
 0xa34   :  { %v1229_v12 = vmul.f32 0.7978846, %v1225_v9  ;;  %v1227_v13 = vadd.f32 %v1223_v10, %v1205_v60  ;;  %1646 = vmatpush1.bf16.msra.mxu0 %v3606_v53  ;;  %v3610_v60 = vld [vmem:[%s4653_s20 + $0xd8] ss:$12 sps:$4 sm:$0xff]   ;;  %v3618_v10 = vld [vmem:[%s4653_s20 + $0x108] ss:$12 sps:$4 sm:$0xff]  }
 0xa35   :  { %v1228_v14 = vadd.f32 %v1224_v16, %v1207_v19  ;;  %v1230_v15 = vmul.f32 0.7978846, %v1226_v11  ;;  %v3620_v9 = vld [vmem:[%s4653_s20 + $0x10c] ss:$12 sps:$4 sm:$0xff]   ;;  %v3621_v16 = vld [vmem:[%s4653_s20 + $0x110] ss:$12 sps:$4 sm:$0xff]  }
 0xa36   :  { %3718 = vtanh.f32 %v1229_v12  ;;  %v1231_v8 = vmul.f32 0.7978846, %v1227_v13  ;;  %v3624_v11 = vld [vmem:[%s4653_s20 + $0x124] ss:$12 sps:$4 sm:$0xff]   ;;  %v3622_v12 = vld [vmem:[%s4653_s20 + $0x120] ss:$12 sps:$4 sm:$0xff]  }
 0xa37   :  { %v1232_v17 = vmul.f32 0.7978846, %v1228_v14  ;;  %3720 = vtanh.f32 %v1230_v15  ;;  %v3625_v13 = vld [vmem:[%s4653_s20 + $0x128] ss:$12 sps:$4 sm:$0xff]   ;;  %v3626_v15 = vld [vmem:[%s4653_s20 + $0x138] ss:$12 sps:$4 sm:$0xff]  }
 0xa38   :  { %3722 = vtanh.f32 %v1231_v8  ;;  %v3628_v14 = vld [vmem:[%s4653_s20 + $0x13c] ss:$12 sps:$4 sm:$0xff]   ;;  %v3629_v8 = vld [vmem:[%s4653_s20 + $0x140] ss:$12 sps:$4 sm:$0xff]  }
 0xa39   :  { %3724 = vtanh.f32 %v1232_v17  ;;  %v3632_v17 = vld [vmem:[%s4653_s20 + $0x154] ss:$12 sps:$4 sm:$0xff]  }
 0xa40   :  { %v3719_v18 = vpop.eup %3718 }
 0xa41   :  { %v3721_v21 = vpop.eup %3720  ;;  %v1237_v22 = vadd.f32 1.0, %v3719_v18  ;;  %v3630_v18 = vld [vmem:[%s4653_s20 + $0x150] ss:$12 sps:$4 sm:$0xff]  }
 0xa42   :  { %v3723_v25 = vpop.eup %3722  ;;  %v1238_v26 = vadd.f32 1.0, %v3721_v21  ;;  %v3633_v21 = vld [vmem:[%s4653_s20 + $0x158] ss:$12 sps:$4 sm:$0xff]  }
 0xa43   :  { %v3725_v27 = vpop.eup %3724  ;;  %v1239_v33 = vadd.f32 1.0, %v3723_v25  ;;  %v1241_v38 = vmul.f32 %v1237_v22, %v1209_v31  ;;  %v3636_v22 = vld [vmem:[%s4653_s20 + $0x16c] ss:$12 sps:$4 sm:$0xff]   ;;  %v3634_v25 = vld [vmem:[%s4653_s20 + $0x168] ss:$12 sps:$4 sm:$0xff]  }
 0xa44   :  { %v1240_v37 = vadd.f32 1.0, %v3725_v27  ;;  %v1242_v41 = vmul.f32 %v1238_v26, %v1210_v34  ;;  %v3637_v26 = vld [vmem:[%s4653_s20 + $0x170] ss:$12 sps:$4 sm:$0xff]  }
 0xa45   :  { %v1243_v40 = vmul.f32 %v1239_v33, %v1211_v32 }
 0xa46   :  { %v1244_v42 = vmul.f32 %v1240_v37, %v1212_v36 }
 0xa47   :  { %v1245_v43 = vpack.c.bf16 %v1243_v40, %v1241_v38  ;;  %v2999_v38 = vld [vmem:[%s4642_s14] ss:$0 sm:$0xff] }
 0xa48   :  { %v1246_v44 = vpack.c.bf16 %v1244_v42, %v1242_v41 }
 0xa4a   :  { %1414 = vmatprep.mubr.bf16.mxu1 %v1246_v44  ;;  %v3000_v44 = vld [vmem:[%s4643_s15] ss:$0 sm:$0xff] }
 0xa4b   :  { %1415 = vmatmul.mubr.bf16.vlgmr.msra.gmra.mrb[28].mxu1 %v1245_v43 }
 0xa4c   :  { %3425 = vmatprep.mubr.msk.bf16.mxu1 %vm3764_vm0, %v3762_v3  ;;  %3410 = vmatpush3.bf16.msra.mxu1 %v3609_v58 }
 0xa4d   :  { %3411 = vmatprep.subr.bf16.mxu1 %v3762_v3 }
 0xb1e   :  { %v3245_v45 = vpop.f32.mrb[28].mxu1 }
 0xb1f   :  { %v3246_v20 = vpop.f32.mrb[29].mxu1 }
 0xb20   :  { %v3247_v23 = vadd.f32 %v3246_v20, %v3245_v45  ;;  %v3248_v24 = vpop.f32.mrb[30].mxu1 }
 0xb21   :  { %v3249_v47 = vpop.f32.mrb[31].mxu1 }
 0xb22   :  { %v1417_v48 = vadd.f32 %v3247_v23, %v2982_v46  ;;  %v3250_v50 = vadd.f32 %v3249_v47, %v3248_v24  ;;  %v3033_v24 = vld [vmem:[%s4632_s5 + $0x3] sm:$0x7] }
 0xb23   :  { %v1509_v47 = vrot.slane %v3033_v24, %v3982_v55 }
 0xb24   :  { %v1420_v51 = vadd.f32 %v3250_v50, %v2982_v46  ;;  %v1423_v49 = vadd.f32 %v1417_v48, %v4176_v28  ;;  %v3612_v28 = vld [vmem:[%s4653_s20 + $0xdc] ss:$12 sps:$4 sm:$0xff]  }
 0xb25   :  { %1647 = vmatprep.subr.bf16.mxu0 %v3612_v28 }
 0xb26   :  { %1427 = vadd.xlane.f32.xlu0 %v1423_v49  ;;  %v1424_v52 = vadd.f32 %v1420_v51, %v4178_v29  ;;  %v3613_v29 = vld [vmem:[%s4653_s20 + $0xe0] ss:$12 sps:$4 sm:$0xff]   ;;  %1648 = vmatpush1.bf16.msra.mxu0 %v3610_v60  ;;  %v1505_v60 = vrot.slane %v3033_v24, %v3990_v59 }
 0xb27   :  { %3412 = vmatpush3.bf16.msra.mxu1 %v3613_v29  ;;  %1649 = vmatprep.subr.bf16.mxu0 %v3616_v5 }
 0xb28   :  { %1429 = vadd.xlane.f32.xlu1 %v1424_v52  ;;  %3413 = vmatprep.subr.bf16.mxu1 %v3762_v3 }
 0xb2a   :  { %1650 = vmatpush1.bf16.msra.mxu0 %v3614_v6 }
 0xb2b   :  { %3414 = vmatpush3.bf16.msra.mxu1 %v3617_v7  ;;  %1651 = vmatprep.subr.bf16.mxu0 %v3620_v9 }
 0xb2c   :  { %3415 = vmatprep.subr.bf16.mxu1 %v3762_v3 }
 0xb2e   :  { %1652 = vmatpush1.bf16.msra.mxu0 %v3618_v10 }
 0xb2f   :  { %3416 = vmatpush3.bf16.msra.mxu1 %v3621_v16  ;;  %1653 = vmatprep.subr.bf16.mxu0 %v3624_v11 }
 0xb30   :  { %3417 = vmatprep.subr.bf16.mxu1 %v3762_v3 }
 0xb32   :  { %1654 = vmatpush1.bf16.msra.mxu0 %v3622_v12 }
 0xb33   :  { %3418 = vmatpush3.bf16.msra.mxu1 %v3625_v13  ;;  %1655 = vmatprep.subr.bf16.mxu0 %v3628_v14 }
 0xb34   :  { %3419 = vmatprep.subr.bf16.mxu1 %v3762_v3 }
 0xb36   :  { %1656 = vmatpush1.bf16.msra.mxu0 %v3626_v15 }
 0xb37   :  { %3420 = vmatpush3.bf16.msra.mxu1 %v3629_v8  ;;  %1657 = vmatprep.subr.bf16.mxu0 %v3632_v17 }
 0xb38   :  { %3421 = vmatprep.subr.bf16.mxu1 %v3762_v3 }
 0xb3a   :  { %1658 = vmatpush1.bf16.msra.mxu0 %v3630_v18 }
 0xb3b   :  { %3422 = vmatpush3.bf16.msra.mxu1 %v3633_v21  ;;  %1659 = vmatprep.subr.bf16.mxu0 %v3636_v22 }
 0xb3c   :  { %3423 = vmatprep.subr.bf16.mxu1 %v3762_v3 }
 0xb3e   :  { %1660 = vmatpush1.bf16.msra.mxu0 %v3634_v25 }
 0xb3f   :  { %3424 = vmatpush3.bf16.msra.mxu1 %v3637_v26  ;;  %3429 = vmatprep.subr.bf16.mxu0 %v3762_v3 }
 0xb40   :  { %3435 = vmatprep.subr.bf16.mxu1 %v3762_v3 }
 0xbb3   :  { %v1428_v61 = vpop.xlane.xlu0 %1427 }
 0xbb4   :  { %v1431_v62 = vmul.f32 0.0078125, %v1428_v61 }
 0xbb5   :  { %v1430_v19 = vpop.xlane.xlu1 %1429 }
 0xbb6   :  { %v1433_v63 = vsub.f32 %v1423_v49, %v1431_v62  ;;  %v1432_v0 = vmul.f32 0.0078125, %v1430_v19 }
 0xbb8   :  { %v1434_v1 = vsub.f32 %v1424_v52, %v1432_v0  ;;  %v1435_v2 = vmul.f32 %v1433_v63, %v1433_v63  ;;  %v1513_v52 = vrot.slane %v3033_v24, %v174_v57 }
 0xbba   :  { %1437 = vadd.xlane.f32.xlu0 %v1435_v2  ;;  %v1436_v4 = vmul.f32 %v1434_v1, %v1434_v1 }
 0xbbc   :  { %1439 = vadd.xlane.f32.xlu1 %v1436_v4 }
 0xc47   :  { %v1438_v27 = vpop.xlane.xlu0 %1437 }
 0xc48   :  { %v1441_v31 = vmul.f32 0.0078125, %v1438_v27 }
 0xc49   :  { %v1440_v32 = vpop.xlane.xlu1 %1439 }
 0xc4a   :  { %v1443_v33 = vadd.f32 1e-12, %v1441_v31  ;;  %v1442_v34 = vmul.f32 0.0078125, %v1440_v32 }
 0xc4c   :  { %3726 = vrsqrt.f32 %v1443_v33  ;;  %v1444_v36 = vadd.f32 1e-12, %v1442_v34 }
 0xc4e   :  { %3728 = vrsqrt.f32 %v1444_v36 }
 0xc56   :  { %v3727_v37 = vpop.eup %3726 }
 0xc57   :  { %v1447_v40 = vmul.f32 %v3727_v37, %v1433_v63 }
 0xc58   :  { %v3729_v41 = vpop.eup %3728 }
 0xc59   :  { %v1448_v42 = vmul.f32 %v3729_v41, %v1434_v1  ;;  %v1455_v43 = vmul.f32 %v2999_v38, %v1447_v40 }
 0xc5b   :  { %v1456_v45 = vmul.f32 %v2999_v38, %v1448_v42  ;;  %v4331_v46 = vadd.f32 %v3000_v44, %v1455_v43 }
 0xc5d   :  { %v4333_v20 = vadd.f32 %v3000_v44, %v1456_v45 }
 0xc5f   :  { %v1465_v23 = vpack.c.bf16 %v4333_v20, %v4331_v46 }
 0xc61   :  { %1678 = vmatmul.mubr.bf16.vlgmr.msra.gmra.mrb[24].mxu0 %v1465_v23  ;;  %3426 = vmatmul.mubr.bf16.vlgmr.msra.gmra.mrb[32].mxu1 %v1465_v23 }
 0xc62   :  { %3431 = vmatprep.mubr.msk.bf16.mxu0 %vm3764_vm0, %v3762_v3  ;;  %3437 = vmatprep.mubr.msk.bf16.mxu1 %vm3764_vm0, %v3762_v3 }
 0xd34   :  { %v1679_v48 = vpop.f32.mrb[24].mxu0  ;;  %v1722_v50 = vpop.f32.mrb[32].mxu1 }
 0xd35   :  { %v1681_v51 = vpop.f32.mrb[25].mxu0  ;;  %v3427_v49 = vpop.f32.mrb[33].mxu1  ;;  %v1723_v19 = vadd.f32 %v1722_v50, %v1513_v52  ;;  %v1680_v1 = vadd.f32 %v1679_v48, %v1505_v60 }
 0xd36   :  { %v1682_v53 = vadd.f32 %v1681_v51, %v1509_v47  ;;  %v1683_v56 = vpop.f32.mrb[26].mxu0  ;;  %v1725_v58 = vpop.f32.mrb[34].mxu1 }
 0xd37   :  { %v1685_v28 = vpop.f32.mrb[27].mxu0  ;;  %v3428_v29 = vpop.f32.mrb[35].mxu1  ;;  %v1726_v2 = vadd.f32 %v1725_v58, %v1513_v52  ;;  %v4351_v54 = vpack.c.bf16 %v1723_v19, %v1723_v19  ;;  %v1684_v57 = vadd.f32 %v1683_v56, %v1505_v60  ;;  %v1746_v5 = vpack.c.bf16 %v1680_v1, %v1680_v1 }
 0xd38   :  { %v1748_v61 = vpack.c.bf16 %v1682_v53, %v1682_v53  ;;  %v1686_v62 = vadd.f32 %v1685_v28, %v1509_v47 }
 0xd39   :  { %v4354_v6 = vpack.c.bf16 %v1726_v2, %v1726_v2  ;;  %v1876_v7 = vsel %vm548_vm2, %v4351_v54, 0  ;;  %v1747_v9 = vpack.c.bf16 %v1684_v57, %v1684_v57 }
 0xd3a   :  { %v1756_v63 = vsel %vm413_vm1, %v1748_v61, 0  ;;  %v1749_v0 = vpack.c.bf16 %v1686_v62, %v1686_v62 }
 0xd3b   :  { %3430 = vmatpush3.bf16.xpose.msra.mxu0 %v1756_v63  ;;  %v1922_v10 = vsel %vm548_vm2, %v4354_v6, 0 }
 0xd3c   :  { %v1802_v4 = vsel %vm413_vm1, %v1749_v0, 0  ;;  %3441 = vmatprep.subr.bf16.mxu0 %v3762_v3 }
 0xd3d   :  { %3436 = vmatpush3.bf16.xpose.msra.mxu1 %v1802_v4 }
 0xd3e   :  { %3447 = vmatprep.subr.bf16.mxu1 %v3762_v3 }
 0xd42   :  { %3432 = vmatmul.mubr.msk.bf16.vlgmr.msra.gmra.mrb[28].mxu0 %vm413_vm1, %v1746_v5 }
 0xd43   :  { %3442 = vmatpush3.bf16.msra.mxu0 %v1876_v7  ;;  %3443 = vmatprep.mubr.msk.bf16.mxu0 %vm3764_vm0, %v3762_v3 }
 0xd44   :  { %3438 = vmatmul.mubr.msk.bf16.vlgmr.msra.gmra.mrb[36].mxu1 %vm413_vm1, %v1747_v9  ;;  %3453 = vmatprep.subr.bf16.mxu0 %v3762_v3 }
 0xd45   :  { %3448 = vmatpush3.bf16.msra.mxu1 %v1922_v10  ;;  %3449 = vmatprep.mubr.msk.bf16.mxu1 %vm3764_vm0, %v3762_v3 }
 0xd46   :  { %3459 = vmatprep.subr.bf16.mxu1 %v3762_v3 }
 0xe15   :  { %v1792_v16 = vpop.f32.mrb[28].mxu0 }
 0xe16   :  { %v1844_v11 = vmul.f32 0.125, %v1792_v16  ;;  %v3433_v12 = vpop.f32.mrb[29].mxu0 }
 0xe17   :  { %v1795_v13 = vpop.f32.mrb[30].mxu0  ;;  %v1838_v14 = vpop.f32.mrb[36].mxu1 }
 0xe18   :  { %v1845_v15 = vmul.f32 0.125, %v1838_v14  ;;  %v3434_v8 = vpop.f32.mrb[31].mxu0  ;;  %v3439_v17 = vpop.f32.mrb[37].mxu1  ;;  %v1846_v18 = vadd.f32 %v1844_v11, %v4023_v35 }
 0xe19   :  { %v1841_v21 = vpop.f32.mrb[38].mxu1 }
 0xe1a   :  { %v3440_v22 = vpop.f32.mrb[39].mxu1  ;;  %v1848_v25 = vsel %vm520_vm3, %v1846_v18, -inf  ;;  %v1847_v26 = vadd.f32 %v1845_v15, %v4026_v39 }
 0xe1b   :  { %1849 = vmax.xlane.f32.xlu0 %v1848_v25 }
 0xe1c   :  { %v1851_v27 = vsel %vm520_vm3, %v1847_v26, -inf }
 0xe1d   :  { %1852 = vmax.xlane.f32.xlu1 %v1851_v27 }
 0xe2e   :  { %2021 = vrot.lane.b32.xlu1 %v1749_v0, %s3766_s1 }
 0xea8   :  { %v1850_v31 = vpop.xlane.xlu0 %1849 }
 0xea9   :  { %v1854_v32 = vsub.f32 %v1846_v18, %v1850_v31 }
 0xeaa   :  { %v1853_v33 = vpop.xlane.xlu1 %1852 }
 0xeab   :  { %v1856_v34 = vmul.f32 1.442695, %v1854_v32  ;;  %v1855_v36 = vsub.f32 %v1847_v26, %v1853_v33 }
 0xead   :  { %3730 = vpow2.f32 %v1856_v34  ;;  %v1858_v37 = vmul.f32 1.442695, %v1855_v36 }
 0xeae   :  { %v2022_v43 = vpop.permute.xlu1 %2021 }
 0xeaf   :  { %3732 = vpow2.f32 %v1858_v37  ;;  %v2027_v53 = vsel %vm413_vm1, %v2022_v43, 0 }
 0xeb7   :  { %v3731_v38 = vpop.eup %3730 }
 0xeb8   :  { %v1860_v40 = vsel %vm520_vm3, %v3731_v38, 0.0 }
 0xeb9   :  { %v3733_v41 = vpop.eup %3732  ;;  %1861 = vadd.xlane.f32.xlu0 %v1860_v40 }
 0xeba   :  { %v1863_v42 = vsel %vm520_vm3, %v3733_v41, 0.0 }
 0xebb   :  { %1864 = vadd.xlane.f32.xlu1 %v1863_v42 }
 0xecc   :  { %1966 = vrot.lane.b32.xlu1 %v1746_v5, %s3766_s1 }
 0xecf   :  { %1969 = vrot.lane.b32.xlu0 %v1748_v61, %s3766_s1 }
 0xed0   :  { %2018 = vrot.lane.b32.xlu1 %v1747_v9, %s3766_s1 }
 0xf46   :  { %v1862_v44 = vpop.xlane.xlu0 %1861 }
 0xf47   :  { %3734 = vrcp.f32 %v1862_v44 }
 0xf48   :  { %v1865_v45 = vpop.xlane.xlu1 %1864 }
 0xf49   :  { %3736 = vrcp.f32 %v1865_v45 }
 0xf4a   :  { %v1970_v48 = vpop.permute.xlu0 %1969 }
 0xf4b   :  { %v1975_v49 = vsel %vm413_vm1, %v1970_v48, 0  ;;  %v3641_v48 = vld [vmem:[%s4634_s6 + $0x58] sm:$0xff]  }
 0xf4c   :  { %v1967_v56 = vpop.permute.xlu1 %1966 }
 0xf50   :  { %v2019_v58 = vpop.permute.xlu1 %2018 }
 0xf51   :  { %v3735_v23 = vpop.eup %3734 }
 0xf52   :  { %v1868_v24 = vmul.f32 %v3735_v23, %v3731_v38  ;;  %v3643_v23 = vld [vmem:[%s4634_s6 + $0x68] sm:$0xff]  }
 0xf53   :  { %v3737_v47 = vpop.eup %3736 }
 0xf54   :  { %v1869_v50 = vmul.f32 %v3737_v47, %v3733_v41  ;;  %v1870_v51 = vpack.c.bf16 %v1868_v24, %v1868_v24  ;;  %v3642_v41 = vld [vmem:[%s4634_s6 + $0x60] sm:$0xff]   ;;  %v3639_v24 = vld [vmem:[%s4634_s6 + $0x48] sm:$0xff]   ;;  %v3640_v47 = vld [vmem:[%s4634_s6 + $0x50] sm:$0xff]  }
 0xf56   :  { %3444 = vmatmul.mubr.msk.bf16.vlgmr.msra.gmra.mrb[32].mxu0 %vm520_vm3, %v1870_v51  ;;  %v1871_v52 = vpack.c.bf16 %v1869_v50, %v1869_v50  ;;  %v3644_v50 = vld [vmem:[%s4634_s6 + $0x70] sm:$0xff]   ;;  %v3645_v51 = vld [vmem:[%s4634_s6 + $0x78] sm:$0xff]  }
 0xf57   :  { %3454 = vmatpush3.bf16.xpose.msra.mxu0 %v1975_v49  ;;  %3455 = vmatprep.mubr.msk.bf16.mxu0 %vm3764_vm0, %v3762_v3 }
 0xf58   :  { %3450 = vmatmul.mubr.msk.bf16.vlgmr.msra.gmra.mrb[40].mxu1 %vm520_vm3, %v1871_v52  ;;  %3465 = vmatprep.subr.bf16.mxu0 %v3762_v3 }
 0xf59   :  { %3460 = vmatpush3.bf16.xpose.msra.mxu1 %v2027_v53  ;;  %3461 = vmatprep.mubr.msk.bf16.mxu1 %vm3764_vm0, %v3762_v3 }
 0xf5a   :  { %3471 = vmatprep.subr.bf16.mxu1 %v3762_v3 }
 0xf5e   :  { %3456 = vmatmul.mubr.msk.bf16.vlgmr.msra.gmra.mrb[36].mxu0 %vm413_vm1, %v1967_v56 }
 0xf5f   :  { %3467 = vmatprep.mubr.msk.bf16.mxu0 %vm3764_vm0, %v3762_v3 }
 0xf60   :  { %3462 = vmatmul.mubr.msk.bf16.vlgmr.msra.gmra.mrb[44].mxu1 %vm413_vm1, %v2019_v58 }
 0xf61   :  { %3473 = vmatprep.mubr.msk.bf16.mxu1 %vm3764_vm0, %v3762_v3 }
0x1029   :  { %v4394_v28 = vpop.f32.mrb[32].mxu0 }
0x102a   :  { %v3445_v29 = vpop.f32.mrb[33].mxu0 }
0x102b   :  { %v1915_v60 = vpop.f32.mrb[34].mxu0  ;;  %v4396_v61 = vpop.f32.mrb[40].mxu1 }
0x102c   :  { %v1964_v62 = vpack.c.bf16 %v4396_v61, %v4394_v28  ;;  %v3446_v19 = vpop.f32.mrb[35].mxu0  ;;  %v3451_v63 = vpop.f32.mrb[41].mxu1 }
0x102d   :  { %v1961_v0 = vpop.f32.mrb[42].mxu1 }
0x102e   :  { %v3452_v1 = vpop.f32.mrb[43].mxu1 }
0x1031   :  { %v2011_v2 = vpop.f32.mrb[36].mxu0 }
0x1032   :  { %v2069_v4 = vmul.f32 0.125, %v2011_v2  ;;  %v3457_v57 = vpop.f32.mrb[37].mxu0  ;;  %v3093_v2 = vld [vmem:[%s4635_s7 + $0x1] ss:$0 sm:$0xff] }
0x1033   :  { %v2014_v5 = vpop.f32.mrb[38].mxu0  ;;  %v2063_v7 = vpop.f32.mrb[44].mxu1 }
0x1034   :  { %v2070_v9 = vmul.f32 0.125, %v2063_v7  ;;  %v3458_v10 = vpop.f32.mrb[39].mxu0  ;;  %v3463_v16 = vpop.f32.mrb[45].mxu1  ;;  %v2071_v11 = vadd.f32 %v2069_v4, %v4023_v35 }
0x1035   :  { %v2066_v12 = vpop.f32.mrb[46].mxu1 }
0x1036   :  { %v3464_v13 = vpop.f32.mrb[47].mxu1  ;;  %v2073_v14 = vsel %vm520_vm3, %v2071_v11, -inf  ;;  %v2072_v15 = vadd.f32 %v2070_v9, %v4026_v39  ;;  %v3646_v12 = vld [vmem:[%s4636_s10 + $0x80] ss:$8 sps:$4 sm:$0xff]  }
0x1037   :  { %2074 = vmax.xlane.f32.xlu0 %v2073_v14  ;;  %v3648_v13 = vld [vmem:[%s4636_s10 + $0x84] ss:$8 sps:$4 sm:$0xff]   ;;  %v3651_v14 = vld [vmem:[%s4636_s10 + $0x94] ss:$8 sps:$4 sm:$0xff]  }
0x1038   :  { %v2076_v8 = vsel %vm520_vm3, %v2072_v15, -inf }
0x1039   :  { %2077 = vmax.xlane.f32.xlu1 %v2076_v8 }
0x104a   :  { %2147 = vrot.lane.b32.xlu1 %v4354_v6, %s3766_s1 }
0x10c4   :  { %v2075_v17 = vpop.xlane.xlu0 %2074 }
0x10c5   :  { %v2079_v18 = vsub.f32 %v2071_v11, %v2075_v17 }
0x10c6   :  { %v2078_v21 = vpop.xlane.xlu1 %2077 }
0x10c7   :  { %v2081_v22 = vmul.f32 1.442695, %v2079_v18  ;;  %v2080_v25 = vsub.f32 %v2072_v15, %v2078_v21 }
0x10c9   :  { %3738 = vpow2.f32 %v2081_v22  ;;  %v2083_v35 = vmul.f32 1.442695, %v2080_v25 }
0x10ca   :  { %v2148_v26 = vpop.permute.xlu1 %2147 }
0x10cb   :  { %3740 = vpow2.f32 %v2083_v35  ;;  %v2153_v27 = vsel %vm548_vm2, %v2148_v26, 0  ;;  %v3654_v35 = vld [vmem:[%s4636_s10 + $0xa4] ss:$8 sps:$4 sm:$0xff]   ;;  %v3652_v26 = vld [vmem:[%s4636_s10 + $0xa0] ss:$8 sps:$4 sm:$0xff]  }
0x10cc   :  { %3472 = vmatpush3.bf16.msra.mxu1 %v2153_v27  ;;  %v3657_v27 = vld [vmem:[%s4636_s10 + $0xb4] ss:$8 sps:$4 sm:$0xff]  }
0x10cd   :  { %3489 = vmatprep.subr.bf16.mxu1 %v3762_v3 }
0x10d3   :  { %v3739_v39 = vpop.eup %3738 }
0x10d4   :  { %v2085_v31 = vsel %vm520_vm3, %v3739_v39, 0.0 }
0x10d5   :  { %v3741_v32 = vpop.eup %3740  ;;  %2086 = vadd.xlane.f32.xlu0 %v2085_v31  ;;  %v3660_v31 = vld [vmem:[%s4636_s10 + $0xc4] ss:$8 sps:$4 sm:$0xff]  }
0x10d6   :  { %v2088_v6 = vsel %vm520_vm3, %v3741_v32, 0.0 }
0x10d9   :  { %2089 = vadd.xlane.f32.xlu0 %v2088_v6  ;;  %v3663_v6 = vld [vmem:[%s4636_s10 + $0xd4] ss:$8 sps:$4 sm:$0xff]  }
0x10ef   :  { %2098 = vrot.lane.b32.xlu0 %v4351_v54, %s3766_s1  ;;  %v3638_v54 = vld [vmem:[%s4634_s6 + $0x40] sm:$0xff]  }
0x1162   :  { %v2087_v33 = vpop.xlane.xlu0 %2086 }
0x1163   :  { %3742 = vrcp.f32 %v2087_v33  ;;  %v3661_v33 = vld [vmem:[%s4636_s10 + $0xd0] ss:$8 sps:$4 sm:$0xff]  }
0x1166   :  { %v2090_v34 = vpop.xlane.xlu0 %2089 }
0x1167   :  { %3744 = vrcp.f32 %v2090_v34  ;;  %v3666_v34 = vld [vmem:[%s4636_s10 + $0xe4] ss:$8 sps:$4 sm:$0xff]  }
0x116a   :  { %v2099_v36 = vpop.permute.xlu0 %2098 }
0x116b   :  { %v2104_v37 = vsel %vm548_vm2, %v2099_v36, 0  ;;  %v3664_v36 = vld [vmem:[%s4636_s10 + $0xe0] ss:$8 sps:$4 sm:$0xff]  }
0x116c   :  { %3466 = vmatpush3.bf16.msra.mxu0 %v2104_v37  ;;  %v3669_v37 = vld [vmem:[%s4636_s10 + $0xf4] ss:$8 sps:$4 sm:$0xff]  }
0x116d   :  { %v3743_v38 = vpop.eup %3742  ;;  %3477 = vmatprep.subr.bf16.mxu0 %v3762_v3 }
0x116e   :  { %v2093_v40 = vmul.f32 %v3743_v38, %v3739_v39  ;;  %v3655_v39 = vld [vmem:[%s4636_s10 + $0xb0] ss:$8 sps:$4 sm:$0xff]  }
0x116f   :  { %v3667_v38 = vld [vmem:[%s4636_s10 + $0xf0] ss:$8 sps:$4 sm:$0xff]  }
0x1170   :  { %v2095_v42 = vpack.c.bf16 %v2093_v40, %v2093_v40 }
0x1171   :  { %v3745_v43 = vpop.eup %3744 }
0x1172   :  { %v2094_v44 = vmul.f32 %v3745_v43, %v3741_v32  ;;  %3468 = vmatmul.mubr.msk.bf16.vlgmr.msra.gmra.mrb[40].mxu0 %vm520_vm3, %v2095_v42  ;;  %v3658_v32 = vld [vmem:[%s4636_s10 + $0xc0] ss:$8 sps:$4 sm:$0xff]  }
0x1173   :  { %3478 = vmatpush3.bf16.msra.mxu0 %v3642_v41  ;;  %3485 = vmatprep.mubr.msk.bf16.mxu0 %vm3764_vm0, %v3762_v3 }
0x1174   :  { %v2096_v45 = vpack.c.bf16 %v2094_v44, %v2094_v44  ;;  %3479 = vmatprep.subr.bf16.mxu0 %v3762_v3 }
0x1176   :  { %3474 = vmatmul.mubr.msk.bf16.vlgmr.msra.gmra.mrb[48].mxu1 %vm520_vm3, %v2096_v45 }
0x1177   :  { %3490 = vmatpush3.bf16.msra.mxu1 %v3638_v54  ;;  %3497 = vmatprep.mubr.msk.bf16.mxu1 %vm3764_vm0, %v3762_v3 }
0x1178   :  { %3491 = vmatprep.subr.bf16.mxu1 %v3762_v3  ;;  %3480 = vmatpush3.bf16.msra.mxu0 %v3643_v23  ;;  %v3096_v23 = vld [vmem:[%s4637_s8 + $0x1] ss:$0 sm:$0xff] }
0x1179   :  { %3481 = vmatprep.subr.bf16.mxu0 %v3762_v3 }
0x117b   :  { %3492 = vmatpush3.bf16.msra.mxu1 %v3639_v24 }
0x117c   :  { %3493 = vmatprep.subr.bf16.mxu1 %v3762_v3  ;;  %3482 = vmatpush3.bf16.msra.mxu0 %v3644_v50 }
0x117d   :  { %3483 = vmatprep.subr.bf16.mxu0 %v3762_v3 }
0x117f   :  { %3494 = vmatpush3.bf16.msra.mxu1 %v3640_v47 }
0x1180   :  { %3495 = vmatprep.subr.bf16.mxu1 %v3762_v3  ;;  %3484 = vmatpush3.bf16.msra.mxu0 %v3645_v51  ;;  %v3097_v51 = vld [vmem:[%s4638_s9 + $0x1] ss:$0 sm:$0xff] }
0x1181   :  { %2497 = vmatprep.subr.bf16.mxu0 %v3648_v13 }
0x1183   :  { %3496 = vmatpush3.bf16.msra.mxu1 %v3641_v48 }
0x1186   :  { %3498 = vmatmul.mubr.msk.bf16.vlgmr.msra.gmra.mrb[52].mxu1 %vm413_vm1, %v1964_v62 }
0x1245   :  { %v2140_v49 = vpop.f32.mrb[40].mxu0 }
0x1246   :  { %v3469_v52 = vpop.f32.mrb[41].mxu0 }
0x1247   :  { %v2143_v53 = vpop.f32.mrb[42].mxu0 }
0x1248   :  { %v3470_v56 = vpop.f32.mrb[43].mxu0 }
0x1249   :  { %v2189_v58 = vpop.f32.mrb[48].mxu1 }
0x124a   :  { %v2195_v28 = vpack.c.bf16 %v2189_v58, %v2140_v49  ;;  %v3475_v29 = vpop.f32.mrb[49].mxu1  ;;  %v3670_v58 = vld [vmem:[%s4639_s12 + $0xc0] sm:$0xff]  }
0x124b   :  { %v2192_v60 = vpop.f32.mrb[50].mxu1  ;;  %3286 = vmatprep.subr.bf16.mxu1 %v3670_v58  ;;  %v3672_v29 = vld [vmem:[%s4639_s12 + $0xc8] sm:$0xff]  }
0x124c   :  { %v3476_v61 = vpop.f32.mrb[51].mxu1  ;;  %3486 = vmatmul.mubr.msk.bf16.vlgmr.msra.gmra.mrb[44].mxu0 %vm413_vm1, %v2195_v28  ;;  %v3671_v28 = vld [vmem:[%s4639_s12 + $0x80] sm:$0xff]   ;;  %v3673_v60 = vld [vmem:[%s4639_s12 + $0x88] sm:$0xff]  }
0x124d   :  { %2529 = vmatprep.mubr.bf16.mxu0 %v3763_v30  ;;  %2498 = vmatpush1.bf16.msra.mxu0 %v3646_v12  ;;  %v3674_v61 = vld [vmem:[%s4639_s12 + $0xd0] sm:$0xff]  }
0x124e   :  { %2499 = vmatprep.subr.bf16.mxu0 %v3651_v14  ;;  %3287 = vmatpush3.bf16.msra.mxu1 %v3671_v28 }
0x124f   :  { %3288 = vmatprep.subr.bf16.mxu1 %v3672_v29 }
0x1252   :  { %3289 = vmatpush3.bf16.msra.mxu1 %v3673_v60 }
0x1253   :  { %3290 = vmatprep.subr.bf16.mxu1 %v3674_v61 }
0x1259   :  { %v2325_v62 = vpop.f32.mrb[52].mxu1 }
0x125a   :  { %v3499_v19 = vpop.f32.mrb[53].mxu1 }
0x125b   :  { %v2328_v63 = vpop.f32.mrb[54].mxu1  ;;  %v3676_v19 = vld [vmem:[%s4639_s12 + $0xd8] sm:$0xff]  }
0x125c   :  { %v3500_v0 = vpop.f32.mrb[55].mxu1 }
0x125d   :  { %v3678_v0 = vld [vmem:[%s4639_s12 + $0xe0] sm:$0xff]  }
0x131f   :  { %v2257_v1 = vpop.f32.mrb[44].mxu0 }
0x1320   :  { %v2326_v4 = vadd.f32 %v2325_v62, %v2257_v1  ;;  %v3487_v57 = vpop.f32.mrb[45].mxu0  ;;  %v3675_v62 = vld [vmem:[%s4639_s12 + $0x90] sm:$0xff]   ;;  %v3679_v1 = vld [vmem:[%s4639_s12 + $0xa0] sm:$0xff]  }
0x1321   :  { %v2260_v5 = vpop.f32.mrb[46].mxu0  ;;  %3291 = vmatpush3.bf16.msra.mxu1 %v3675_v62  ;;  %v3682_v57 = vld [vmem:[%s4639_s12 + $0xf0] sm:$0xff]   ;;  %v3164_v62 = vld [vmem:[%s4641_s13 + $0x1] ss:$0 sm:$0xff] }
0x1322   :  { %v2340_v7 = vadd.f32 %v3093_v2, %v2326_v4  ;;  %v2329_v9 = vadd.f32 %v2328_v63, %v2260_v5  ;;  %v3488_v10 = vpop.f32.mrb[47].mxu0  ;;  %v3677_v63 = vld [vmem:[%s4639_s12 + $0x98] sm:$0xff]   ;;  %3292 = vmatprep.subr.bf16.mxu1 %v3676_v19  ;;  %v3681_v4 = vld [vmem:[%s4639_s12 + $0xa8] sm:$0xff]   ;;  %v3683_v5 = vld [vmem:[%s4639_s12 + $0xb0] sm:$0xff]  }
0x1323   :  { %v3114_v10 = vld [vmem:[%s4640_s11 + $0x2] sm:$0x3] }
0x1324   :  { %v2341_v16 = vadd.f32 %v3093_v2, %v2329_v9  ;;  %v2342_v11 = vadd.f32 %v2340_v7, %v4331_v46  ;;  %v3649_v46 = vld [vmem:[%s4636_s10 + $0x90] ss:$8 sps:$4 sm:$0xff]   ;;  %v3680_v2 = vld [vmem:[%s4639_s12 + $0xe8] sm:$0xff]  }
0x1325   :  { %2500 = vmatpush1.bf16.msra.mxu0 %v3649_v46  ;;  %3293 = vmatpush3.bf16.msra.mxu1 %v3677_v63  ;;  %v3684_v7 = vld [vmem:[%s4639_s12 + $0xf8] sm:$0xff]  }
0x1326   :  { %2348 = vadd.xlane.f32.xlu1 %v2342_v11  ;;  %v2343_v30 = vadd.f32 %v2341_v16, %v4333_v20  ;;  %2501 = vmatprep.subr.bf16.mxu0 %v3654_v35  ;;  %v3685_v9 = vld [vmem:[%s4639_s12 + $0xb8] sm:$0xff]   ;;  %v2410_v16 = vrot.slane %v3114_v10, %v3990_v59 }
0x1327   :  { %3294 = vmatprep.subr.bf16.mxu1 %v3678_v0 }
0x1328   :  { %2350 = vadd.xlane.f32.xlu0 %v2343_v30 }
0x1329   :  { %2502 = vmatpush1.bf16.msra.mxu0 %v3652_v26  ;;  %3295 = vmatpush3.bf16.msra.mxu1 %v3679_v1 }
0x132a   :  { %2503 = vmatprep.subr.bf16.mxu0 %v3657_v27  ;;  %3296 = vmatprep.subr.bf16.mxu1 %v3680_v2 }
0x132d   :  { %2504 = vmatpush1.bf16.msra.mxu0 %v3655_v39  ;;  %3297 = vmatpush3.bf16.msra.mxu1 %v3681_v4 }
0x132e   :  { %2505 = vmatprep.subr.bf16.mxu0 %v3660_v31  ;;  %3298 = vmatprep.subr.bf16.mxu1 %v3682_v57 }
0x1331   :  { %2506 = vmatpush1.bf16.msra.mxu0 %v3658_v32  ;;  %3299 = vmatpush3.bf16.msra.mxu1 %v3683_v5 }
0x1332   :  { %2507 = vmatprep.subr.bf16.mxu0 %v3663_v6  ;;  %3300 = vmatprep.subr.bf16.mxu1 %v3684_v7 }
0x1335   :  { %2508 = vmatpush1.bf16.msra.mxu0 %v3661_v33  ;;  %3301 = vmatpush3.bf16.msra.mxu1 %v3685_v9  ;;  %v3686_v9 = vld [vmem:[%s4644_s16] sm:$0xff]  }
0x1336   :  { %2509 = vmatprep.subr.bf16.mxu0 %v3666_v34 }
0x1339   :  { %2510 = vmatpush1.bf16.msra.mxu0 %v3664_v36 }
0x133a   :  { %2511 = vmatprep.subr.bf16.mxu0 %v3669_v37 }
0x133d   :  { %2512 = vmatpush1.bf16.msra.mxu0 %v3667_v38 }
0x133e   :  { %3501 = vmatprep.subr.bf16.mxu0 %v3762_v3 }
0x13b3   :  { %v2349_v20 = vpop.xlane.xlu1 %2348 }
0x13b4   :  { %v2352_v15 = vmul.f32 0.0078125, %v2349_v20 }
0x13b5   :  { %v2351_v8 = vpop.xlane.xlu0 %2350 }
0x13b6   :  { %v2354_v17 = vsub.f32 %v2342_v11, %v2352_v15  ;;  %v2353_v18 = vmul.f32 0.0078125, %v2351_v8  ;;  %v2414_v11 = vrot.slane %v3114_v10, %v3982_v55  ;;  %v3687_v10 = vld [vmem:[%s4644_s16 + $0x8] sm:$0xff]  }
0x13b8   :  { %v2355_v21 = vsub.f32 %v2343_v30, %v2353_v18  ;;  %v2356_v22 = vmul.f32 %v2354_v17, %v2354_v17 }
0x13ba   :  { %2358 = vadd.xlane.f32.xlu0 %v2356_v22  ;;  %v2357_v25 = vmul.f32 %v2355_v21, %v2355_v21 }
0x13bc   :  { %2360 = vadd.xlane.f32.xlu1 %v2357_v25 }
0x1447   :  { %v2359_v40 = vpop.xlane.xlu0 %2358 }
0x1448   :  { %v2362_v41 = vmul.f32 0.0078125, %v2359_v40 }
0x1449   :  { %v2361_v42 = vpop.xlane.xlu1 %2360 }
0x144a   :  { %v2364_v43 = vadd.f32 1e-12, %v2362_v41  ;;  %v2363_v44 = vmul.f32 0.0078125, %v2361_v42 }
0x144c   :  { %3746 = vrsqrt.f32 %v2364_v43  ;;  %v2365_v54 = vadd.f32 1e-12, %v2363_v44 }
0x144e   :  { %3748 = vrsqrt.f32 %v2365_v54 }
0x1456   :  { %v3747_v45 = vpop.eup %3746 }
0x1457   :  { %v2368_v24 = vmul.f32 %v3747_v45, %v2354_v17 }
0x1458   :  { %v3749_v47 = vpop.eup %3748 }
0x1459   :  { %v2369_v48 = vmul.f32 %v3749_v47, %v2355_v21  ;;  %v2376_v50 = vmul.f32 %v3096_v23, %v2368_v24 }
0x145b   :  { %v2377_v49 = vmul.f32 %v3096_v23, %v2369_v48  ;;  %v4516_v52 = vadd.f32 %v3097_v51, %v2376_v50 }
0x145d   :  { %v4518_v53 = vadd.f32 %v3097_v51, %v2377_v49 }
0x145f   :  { %v2386_v56 = vpack.c.bf16 %v4518_v53, %v4516_v52 }
0x1461   :  { %2530 = vmatmul.mubr.bf16.vlgmr.msra.gmra.mrb[48].mxu0 %v2386_v56 }
0x1462   :  { %3517 = vmatprep.mubr.msk.bf16.mxu0 %vm3764_vm0, %v3762_v3  ;;  %3502 = vmatpush3.bf16.msra.mxu0 %v3686_v9 }
0x1463   :  { %3503 = vmatprep.subr.bf16.mxu0 %v3762_v3 }
0x1466   :  { %3504 = vmatpush3.bf16.msra.mxu0 %v3687_v10 }
0x1467   :  { %3505 = vmatprep.subr.bf16.mxu0 %v3762_v3 }
0x1534   :  { %v2531_v30 = vpop.f32.mrb[48].mxu0 }
0x1535   :  { %v2532_v12 = vadd.f32 %v2531_v30, %v2410_v16  ;;  %v2533_v13 = vpop.f32.mrb[49].mxu0 }
0x1536   :  { %v2534_v14 = vadd.f32 %v2533_v13, %v2414_v11  ;;  %v2535_v46 = vpop.f32.mrb[50].mxu0 }
0x1537   :  { %v2544_v20 = vmul.f32 0.044715, %v2532_v12  ;;  %v2536_v15 = vadd.f32 %v2535_v46, %v2410_v16  ;;  %v2537_v8 = vpop.f32.mrb[51].mxu0  ;;  %v2540_v23 = vmul.f32 0.5, %v2532_v12  ;;  %v3688_v46 = vld [vmem:[%s4644_s16 + $0x10] sm:$0xff]  }
0x1538   :  { %v2545_v17 = vmul.f32 0.044715, %v2534_v14  ;;  %v2538_v18 = vadd.f32 %v2537_v8, %v2414_v11  ;;  %v2541_v48 = vmul.f32 0.5, %v2534_v14  ;;  %3506 = vmatpush3.bf16.msra.mxu0 %v3688_v46  ;;  %v3691_v8 = vld [vmem:[%s4644_s16 + $0x28] sm:$0xff]  }
0x1539   :  { %v2548_v21 = vmul.f32 %v2544_v20, %v2532_v12  ;;  %v2546_v22 = vmul.f32 0.044715, %v2536_v15  ;;  %v2542_v24 = vmul.f32 0.5, %v2536_v15  ;;  %3507 = vmatprep.subr.bf16.mxu0 %v3762_v3  ;;  %v3689_v20 = vld [vmem:[%s4644_s16 + $0x18] sm:$0xff]  }
0x153a   :  { %v2549_v25 = vmul.f32 %v2545_v17, %v2534_v14  ;;  %v2547_v35 = vmul.f32 0.044715, %v2538_v18  ;;  %v2543_v50 = vmul.f32 0.5, %v2538_v18  ;;  %v3692_v17 = vld [vmem:[%s4644_s16 + $0x30] sm:$0xff]  }
0x153b   :  { %v2552_v26 = vmul.f32 %v2548_v21, %v2532_v12  ;;  %v2550_v27 = vmul.f32 %v2546_v22, %v2536_v15 }
0x153c   :  { %v2553_v39 = vmul.f32 %v2549_v25, %v2534_v14  ;;  %v2551_v59 = vmul.f32 %v2547_v35, %v2538_v18  ;;  %3508 = vmatpush3.bf16.msra.mxu0 %v3689_v20 }
0x153d   :  { %v2556_v31 = vadd.f32 %v2552_v26, %v2532_v12  ;;  %v2554_v55 = vmul.f32 %v2550_v27, %v2536_v15  ;;  %3509 = vmatprep.subr.bf16.mxu0 %v3762_v3 }
0x153e   :  { %v2555_v32 = vmul.f32 %v2551_v59, %v2538_v18  ;;  %v2557_v6 = vadd.f32 %v2553_v39, %v2534_v14  ;;  %v3183_v59 = vld [vmem:[%s4642_s14 + $0x1] ss:$0 sm:$0xff] }
0x153f   :  { %v2560_v33 = vmul.f32 0.7978846, %v2556_v31  ;;  %v2558_v34 = vadd.f32 %v2554_v55, %v2536_v15  ;;  %v3690_v15 = vld [vmem:[%s4644_s16 + $0x20] sm:$0xff]  }
0x1540   :  { %v2559_v36 = vadd.f32 %v2555_v32, %v2538_v18  ;;  %v2561_v37 = vmul.f32 0.7978846, %v2557_v6  ;;  %3510 = vmatpush3.bf16.msra.mxu0 %v3690_v15  ;;  %v3693_v18 = vld [vmem:[%s4644_s16 + $0x38] sm:$0xff]  }
0x1541   :  { %3750 = vtanh.f32 %v2560_v33  ;;  %v2562_v38 = vmul.f32 0.7978846, %v2558_v34  ;;  %3511 = vmatprep.subr.bf16.mxu0 %v3762_v3 }
0x1542   :  { %v2563_v40 = vmul.f32 0.7978846, %v2559_v36  ;;  %3752 = vtanh.f32 %v2561_v37 }
0x1543   :  { %3754 = vtanh.f32 %v2562_v38  ;;  %v3185_v38 = vld [vmem:[%s4645_s17] ss:$0 sm:$0xff] }
0x1544   :  { %3756 = vtanh.f32 %v2563_v40  ;;  %3512 = vmatpush3.bf16.msra.mxu0 %v3691_v8 }
0x1545   :  { %3513 = vmatprep.subr.bf16.mxu0 %v3762_v3 }
0x1548   :  { %3514 = vmatpush3.bf16.msra.mxu0 %v3692_v17 }
0x1549   :  { %3515 = vmatprep.subr.bf16.mxu0 %v3762_v3  ;;  %v3184_v3 = vld [vmem:[%s4643_s15 + $0x1] ss:$0 sm:$0xff] }
0x154b   :  { %v3751_v41 = vpop.eup %3750 }
0x154c   :  { %v3753_v42 = vpop.eup %3752  ;;  %v2568_v43 = vadd.f32 1.0, %v3751_v41  ;;  %3516 = vmatpush3.bf16.msra.mxu0 %v3693_v18 }
0x154d   :  { %v3755_v44 = vpop.eup %3754  ;;  %v2569_v54 = vadd.f32 1.0, %v3753_v42 }
0x154e   :  { %v3757_v45 = vpop.eup %3756  ;;  %v2570_v47 = vadd.f32 1.0, %v3755_v44  ;;  %v2572_v49 = vmul.f32 %v2568_v43, %v2540_v23 }
0x154f   :  { %v2571_v51 = vadd.f32 1.0, %v3757_v45  ;;  %v2573_v58 = vmul.f32 %v2569_v54, %v2541_v48 }
0x1550   :  { %v2574_v56 = vmul.f32 %v2570_v47, %v2542_v24 }
0x1551   :  { %v2575_v28 = vmul.f32 %v2571_v51, %v2543_v50 }
0x1552   :  { %v2576_v29 = vpack.c.bf16 %v2574_v56, %v2572_v49 }
0x1553   :  { %v2577_v60 = vpack.c.bf16 %v2575_v28, %v2573_v58 }
0x1555   :  { %2747 = vmatprep.mubr.bf16.mxu1 %v2577_v60 }
0x1556   :  { %2748 = vmatmul.mubr.bf16.vlgmr.msra.gmra.mrb[56].mxu1 %v2576_v29 }
0x1629   :  { %v3302_v61 = vpop.f32.mrb[56].mxu1 }
0x162a   :  { %v3303_v19 = vpop.f32.mrb[57].mxu1 }
0x162b   :  { %v3304_v63 = vadd.f32 %v3303_v19, %v3302_v61  ;;  %v3305_v0 = vpop.f32.mrb[58].mxu1 }
0x162c   :  { %v3306_v1 = vpop.f32.mrb[59].mxu1 }
0x162d   :  { %v2750_v2 = vadd.f32 %v3304_v63, %v3164_v62  ;;  %v3307_v4 = vadd.f32 %v3306_v1, %v3305_v0 }
0x162f   :  { %v2753_v57 = vadd.f32 %v3307_v4, %v3164_v62  ;;  %v2756_v5 = vadd.f32 %v2750_v2, %v4516_v52 }
0x1631   :  { %2762 = vadd.xlane.f32.xlu0 %v2756_v5  ;;  %v2757_v7 = vadd.f32 %v2753_v57, %v4518_v53 }
0x1633   :  { %2764 = vadd.xlane.f32.xlu1 %v2757_v7 }
0x16be   :  { %v2763_v16 = vpop.xlane.xlu0 %2762 }
0x16bf   :  { %v2766_v52 = vmul.f32 0.0078125, %v2763_v16 }
0x16c0   :  { %v2765_v11 = vpop.xlane.xlu1 %2764 }
0x16c1   :  { %v2768_v30 = vsub.f32 %v2756_v5, %v2766_v52  ;;  %v2767_v53 = vmul.f32 0.0078125, %v2765_v11 }
0x16c3   :  { %v2769_v12 = vsub.f32 %v2757_v7, %v2767_v53  ;;  %v2770_v13 = vmul.f32 %v2768_v30, %v2768_v30 }
0x16c5   :  { %2772 = vadd.xlane.f32.xlu0 %v2770_v13  ;;  %v2771_v14 = vmul.f32 %v2769_v12, %v2769_v12 }
0x16c7   :  { %2774 = vadd.xlane.f32.xlu1 %v2771_v14 }
0x1752   :  { %v2773_v21 = vpop.xlane.xlu0 %2772 }
0x1753   :  { %v2776_v22 = vmul.f32 0.0078125, %v2773_v21 }
0x1754   :  { %v2775_v25 = vpop.xlane.xlu1 %2774 }
0x1755   :  { %v2778_v35 = vadd.f32 1e-12, %v2776_v22  ;;  %v2777_v26 = vmul.f32 0.0078125, %v2775_v25 }
0x1757   :  { %3758 = vrsqrt.f32 %v2778_v35  ;;  %v2779_v27 = vadd.f32 1e-12, %v2777_v26 }
0x1759   :  { %3760 = vrsqrt.f32 %v2779_v27 }
0x1761   :  { %v3759_v39 = vpop.eup %3758 }
0x1762   :  { %v2782_v31 = vmul.f32 %v3759_v39, %v2768_v30 }
0x1763   :  { %v3761_v55 = vpop.eup %3760 }
0x1764   :  { %v2783_v32 = vmul.f32 %v3761_v55, %v2769_v12  ;;  %v2790_v6 = vmul.f32 %v3183_v59, %v2782_v31 }
0x1766   :  { %v2791_v33 = vmul.f32 %v3183_v59, %v2783_v32  ;;  %v2798_v34 = vadd.f32 %v3184_v3, %v2790_v6 }
0x1768   :  { %v2799_v36 = vadd.f32 %v3184_v3, %v2791_v33 }
0x176a   :  { %v2800_v37 = vpack.c.bf16 %v2799_v36, %v2798_v34 }
0x176c   :  { %3518 = vmatmul.mubr.bf16.vlgmr.msra.gmra.mrb[52].mxu0 %v2800_v37 }
0x183f   :  { %v2906_v40 = vpop.f32.mrb[52].mxu0 }
0x1840   :  { %v2907_v41 = vadd.f32 %v3185_v38, %v2906_v40  ;;  %v3519_v42 = vpop.f32.mrb[53].mxu0 }
0x1841   :  { %v2909_v43 = vpop.f32.mrb[54].mxu0 }
0x1842   :  { %2913 = vst [vmem:[%s4646_s18] sm:$0xff] %v2907_v41  ;;  %v2910_v44 = vadd.f32 %v3185_v38, %v2909_v43  ;;  %v3520_v54 = vpop.f32.mrb[55].mxu0 }
0x1844   :  { %2914 = vst [vmem:[%s4646_s18 + $0x8] sm:$0xff] %v2910_v44 }

</bundles_post_ra>
